<compile_context>
chip_gen: v6e
topology: v6e:2x2x1
jax: 0.10.0
libtpu: 0.0.40
codegen_flags: <defaults>
</compile_context>

<pallas_src>
import functools

import jax
import jax.numpy as jnp
from jax.experimental import pallas as pl
from jax.experimental.pallas import tpu as pltpu


def get_padding(kernel_size, mode="same"):
    if mode == "same":
        return (kernel_size - 1) // 2
    return 0


def _round_up(v, m):
    return ((v + m - 1) // m) * m


# ---------------------------------------------------------------------------
# kernel helpers
# ---------------------------------------------------------------------------

def _fill_scratch_interior(x_ref, xpad_ref, *, pad, wl):
    """Copy the (H, W, Cblk) input block into the padded scratch (input dtype).

    The left W-halo `wl` is rounded up to a multiple of 8 sublanes so this store is a
    full-width aligned vst (perf review: no masked partial stores)."""
    H, W = x_ref.shape[1], x_ref.shape[2]
    xpad_ref[pad:pad + H, wl:wl + W, :] = x_ref[0]


def _dwconv_tile(xpad_ref, w_ref, *, K, stride, dilation, pad, wl, Hout, Wout):
    """Depthwise conv of one padded tile; f32 accumulation on the VPU."""
    w = w_ref[...].astype(jnp.float32)                 # (K, K, Cblk): tiny, loaded once
    Cblk = w.shape[-1]
    acc = jnp.zeros((Hout, Wout, Cblk), jnp.float32)
    wbase = wl - pad                                   # first "real" padded column
    if stride == 1:
        for kh in range(K):
            # One aligned, full-width slab load per kernel row: K vld instead of K*K
            # sublane-misaligned window loads (perf review item).
            h0 = kh * dilation
            slab = xpad_ref[h0:h0 + Hout, :, :].astype(jnp.float32)
            for kw in range(K):
                s = wbase + kw * dilation
                # kw shift = in-register sublane shift of the already-loaded slab.
                acc = acc + slab[:, s:s + Wout, :] * w[kh, kw]
    else:
        # TODO(synk): phase-split the scratch along W for stride > 1 so these become
        # dense aligned loads instead of strided sublane reads.
        for kh in range(K):
            for kw in range(K):
                win = xpad_ref[pl.ds(kh * dilation, Hout, stride),
                               pl.ds(wbase + kw * dilation, Wout, stride), :]
                acc = acc + win.astype(jnp.float32) * w[kh, kw]
    return acc


def _conv_and_stats(x_ref, w_ref, stats_ref, xpad_ref, *, K, stride, dilation,
                    pad, wl, Hout, Wout, zero_halo):
    """Shared pass-1 body: padded copy -> conv -> accumulate sum / sum-of-squares."""
    j = pl.program_id(2)          # innermost ("arbitrary") batch-within-split axis

    @pl.when(j == 0)
    def _init_stats():
        stats_ref[...] = jnp.zeros_like(stats_ref)

    if zero_halo:
        # Halo zeros persist across the sequential batch sweep; the interior is fully
        # overwritten every step, so no per-step full-scratch zero fill (perf review).
        @pl.when(j == 0)
        def _init_halo():
            xpad_ref[...] = jnp.zeros_like(xpad_ref)

    _fill_scratch_interior(x_ref, xpad_ref, pad=pad, wl=wl)
    acc = _dwconv_tile(xpad_ref, w_ref, K=K, stride=stride, dilation=dilation,
                       pad=pad, wl=wl, Hout=Hout, Wout=Wout)

    s = jnp.sum(acc, axis=(0, 1), keepdims=True).reshape(1, -1)
    ss = jnp.sum(acc * acc, axis=(0, 1), keepdims=True).reshape(1, -1)
    stats_ref[0:1, :] = stats_ref[0:1, :] + s
    stats_ref[1:2, :] = stats_ref[1:2, :] + ss
    return acc


def _stats_store_kernel(x_ref, w_ref, stats_ref, conv_ref, xpad_ref, **params):
    """Pass 1 ("store" mode): also write the conv output so pass 2 is elementwise."""
    acc = _conv_and_stats(x_ref, w_ref, stats_ref, xpad_ref, **params)
    conv_ref[0] = acc.astype(conv_ref.dtype)


def _stats_only_kernel(x_ref, w_ref, stats_ref, xpad_ref, **params):
    """Pass 1 ("recompute" mode): stats only, conv recomputed in pass 2."""
    _conv_and_stats(x_ref, w_ref, stats_ref, xpad_ref, **params)


def _bn_act_kernel(conv_ref, scale_ref, shift_ref, o_ref):
    """Pass 2 ("store" mode): y = conv * scale + shift, ReLU. Pure elementwise."""
    y = conv_ref[0].astype(jnp.float32) * scale_ref[0, :] + shift_ref[0, :]
    o_ref[0] = jnp.maximum(y, 0.0).astype(o_ref.dtype)


def _conv_bn_act_kernel(x_ref, w_ref, scale_ref, shift_ref, o_ref, xpad_ref, *,
                        K, stride, dilation, pad, wl, Hout, Wout, zero_halo):
    """Pass 2 ("recompute" mode): conv recomputed, then scale/shift + ReLU."""
    if zero_halo:
        # Batch is the innermost "arbitrary" axis of this pass, so n == 0 is reached
        # on every core / channel block before the halo is read (megacore-safe).
        @pl.when(pl.program_id(1) == 0)
        def _init_halo():
            xpad_ref[...] = jnp.zeros_like(xpad_ref)

    _fill_scratch_interior(x_ref, xpad_ref, pad=pad, wl=wl)
    acc = _dwconv_tile(xpad_ref, w_ref, K=K, stride=stride, dilation=dilation,
                       pad=pad, wl=wl, Hout=Hout, Wout=Wout)
    y = acc * scale_ref[0, :] + shift_ref[0, :]
    o_ref[0] = jnp.maximum(y, 0.0).astype(o_ref.dtype)


# ---------------------------------------------------------------------------
# wrapper
# ---------------------------------------------------------------------------

def _pick_two_pass_mode():
    """'store' writes the conv output to HBM in pass 1 (pass 2 elementwise) — best on
    compute/vld-bound v6e/v7x.  'recompute' re-runs the conv in pass 2 — best on
    HBM-bound v5e and older (perf review: keep the decision generation-specific)."""
    try:
        kind = jax.devices()[0].device_kind.lower()
    except Exception:
        return "store"
    for tag in ("v2", "v3", "v4", "v5"):
        if tag in kind:
            return "recompute"
    return "store"


def _vmem_limit(need_bytes):
    """Per-pass VMEM limit: estimated need + margin, kept under v7x's 64 MiB VMEM."""
    need = int(need_bytes) + (4 << 20)          # margin for Mosaic internal scratch
    cap = 56 << 20                              # headroom below 64 MiB physical (v7x)
    return need if need > cap else max(need, 8 << 20)


def depthwise_conv_bn_act(x_nchw, weight, gamma, beta, *, kernel_size, stride=1,
                          dilation=1, eps=1e-5, two_pass_mode=None):
    """x_nchw: (N, C, H, W); weight: (C, 1, kh, kw) (PyTorch depthwise layout)."""
    if two_pass_mode is None:
        two_pass_mode = _pick_two_pass_mode()
    assert two_pass_mode in ("store", "recompute")

    N, C, H, W = x_nchw.shape
    K = kernel_size
    pad = get_padding(K)
    Hout = (H + 2 * pad - dilation * (K - 1) - 1) // stride + 1
    Wout = (W + 2 * pad - dilation * (K - 1) - 1) // stride + 1

    # Padded scratch geometry: left W-halo rounded up to 8 sublanes so the interior
    # store and the per-row slab loads are aligned; W extent rounded to a sublane tile.
    wl = _round_up(pad, 8) if pad > 0 else 0
    Hp = H + 2 * pad
    Wtot = _round_up(wl + W + pad, 8)

    # Channel blocking: 128-lane blocks when possible; small C keeps full extent
    # (allowed by the (8,128) rule) to avoid inflating HBM traffic.
    # TODO(synk): for C < 128 fold batch / channel groups onto the 128 lanes.
    if C % 128 == 0:
        CP, Cblk = C, 128
    elif C < 128:
        CP, Cblk = C, C
    else:
        CP, Cblk = _round_up(C, 128), 128
    n_cblk = CP // Cblk

    # Pass-1 batch split: second parallel axis so both v7x TCs have work when n_cblk==1.
    n_split = 2 if (n_cblk == 1 and N >= 2 and N % 2 == 0) else 1
    nper = N // n_split

    # Layout glue: NCHW -> NHWC; channel padding only when needed.
    # TODO(synk): keep NHWC end-to-end (or in-kernel einshape) to drop these HBM passes.
    x = jnp.transpose(x_nchw, (0, 2, 3, 1))
    w = jnp.transpose(weight[:, 0, :, :], (1, 2, 0))       # (K, K, C)
    g = gamma.astype(jnp.float32)
    b = beta.astype(jnp.float32)
    if CP != C:
        x = jnp.pad(x, ((0, 0), (0, 0), (0, 0), (0, CP - C)))
        w = jnp.pad(w, ((0, 0), (0, 0), (0, CP - C)))
        g = jnp.pad(g, (0, CP - C))
        b = jnp.pad(b, (0, CP - C))

    out_dtype = x_nchw.dtype
    inter_dtype = jnp.bfloat16 if x.dtype == jnp.bfloat16 else jnp.float32
    x_itm = x.dtype.itemsize
    w_itm = w.dtype.itemsize
    inter_itm = jnp.dtype(inter_dtype).itemsize
    out_itm = jnp.dtype(out_dtype).itemsize

    common = dict(K=K, stride=stride, dilation=dilation, pad=pad, wl=wl,
                  Hout=Hout, Wout=Wout, zero_halo=(pad > 0))

    # ---- pass 1: conv -> per-channel sum / sum-of-squares (+ conv out in store mode)
    x_spec = pl.BlockSpec((1, H, W, Cblk), lambda s, c, j: (s * nper + j, 0, 0, c))
    w_spec = pl.BlockSpec((K, K, Cblk), lambda s, c, j: (0, 0, c))
    stats_spec = pl.BlockSpec((None, 2, Cblk), lambda s, c, j: (s, 0, c))
    stats_shape = jax.ShapeDtypeStruct((n_split, 2, CP), jnp.float32)

    need1 = (2 * H * W * Cblk * x_itm           # x block, double buffered
             + 2 * K * K * Cblk * w_itm         # weights
             + 2 * 2 * Cblk * 4                 # stats block
             + Hp * Wtot * Cblk * x_itm)        # padded scratch (single buffer)

    if two_pass_mode == "store":
        conv_spec = pl.BlockSpec((1, Hout, Wout, Cblk),
                                 lambda s, c, j: (s * nper + j, 0, 0, c))
        conv_shape = jax.ShapeDtypeStruct((N, Hout, Wout, CP), inter_dtype)
        need1 += 2 * Hout * Wout * Cblk * inter_itm
        stats3, conv = pl.pallas_call(
            functools.partial(_stats_store_kernel, **common),
            out_shape=(stats_shape, conv_shape),
            grid_spec=pltpu.PrefetchScalarGridSpec(
                num_scalar_prefetch=0,
                grid=(n_split, n_cblk, nper),   # BN reduction (batch) axis last
                in_specs=[x_spec, w_spec],
                out_specs=(stats_spec, conv_spec),
                scratch_shapes=[pltpu.VMEM((Hp, Wtot, Cblk), x.dtype)],
            ),
            compiler_params=pltpu.CompilerParams(
                dimension_semantics=("parallel", "parallel", "arbitrary"),
                vmem_limit_bytes=_vmem_limit(need1),
            ),
        )(x, w)
    else:
        conv = None
        stats3 = pl.pallas_call(
            functools.partial(_stats_only_kernel, **common),
            out_shape=stats_shape,
            grid_spec=pltpu.PrefetchScalarGridSpec(
                num_scalar_prefetch=0,
                grid=(n_split, n_cblk, nper),
                in_specs=[x_spec, w_spec],
                out_specs=stats_spec,
                scratch_shapes=[pltpu.VMEM((Hp, Wtot, Cblk), x.dtype)],
            ),
            compiler_params=pltpu.CompilerParams(
                dimension_semantics=("parallel", "parallel", "arbitrary"),
                vmem_limit_bytes=_vmem_limit(need1),
            ),
        )(x, w)

    # Fold BN into per-channel scale/shift once (tiny (CP,) math, rsqrt on EUP).
    # TODO(synk): E[x^2]-E[x]^2 in f32 can lose precision when |mean| >> std; switch to
    # a centered second pass / Welford if tolerances tighten.
    stats = jnp.sum(stats3, axis=0)                           # (2, CP)
    count = jnp.float32(N * Hout * Wout)
    mean = stats[0] / count
    var = jnp.maximum(stats[1] / count - mean * mean, 0.0)    # biased (training BN)
    scale = g * jax.lax.rsqrt(var + eps)
    shift = b - mean * scale
    scale2d = scale.reshape(1, CP)
    shift2d = shift.reshape(1, CP)

    # ---- pass 2 --------------------------------------------------------------
    if two_pass_mode == "store":
        need2 = (2 * Hout * Wout * Cblk * inter_itm
                 + 2 * 2 * Cblk * 4                        # scale + shift blocks
                 + 2 * Hout * Wout * Cblk * out_itm)
        io_alias = {0: 0} if jnp.dtype(inter_dtype) == jnp.dtype(out_dtype) else {}
        out_nhwc = pl.pallas_call(
            _bn_act_kernel,
            out_shape=jax.ShapeDtypeStruct((N, Hout, Wout, CP), out_dtype),
            grid_spec=pltpu.PrefetchScalarGridSpec(
                num_scalar_prefetch=0,
                grid=(n_cblk, N),
                in_specs=[
                    pl.BlockSpec((1, Hout, Wout, Cblk), lambda c, n: (n, 0, 0, c)),
                    pl.BlockSpec((1, Cblk), lambda c, n: (0, c)),
                    pl.BlockSpec((1, Cblk), lambda c, n: (0, c)),
                ],
                out_specs=pl.BlockSpec((1, Hout, Wout, Cblk),
                                       lambda c, n: (n, 0, 0, c)),
            ),
            compiler_params=pltpu.CompilerParams(
                dimension_semantics=("parallel", "parallel"),
                vmem_limit_bytes=_vmem_limit(need2),
            ),
            input_output_aliases=io_alias,        # update the conv buffer in place
        )(conv, scale2d, shift2d)
    else:
        need2 = (2 * H * W * Cblk * x_itm + 2 * K * K * Cblk * w_itm
                 + 2 * 2 * Cblk * 4
                 + Hp * Wtot * Cblk * x_itm
                 + 2 * Hout * Wout * Cblk * out_itm)
        out_nhwc = pl.pallas_call(
            functools.partial(_conv_bn_act_kernel, **common),
            out_shape=jax.ShapeDtypeStruct((N, Hout, Wout, CP), out_dtype),
            grid_spec=pltpu.PrefetchScalarGridSpec(
                num_scalar_prefetch=0,
                grid=(n_cblk, N),
                in_specs=[
                    pl.BlockSpec((1, H, W, Cblk), lambda c, n: (n, 0, 0, c)),
                    pl.BlockSpec((K, K, Cblk), lambda c, n: (0, 0, c)),
                    pl.BlockSpec((1, Cblk), lambda c, n: (0, c)),
                    pl.BlockSpec((1, Cblk), lambda c, n: (0, c)),
                ],
                out_specs=pl.BlockSpec((1, Hout, Wout, Cblk),
                                       lambda c, n: (n, 0, 0, c)),
                scratch_shapes=[pltpu.VMEM((Hp, Wtot, Cblk), x.dtype)],
            ),
            compiler_params=pltpu.CompilerParams(
                # Batch must be the innermost "arbitrary" axis so the once-per-block
                # halo zero at n == 0 is valid even under megacore sharding.
                dimension_semantics=("parallel", "arbitrary"),
                vmem_limit_bytes=_vmem_limit(need2),
            ),
        )(x, w, scale2d, shift2d)

    out_nhwc = out_nhwc[..., :C]                  # drop channel padding (if any)
    return jnp.transpose(out_nhwc, (0, 3, 1, 2))  # back to NCHW


# ---------------------------------------------------------------------------
# pure-JAX reference (mirrors PyTorch conv -> BN(train) -> ReLU)
# ---------------------------------------------------------------------------

def reference_nchw(x, weight, gamma, beta, *, kernel_size, stride=1, dilation=1, eps=1e-5):
    N, C, H, W = x.shape
    pad = get_padding(kernel_size)
    xp = jnp.pad(x, ((0, 0), (0, 0), (pad, pad), (pad, pad)))
    Hout = (H + 2 * pad - dilation * (kernel_size - 1) - 1) // stride + 1
    Wout = (W + 2 * pad - dilation * (kernel_size - 1) - 1) // stride + 1
    out = jnp.zeros((N, C, Hout, Wout), jnp.float32)
    for kh in range(kernel_size):
        for kw in range(kernel_size):
            h0, w0 = kh * dilation, kw * dilation
            win = xp[:, :,
                     h0:h0 + (Hout - 1) * stride + 1:stride,
                     w0:w0 + (Wout - 1) * stride + 1:stride]
            out = out + win * weight[:, 0, kh, kw][None, :, None, None]
    mean = out.mean(axis=(0, 2, 3), keepdims=True)
    var = ((out - mean) ** 2).mean(axis=(0, 2, 3), keepdims=True)
    y = (out - mean) / jnp.sqrt(var + eps)
    y = y * gamma[None, :, None, None] + beta[None, :, None, None]
    return jnp.maximum(y, 0.0)


if __name__ == "__main__":
    key = jax.random.PRNGKey(0)
    k_x, k_w, k_g, k_b = jax.random.split(key, 4)

    N, C, H, W = 2, 8, 16, 16
    kernel_size, stride, dilation = 3, 1, 1

    x = jax.random.normal(k_x, (N, C, H, W), jnp.float32)
    weight = jax.random.normal(k_w, (C, 1, kernel_size, kernel_size), jnp.float32) * 0.2
    gamma = 1.0 + 0.1 * jax.random.normal(k_g, (C,), jnp.float32)
    beta = 0.1 * jax.random.normal(k_b, (C,), jnp.float32)

    ref = reference_nchw(x, weight, gamma, beta, kernel_size=kernel_size,
                         stride=stride, dilation=dilation)

    pad = get_padding(kernel_size)
    Hout = (H + 2 * pad - dilation * (kernel_size - 1) - 1) // stride + 1
    Wout = (W + 2 * pad - dilation * (kernel_size - 1) - 1) // stride + 1

    # Exercise both generation-specific schemes ("store": v6e/v7x default;
    # "recompute": v5e-and-older default), so either auto-selected path is validated.
    for mode in ("store", "recompute"):
        out = depthwise_conv_bn_act(x, weight, gamma, beta,
                                    kernel_size=kernel_size, stride=stride,
                                    dilation=dilation, two_pass_mode=mode)
        out = jax.block_until_ready(out)
        assert out.shape == (N, C, Hout, Wout), (mode, out.shape)
        max_err = float(jnp.max(jnp.abs(out - ref)))
        assert jnp.allclose(out, ref, atol=5e-4, rtol=5e-4), (mode, max_err)

    print("KERNEL_OK")
</pallas_src>

<mosaic_0001>
module attributes {stable_mosaic.version = 11 : i64} {
  func.func @_stats_store_kernel(%arg0: i32, %arg1: i32, %arg2: i32, %arg3: memref<1x16x16x8xf32, #tpu.memory_space<vmem>>, %arg4: memref<3x3x8xf32, #tpu.memory_space<vmem>>, %arg5: memref<1x2x8xf32, #tpu.memory_space<vmem>>, %arg6: memref<1x16x16x8xf32, #tpu.memory_space<vmem>>, %arg7: memref<18x32x8xf32, #tpu.memory_space<vmem>>) attributes {dimension_semantics = [#tpu.dimension_semantics<parallel>, #tpu.dimension_semantics<parallel>, #tpu.dimension_semantics<arbitrary>], iteration_bounds = array<i64: 2, 1, 1>, scalar_prefetch = 0 : i64, scratch_operands = 1 : i64, tpu.core_type = #tpu.core_type<tc>, window_params = [{transform_indices = @transform_0, window_bounds = array<i64: 1, 16, 16, 8>}, {transform_indices = @transform_1, window_bounds = array<i64: 3, 3, 8>}, {transform_indices = @transform_2, window_bounds = array<i64: 1, 2, 8>}, {transform_indices = @transform_3, window_bounds = array<i64: 1, 16, 16, 8>}]} {
    %c0_i32 = arith.constant 0 : i32
    %0 = arith.cmpi eq, %arg2, %c0_i32 : i32
    %1 = arith.extui %0 : i1 to i32
    %c0_i32_0 = arith.constant 0 : i32
    %2 = arith.cmpi ne, %1, %c0_i32_0 : i32
    scf.if %2 {
      %cst_36 = arith.constant 0.000000e+00 : f32
      %99 = vector.broadcast %cst_36 : f32 to vector<2x8xf32>
      %c0_37 = arith.constant 0 : index
      %c0_38 = arith.constant 0 : index
      %c0_39 = arith.constant 0 : index
      %100 = vector.load %arg5[%c0_37, %c0_38, %c0_39] : memref<1x2x8xf32, #tpu.memory_space<vmem>>, vector<1x2x8xf32>
      %101 = vector.shape_cast %100 : vector<1x2x8xf32> to vector<2x8xf32>
      %102 = vector.shape_cast %99 : vector<2x8xf32> to vector<1x2x8xf32>
      tpu.vector_store %arg5[%c0_37, %c0_38, %c0_39], %102 {strides = array<i32>} : memref<1x2x8xf32, #tpu.memory_space<vmem>>, vector<1x2x8xf32>,
    } else {
    }
    %c0_i32_1 = arith.constant 0 : i32
    %3 = arith.cmpi eq, %arg2, %c0_i32_1 : i32
    %4 = arith.extui %3 : i1 to i32
    %c0_i32_2 = arith.constant 0 : i32
    %5 = arith.cmpi ne, %4, %c0_i32_2 : i32
    scf.if %5 {
      %cst_36 = arith.constant 0.000000e+00 : f32
      %99 = vector.broadcast %cst_36 : f32 to vector<18x32x8xf32>
      %c0_37 = arith.constant 0 : index
      %c0_38 = arith.constant 0 : index
      %c0_39 = arith.constant 0 : index
      %100 = vector.load %arg7[%c0_37, %c0_38, %c0_39] : memref<18x32x8xf32, #tpu.memory_space<vmem>>, vector<18x32x8xf32>
      tpu.vector_store %arg7[%c0_37, %c0_38, %c0_39], %99 {strides = array<i32>} : memref<18x32x8xf32, #tpu.memory_space<vmem>>, vector<18x32x8xf32>,
    } else {
    }
    %c0 = arith.constant 0 : index
    %c0_3 = arith.constant 0 : index
    %c0_4 = arith.constant 0 : index
    %c0_5 = arith.constant 0 : index
    %6 = vector.load %arg3[%c0, %c0_3, %c0_4, %c0_5] : memref<1x16x16x8xf32, #tpu.memory_space<vmem>>, vector<1x16x16x8xf32>
    %7 = vector.shape_cast %6 : vector<1x16x16x8xf32> to vector<16x16x8xf32>
    %c1 = arith.constant 1 : index
    %c8 = arith.constant 8 : index
    %c0_6 = arith.constant 0 : index
    %8 = vector.load %arg7[%c1, %c8, %c0_6] : memref<18x32x8xf32, #tpu.memory_space<vmem>>, vector<16x16x8xf32>
    tpu.vector_store %arg7[%c1, %c8, %c0_6], %7 {strides = array<i32>} : memref<18x32x8xf32, #tpu.memory_space<vmem>>, vector<16x16x8xf32>,
    %c0_7 = arith.constant 0 : index
    %c0_8 = arith.constant 0 : index
    %c0_9 = arith.constant 0 : index
    %9 = vector.load %arg4[%c0_7, %c0_8, %c0_9] : memref<3x3x8xf32, #tpu.memory_space<vmem>>, vector<3x3x8xf32>
    %cst = arith.constant 0.000000e+00 : f32
    %10 = vector.broadcast %cst : f32 to vector<16x16x8xf32>
    %c0_10 = arith.constant 0 : index
    %c0_11 = arith.constant 0 : index
    %c0_12 = arith.constant 0 : index
    %11 = vector.load %arg7[%c0_10, %c0_11, %c0_12] : memref<18x32x8xf32, #tpu.memory_space<vmem>>, vector<16x32x8xf32>
    %12 = vector.extract_strided_slice %11 {offsets = [0, 7, 0], sizes = [16, 16, 8], strides = [1, 1, 1]} : vector<16x32x8xf32> to vector<16x16x8xf32>
    %13 = vector.extract_strided_slice %9 {offsets = [0, 0, 0], sizes = [1, 1, 8], strides = [1, 1, 1]} : vector<3x3x8xf32> to vector<1x1x8xf32>
    %14 = vector.shape_cast %13 : vector<1x1x8xf32> to vector<8xf32>
    %15 = vector.shape_cast %14 : vector<8xf32> to vector<1x1x8xf32>
    %16 = vector.broadcast %15 : vector<1x1x8xf32> to vector<16x16x8xf32>
    %17 = arith.mulf %12, %16 : vector<16x16x8xf32>
    %18 = arith.addf %10, %17 : vector<16x16x8xf32>
    %19 = vector.extract_strided_slice %11 {offsets = [0, 8, 0], sizes = [16, 16, 8], strides = [1, 1, 1]} : vector<16x32x8xf32> to vector<16x16x8xf32>
    %20 = vector.extract_strided_slice %9 {offsets = [0, 1, 0], sizes = [1, 1, 8], strides = [1, 1, 1]} : vector<3x3x8xf32> to vector<1x1x8xf32>
    %21 = vector.shape_cast %20 : vector<1x1x8xf32> to vector<8xf32>
    %22 = vector.shape_cast %21 : vector<8xf32> to vector<1x1x8xf32>
    %23 = vector.broadcast %22 : vector<1x1x8xf32> to vector<16x16x8xf32>
    %24 = arith.mulf %19, %23 : vector<16x16x8xf32>
    %25 = arith.addf %18, %24 : vector<16x16x8xf32>
    %26 = vector.extract_strided_slice %11 {offsets = [0, 9, 0], sizes = [16, 16, 8], strides = [1, 1, 1]} : vector<16x32x8xf32> to vector<16x16x8xf32>
    %27 = vector.extract_strided_slice %9 {offsets = [0, 2, 0], sizes = [1, 1, 8], strides = [1, 1, 1]} : vector<3x3x8xf32> to vector<1x1x8xf32>
    %28 = vector.shape_cast %27 : vector<1x1x8xf32> to vector<8xf32>
    %29 = vector.shape_cast %28 : vector<8xf32> to vector<1x1x8xf32>
    %30 = vector.broadcast %29 : vector<1x1x8xf32> to vector<16x16x8xf32>
    %31 = arith.mulf %26, %30 : vector<16x16x8xf32>
    %32 = arith.addf %25, %31 : vector<16x16x8xf32>
    %c1_13 = arith.constant 1 : index
    %c0_14 = arith.constant 0 : index
    %c0_15 = arith.constant 0 : index
    %33 = vector.load %arg7[%c1_13, %c0_14, %c0_15] : memref<18x32x8xf32, #tpu.memory_space<vmem>>, vector<16x32x8xf32>
    %34 = vector.extract_strided_slice %33 {offsets = [0, 7, 0], sizes = [16, 16, 8], strides = [1, 1, 1]} : vector<16x32x8xf32> to vector<16x16x8xf32>
    %35 = vector.extract_strided_slice %9 {offsets = [1, 0, 0], sizes = [1, 1, 8], strides = [1, 1, 1]} : vector<3x3x8xf32> to vector<1x1x8xf32>
    %36 = vector.shape_cast %35 : vector<1x1x8xf32> to vector<8xf32>
    %37 = vector.shape_cast %36 : vector<8xf32> to vector<1x1x8xf32>
    %38 = vector.broadcast %37 : vector<1x1x8xf32> to vector<16x16x8xf32>
    %39 = arith.mulf %34, %38 : vector<16x16x8xf32>
    %40 = arith.addf %32, %39 : vector<16x16x8xf32>
    %41 = vector.extract_strided_slice %33 {offsets = [0, 8, 0], sizes = [16, 16, 8], strides = [1, 1, 1]} : vector<16x32x8xf32> to vector<16x16x8xf32>
    %42 = vector.extract_strided_slice %9 {offsets = [1, 1, 0], sizes = [1, 1, 8], strides = [1, 1, 1]} : vector<3x3x8xf32> to vector<1x1x8xf32>
    %43 = vector.shape_cast %42 : vector<1x1x8xf32> to vector<8xf32>
    %44 = vector.shape_cast %43 : vector<8xf32> to vector<1x1x8xf32>
    %45 = vector.broadcast %44 : vector<1x1x8xf32> to vector<16x16x8xf32>
    %46 = arith.mulf %41, %45 : vector<16x16x8xf32>
    %47 = arith.addf %40, %46 : vector<16x16x8xf32>
    %48 = vector.extract_strided_slice %33 {offsets = [0, 9, 0], sizes = [16, 16, 8], strides = [1, 1, 1]} : vector<16x32x8xf32> to vector<16x16x8xf32>
    %49 = vector.extract_strided_slice %9 {offsets = [1, 2, 0], sizes = [1, 1, 8], strides = [1, 1, 1]} : vector<3x3x8xf32> to vector<1x1x8xf32>
    %50 = vector.shape_cast %49 : vector<1x1x8xf32> to vector<8xf32>
    %51 = vector.shape_cast %50 : vector<8xf32> to vector<1x1x8xf32>
    %52 = vector.broadcast %51 : vector<1x1x8xf32> to vector<16x16x8xf32>
    %53 = arith.mulf %48, %52 : vector<16x16x8xf32>
    %54 = arith.addf %47, %53 : vector<16x16x8xf32>
    %c2 = arith.constant 2 : index
    %c0_16 = arith.constant 0 : index
    %c0_17 = arith.constant 0 : index
    %55 = vector.load %arg7[%c2, %c0_16, %c0_17] : memref<18x32x8xf32, #tpu.memory_space<vmem>>, vector<16x32x8xf32>
    %56 = vector.extract_strided_slice %55 {offsets = [0, 7, 0], sizes = [16, 16, 8], strides = [1, 1, 1]} : vector<16x32x8xf32> to vector<16x16x8xf32>
    %57 = vector.extract_strided_slice %9 {offsets = [2, 0, 0], sizes = [1, 1, 8], strides = [1, 1, 1]} : vector<3x3x8xf32> to vector<1x1x8xf32>
    %58 = vector.shape_cast %57 : vector<1x1x8xf32> to vector<8xf32>
    %59 = vector.shape_cast %58 : vector<8xf32> to vector<1x1x8xf32>
    %60 = vector.broadcast %59 : vector<1x1x8xf32> to vector<16x16x8xf32>
    %61 = arith.mulf %56, %60 : vector<16x16x8xf32>
    %62 = arith.addf %54, %61 : vector<16x16x8xf32>
    %63 = vector.extract_strided_slice %55 {offsets = [0, 8, 0], sizes = [16, 16, 8], strides = [1, 1, 1]} : vector<16x32x8xf32> to vector<16x16x8xf32>
    %64 = vector.extract_strided_slice %9 {offsets = [2, 1, 0], sizes = [1, 1, 8], strides = [1, 1, 1]} : vector<3x3x8xf32> to vector<1x1x8xf32>
    %65 = vector.shape_cast %64 : vector<1x1x8xf32> to vector<8xf32>
    %66 = vector.shape_cast %65 : vector<8xf32> to vector<1x1x8xf32>
    %67 = vector.broadcast %66 : vector<1x1x8xf32> to vector<16x16x8xf32>
    %68 = arith.mulf %63, %67 : vector<16x16x8xf32>
    %69 = arith.addf %62, %68 : vector<16x16x8xf32>
    %70 = vector.extract_strided_slice %55 {offsets = [0, 9, 0], sizes = [16, 16, 8], strides = [1, 1, 1]} : vector<16x32x8xf32> to vector<16x16x8xf32>
    %71 = vector.extract_strided_slice %9 {offsets = [2, 2, 0], sizes = [1, 1, 8], strides = [1, 1, 1]} : vector<3x3x8xf32> to vector<1x1x8xf32>
    %72 = vector.shape_cast %71 : vector<1x1x8xf32> to vector<8xf32>
    %73 = vector.shape_cast %72 : vector<8xf32> to vector<1x1x8xf32>
    %74 = vector.broadcast %73 : vector<1x1x8xf32> to vector<16x16x8xf32>
    %75 = arith.mulf %70, %74 : vector<16x16x8xf32>
    %76 = arith.addf %69, %75 : vector<16x16x8xf32>
    %cst_18 = arith.constant dense<0.000000e+00> : vector<8xf32>
    %77 = vector.multi_reduction <add>, %76, %cst_18 [0, 1] : vector<16x16x8xf32> to vector<8xf32>
    %78 = vector.shape_cast %77 : vector<8xf32> to vector<1x1x8xf32>
    %79 = vector.shape_cast %78 : vector<1x1x8xf32> to vector<1x8xf32>
    %80 = arith.mulf %76, %76 : vector<16x16x8xf32>
    %cst_19 = arith.constant dense<0.000000e+00> : vector<8xf32>
    %81 = vector.multi_reduction <add>, %80, %cst_19 [0, 1] : vector<16x16x8xf32> to vector<8xf32>
    %82 = vector.shape_cast %81 : vector<8xf32> to vector<1x1x8xf32>
    %83 = vector.shape_cast %82 : vector<1x1x8xf32> to vector<1x8xf32>
    %c0_20 = arith.constant 0 : index
    %c0_21 = arith.constant 0 : index
    %c0_22 = arith.constant 0 : index
    %84 = vector.load %arg5[%c0_20, %c0_21, %c0_22] : memref<1x2x8xf32, #tpu.memory_space<vmem>>, vector<1x1x8xf32>
    %85 = vector.shape_cast %84 : vector<1x1x8xf32> to vector<1x8xf32>
    %86 = arith.addf %85, %79 : vector<1x8xf32>
    %c0_23 = arith.constant 0 : index
    %c0_24 = arith.constant 0 : index
    %c0_25 = arith.constant 0 : index
    %87 = vector.load %arg5[%c0_23, %c0_24, %c0_25] : memref<1x2x8xf32, #tpu.memory_space<vmem>>, vector<1x1x8xf32>
    %88 = vector.shape_cast %87 : vector<1x1x8xf32> to vector<1x8xf32>
    %89 = vector.shape_cast %86 : vector<1x8xf32> to vector<1x1x8xf32>
    tpu.vector_store %arg5[%c0_23, %c0_24, %c0_25], %89 {strides = array<i32>} : memref<1x2x8xf32, #tpu.memory_space<vmem>>, vector<1x1x8xf32>,
    %c0_26 = arith.constant 0 : index
    %c1_27 = arith.constant 1 : index
    %c0_28 = arith.constant 0 : index
    %90 = vector.load %arg5[%c0_26, %c1_27, %c0_28] : memref<1x2x8xf32, #tpu.memory_space<vmem>>, vector<1x1x8xf32>
    %91 = vector.shape_cast %90 : vector<1x1x8xf32> to vector<1x8xf32>
    %92 = arith.addf %91, %83 : vector<1x8xf32>
    %c0_29 = arith.constant 0 : index
    %c1_30 = arith.constant 1 : index
    %c0_31 = arith.constant 0 : index
    %93 = vector.load %arg5[%c0_29, %c1_30, %c0_31] : memref<1x2x8xf32, #tpu.memory_space<vmem>>, vector<1x1x8xf32>
    %94 = vector.shape_cast %93 : vector<1x1x8xf32> to vector<1x8xf32>
    %95 = vector.shape_cast %92 : vector<1x8xf32> to vector<1x1x8xf32>
    tpu.vector_store %arg5[%c0_29, %c1_30, %c0_31], %95 {strides = array<i32>} : memref<1x2x8xf32, #tpu.memory_space<vmem>>, vector<1x1x8xf32>,
    %c0_32 = arith.constant 0 : index
    %c0_33 = arith.constant 0 : index
    %c0_34 = arith.constant 0 : index
    %c0_35 = arith.constant 0 : index
    %96 = vector.load %arg6[%c0_32, %c0_33, %c0_34, %c0_35] : memref<1x16x16x8xf32, #tpu.memory_space<vmem>>, vector<1x16x16x8xf32>
    %97 = vector.shape_cast %96 : vector<1x16x16x8xf32> to vector<16x16x8xf32>
    %98 = vector.shape_cast %76 : vector<16x16x8xf32> to vector<1x16x16x8xf32>
    tpu.vector_store %arg6[%c0_32, %c0_33, %c0_34, %c0_35], %98 {strides = array<i32>} : memref<1x16x16x8xf32, #tpu.memory_space<vmem>>, vector<1x16x16x8xf32>,
    return
  }
  func.func @transform_0(%arg0: i32, %arg1: i32, %arg2: i32) -> (i32, i32, i32, i32) {
    %c1_i32 = arith.constant 1 : i32
    %0 = arith.muli %arg0, %c1_i32 : i32
    %1 = arith.addi %0, %arg2 : i32
    %c0_i32 = arith.constant 0 : i32
    %c0_i32_0 = arith.constant 0 : i32
    %c0_i32_1 = arith.constant 0 : i32
    return %1, %c0_i32, %c0_i32_0, %arg1 : i32, i32, i32, i32
  }
  func.func @transform_1(%arg0: i32, %arg1: i32, %arg2: i32) -> (i32, i32, i32) {
    %c0_i32 = arith.constant 0 : i32
    %c0_i32_0 = arith.constant 0 : i32
    %c0_i32_1 = arith.constant 0 : i32
    return %c0_i32, %c0_i32_0, %arg1 : i32, i32, i32
  }
  func.func @transform_2(%arg0: i32, %arg1: i32, %arg2: i32) -> (i32, i32, i32) {
    %c0_i32 = arith.constant 0 : i32
    %c0_i32_0 = arith.constant 0 : i32
    return %arg0, %c0_i32, %arg1 : i32, i32, i32
  }
  func.func @transform_3(%arg0: i32, %arg1: i32, %arg2: i32) -> (i32, i32, i32, i32) {
    %c1_i32 = arith.constant 1 : i32
    %0 = arith.muli %arg0, %c1_i32 : i32
    %1 = arith.addi %0, %arg2 : i32
    %c0_i32 = arith.constant 0 : i32
    %c0_i32_0 = arith.constant 0 : i32
    %c0_i32_1 = arith.constant 0 : i32
    return %1, %c0_i32, %c0_i32_0, %arg1 : i32, i32, i32, i32
  }
}

</mosaic_0001>

<bundles_post_ra>
// kernel: tpu_custom_call.1
= control target key start
LH: loop header
LB: loop body
LE: loop exit
PB: predicated region body
PF: predicated region fallthrough
CT: control target
= control target key end

     0   :  { %9 = vsyncpa [#allocation4], 0  ;;  %s5505_s0 = inlined_call_operand.vmem [shape: f32[2,16,16,8], index: 0, kind: input, shape index: {}]   ;;  %s5506_s1 = inlined_call_operand.vmem [shape: f32[3,3,8], index: 1, kind: input, shape index: {}]   ;;  %s5507_s2 = inlined_call_operand.hbm [shape: f32[2,2,8], index: 2, kind: output, shape index: {0}]   ;;  %s5508_s3 = inlined_call_operand.vmem [shape: f32[2,16,16,8], index: 3, kind: output, shape index: {1}]  }
   0x1   :  { %11 = vsyncpa [#allocation4 + $0x1], 0  ;;  %s3252_s12 = smov 0   ;;  %s3254_s13 = smov 0  }
   0x2   :  { %s3256_s14 = smov 0   ;;  %s3258_s15 = smov 0  }
   0x3   :  { %s3260_s16 = smov 0   ;;  %s3262_s17 = smov 0  }
   0x4 LB: > { %s3079_s18 = sadd.s32 4294967295, %s3228_s17   ;;  %s3080_s19 = sadd.s32 4294967294, %s3228_s17   ;;  %s3228_s17 = sphi %s3262_s17, %s17_s17   ;;  %s3224_s16 = sphi %s3260_s16, %s5571_s16   ;;  %s3220_s15 = sphi %s3258_s15, %s5570_s15   ;;  %s3216_s14 = sphi %s3256_s14, %s5569_s14   ;;  %s3212_s13 = sphi %s3254_s13, %s5568_s13   ;;  %s3208_s12 = sphi %s3252_s12, %s5567_s12  }
   0x5   : > { %s36_s20 = sadd.s32 1, %s3224_s16  ;;  %s101_s21 = sadd.s32 1, %s3216_s14 }
   0x6   : > { %p38_p0 = scmp.ge.s32.totalorder %s36_s20, 2  ;;  %p111_p1 = scmp.ne.s32.totalorder %s3216_s14, %s3212_s13 }
   0x7   : > { %p112_p2 = scmp.eq.s32.totalorder %s3079_s18, 1  ;;  %p117_p3 = scmp.ne.s32.totalorder %s3212_s13, %s3208_s12 }
   0x8   : > { %s5573_s20 = smov (%p38_p0, %s36_s20), 0  ;;  %p118_p5 = scmp.eq.s32.totalorder %s3080_s19, 1 }
   0x9   : > { %p3292_p4 = por %p112_p2, %p111_p1  ;;  %s96_s23 = ssub.s32 %s3224_s16, %s5573_s20 }
   0xa   : > { %p3084_p6 = scmp.ge.s32.totalorder %s3228_s17, 1  ;;  %p99_p7 = scmp.eq.s32.totalorder %s96_s23, 0 }
   0xb   : > { %p3299_p8 = por %p118_p5, %p117_p3  ;;  %p186_p9 = scmp.lt.s32.totalorder %s3228_s17, 3 }
   0xc   : > { %s3305_s25 = scalar_select %p99_p7, %s3216_s14, %s101_s21  }
   0xd   : > { %p187_p10 = pnand %p3084_p6, %p186_p9 }
   0xf   : > { %190 = sbr.rel (%p187_p10) target bundleno = 470 (0x1d6), region = 28 }
  0x14   : > { %vm257_vm0 = vcmask 64512   ;;  %p228_p11 = scmp.lt.s32.totalorder %s3220_s15, 1  ;;  %v463_v0 = vlaneseq  ;;  %v5509_v1 = vmov 0.0   ;;  %v396_v6 = vld [vmem:[%s5506_s1] sm:$0x7]  ;;  %vm876_vm1 = vcmask 1045504  }
  0x15   : > { %259 = vst.msk [vmem:[#allocation2 + $0x8] sm:$0xff] %vm257_vm0, %v5509_v1  ;;  %258 = vst.msk [vmem:[#allocation2] sm:$0xff] %vm257_vm0, %v5509_v1  ;;  %v397_v7 = vld [vmem:[%s5506_s1 + $0x4] sm:$0x7]  ;;  %v398_v11 = vld [vmem:[%s5506_s1 + $0x8] sm:$0x7] }
  0x16   : > { %260 = vst.msk [vmem:[#allocation2 + $0x10] sm:$0xff] %vm257_vm0, %v5509_v1  ;;  %261 = vst.msk [vmem:[#allocation2 + $0x18] sm:$0xff] %vm257_vm0, %v5509_v1  ;;  %s3455_s26 = scalar_select %p228_p11, %s3220_s15, 1  ;;  %v464_v2 = vshrl.u32 %v463_v0, 7  ;;  %vm631_vm2 = vcmask 1046528   ;;  %vm2872_vm3 = vcmask 64519  }
  0x17   : > { %262 = vst.msk [vmem:[#allocation2 + $0x20] sm:$0xff] %vm257_vm0, %v5509_v1  ;;  %263 = vst.msk [vmem:[#allocation2 + $0x28] sm:$0xff] %vm257_vm0, %v5509_v1  ;;  %vm2875_vm4 = vcmask 63488   ;;  %vm2406_vm5 = vcmask 1040384   ;;  %s213_s19 = sand.u32 1, %s3212_s13   ;;  %vm255_vm6 = vcmask 58368  }
  0x18   : > { %264 = vst.msk [vmem:[#allocation2 + $0x30] sm:$0xff] %vm257_vm0, %v5509_v1  ;;  %265 = vst.msk [vmem:[#allocation2 + $0x38] sm:$0xff] %vm257_vm0, %v5509_v1  ;;  %s3094_s27 = sshll.u32 %s3455_s26, 8  ;;  %v465_v3 = vsub.s32 0, %v464_v2  ;;  %v565_v4 = vsub.s32 1, %v464_v2  ;;  %v778_v5 = vsub.s32 2, %v464_v2 }
  0x19   : > { %266 = vst.msk [vmem:[#allocation2 + $0x40] sm:$0xff] %vm257_vm0, %v5509_v1  ;;  %267 = vst.msk [vmem:[#allocation2 + $0x48] sm:$0xff] %vm257_vm0, %v5509_v1  ;;  %s3464_s30 = scalar_lea.vmem %s5505_s0, %s3094_s27  ;;  %s3649_s18 = scalar_lea.vmem %s5508_s3, %s3094_s27  ;;  %vm2867_vm7 = vcmask 57344  }
  0x1a   : > { %268 = vst.msk [vmem:[#allocation2 + $0x50] sm:$0xff] %vm257_vm0, %v5509_v1  ;;  %269 = vst.msk [vmem:[#allocation2 + $0x58] sm:$0xff] %vm257_vm0, %v5509_v1  ;;  %v330_v8 = vld [vmem:[%s3464_s30] sm:$0xff]  ;;  %v331_v9 = vld [vmem:[%s3464_s30 + $0x8] sm:$0xff]  ;;  %v3490_v18 = vrot.slane %v396_v6, %v465_v3  ;;  %v3492_v19 = vrot.slane %v396_v6, %v565_v4  ;;  %v3494_v20 = vrot.slane %v396_v6, %v778_v5  ;;  %s3085_s21 = sshll.u32 %s213_s19, 1  ;;  %s3091_s26 = sshll.u32 %s3220_s15, 5 }
  0x1b   : > { %270 = vst.msk [vmem:[#allocation2 + $0x60] sm:$0xff] %vm257_vm0, %v5509_v1  ;;  %271 = vst.msk [vmem:[#allocation2 + $0x68] sm:$0xff] %vm257_vm0, %v5509_v1  ;;  %v332_v10 = vld [vmem:[%s3464_s30 + $0x10] sm:$0xff]  ;;  %v333_v12 = vld [vmem:[%s3464_s30 + $0x18] sm:$0xff]  ;;  %v3502_v24 = vrot.slane %v397_v7, %v465_v3  ;;  %v3510_v28 = vrot.slane %v397_v7, %v565_v4  ;;  %v3516_v32 = vrot.slane %v397_v7, %v778_v5  ;;  %s5423_s23 = scalar_lea.vmem [#allocation3], %s3085_s21  ;;  %s2923_s4 = scalar_lea.sflag [#allocation4], %s213_s19 }
  0x1c   : > { %272 = vst.msk [vmem:[#allocation2 + $0x70] sm:$0xff] %vm257_vm0, %v5509_v1  ;;  %273 = vst.msk [vmem:[#allocation2 + $0x78] sm:$0xff] %vm257_vm0, %v5509_v1  ;;  %v334_v13 = vld [vmem:[%s3464_s30 + $0x20] sm:$0xff]  ;;  %v335_v14 = vld [vmem:[%s3464_s30 + $0x28] sm:$0xff]  ;;  %v3518_v33 = vrot.slane %v398_v11, %v465_v3  ;;  %v3520_v34 = vrot.slane %v398_v11, %v565_v4  ;;  %v3522_v35 = vrot.slane %v398_v11, %v778_v5  ;;  %s2946_s27 = sshll.u32 %s5423_s23, 4  ;;  %s3231_s6 = smov [#allocation3]   ;;  %s2947_s27 = int_to_ptr.vmem [resolvable:$true] %s2946_s27 }
  0x1d   : > { %274 = vst.msk [vmem:[#allocation2 + $0x80] sm:$0xff] %vm257_vm0, %v5509_v1  ;;  %275 = vst.msk [vmem:[#allocation2 + $0x88] sm:$0xff] %vm257_vm0, %v5509_v1  ;;  %v336_v15 = vld [vmem:[%s3464_s30 + $0x30] sm:$0xff]  ;;  %v337_v16 = vld [vmem:[%s3464_s30 + $0x38] sm:$0xff]  ;;  %s3152_s5 = scalar_lea.vmem %s2947_s27, 32  ;;  %s3156_s15 = sshll.u32 %s3231_s6, 4  ;;  %s3157_s15 = int_to_ptr.vmem [resolvable:$false] %s3156_s15 }
  0x1e   : > { %276 = vst.msk [vmem:[#allocation2 + $0x90] sm:$0xff] %vm257_vm0, %v5509_v1  ;;  %277 = vst.msk [vmem:[#allocation2 + $0x98] sm:$0xff] %vm257_vm0, %v5509_v1  ;;  %v338_v17 = vld [vmem:[%s3464_s30 + $0x40] sm:$0xff]  ;;  %v339_v21 = vld [vmem:[%s3464_s30 + $0x48] sm:$0xff]  ;;  %p3153_p12 = scmp.ne.s32.totalorder %s2947_s27, %s3152_s5  ;;  %s3158_s7 = scalar_lea.vmem %s3157_s15, 64 }
  0x1f   : > { %278 = vst.msk [vmem:[#allocation2 + $0xa0] sm:$0xff] %vm257_vm0, %v5509_v1  ;;  %279 = vst.msk [vmem:[#allocation2 + $0xa8] sm:$0xff] %vm257_vm0, %v5509_v1  ;;  %v340_v22 = vld [vmem:[%s3464_s30 + $0x50] sm:$0xff]  ;;  %v341_v23 = vld [vmem:[%s3464_s30 + $0x58] sm:$0xff]  ;;  %p3159_p1 = scmp.lt.s32.totalorder %s2947_s27, %s3157_s15  ;;  %p3160_p2 = scmp.lt.s32.totalorder %s3158_s7, %s3152_s5 }
  0x20   : > { %280 = vst.msk [vmem:[#allocation2 + $0xb0] sm:$0xff] %vm257_vm0, %v5509_v1  ;;  %281 = vst.msk [vmem:[#allocation2 + $0xb8] sm:$0xff] %vm257_vm0, %v5509_v1  ;;  %v342_v25 = vld [vmem:[%s3464_s30 + $0x60] sm:$0xff]  ;;  %v343_v26 = vld [vmem:[%s3464_s30 + $0x68] sm:$0xff]  ;;  %p3154_p13 = pnand %p3153_p12, %p3292_p4 }
  0x21   : > { %282 = vst.msk [vmem:[#allocation2 + $0xc0] sm:$0xff] %vm257_vm0, %v5509_v1  ;;  %283 = vst.msk [vmem:[#allocation2 + $0xc8] sm:$0xff] %vm257_vm0, %v5509_v1  ;;  %v344_v27 = vld [vmem:[%s3464_s30 + $0x70] sm:$0xff]  ;;  %v345_v29 = vld [vmem:[%s3464_s30 + $0x78] sm:$0xff]  ;;  %p3161_p3 = por %p3160_p2, %p3159_p1 }
  0x22   : > { %284 = vst.msk [vmem:[#allocation2 + $0xd0] sm:$0xff] %vm257_vm0, %v5509_v1  ;;  %285 = vst.msk [vmem:[#allocation2 + $0xd8] sm:$0xff] %vm257_vm0, %v5509_v1  ;;  %v399_v30 = vld [vmem:[#allocation2] sm:$0xff]  ;;  %v400_v31 = vld [vmem:[#allocation2 + $0x8] sm:$0xff]  ;;  %p3155_p0 = pneg %p3154_p13 }
  0x23   : > { %286 = vst.msk [vmem:[#allocation2 + $0xe0] sm:$0xff] %vm257_vm0, %v5509_v1  ;;  %287 = vst.msk [vmem:[#allocation2 + $0xe8] sm:$0xff] %vm257_vm0, %v5509_v1  ;;  %v467_v36 = vmul.f32 %v3490_v18, %v399_v30  ;;  %v3527_v37 = vmul.f32 %v3492_v19, %v400_v31  ;;  %v3530_v38 = vmul.f32 %v3494_v20, %v400_v31  ;;  %v3532_v39 = vld [vmem:[#allocation2 + $0x20] sm:$0xff]  ;;  %v401_v41 = vld [vmem:[#allocation2 + $0x10] sm:$0xff] }
  0x24   : > { %288 = vst.msk [vmem:[#allocation2 + $0xf0] sm:$0xff] %vm257_vm0, %v5509_v1  ;;  %289 = vst.msk [vmem:[#allocation2 + $0xf8] sm:$0xff] %vm257_vm0, %v5509_v1  ;;  %v3534_v40 = vld [vmem:[#allocation2 + $0x40] sm:$0xff]  ;;  %v3537_v42 = vmul.f32 %v3490_v18, %v400_v31  ;;  %v1121_v43 = vmul.f32 %v3502_v24, %v3532_v39  ;;  %v402_v45 = vld [vmem:[#allocation2 + $0x18] sm:$0xff]  ;;  %v469_v46 = vmul.f32 %v3490_v18, %v401_v41  ;;  %p3162_p5 = pnand %p3161_p3, %p3155_p0 }
  0x25   : > { %290 = vst.msk [vmem:[#allocation2 + $0x100] sm:$0xff] %vm257_vm0, %v5509_v1  ;;  %291 = vst.msk [vmem:[#allocation2 + $0x108] sm:$0xff] %vm257_vm0, %v5509_v1  ;;  %v3543_v44 = vmul.f32 %v3518_v33, %v3534_v40  ;;  %v568_v47 = vmul.f32 %v3492_v19, %v401_v41  ;;  %v632_v48 = vrot.slane %v3527_v37, 1  ;;  %v877_v49 = vrot.slane %v3530_v38, 2  ;;  %v346_v59 = vld [vmem:[%s3464_s30 + $0x80] sm:$0xff]  ;;  %v347_v60 = vld [vmem:[%s3464_s30 + $0x88] sm:$0xff] }
  0x26   : > { %292 = vst.msk [vmem:[#allocation2 + $0x110] sm:$0xff] %vm257_vm0, %v5509_v1  ;;  %293 = vst.msk [vmem:[#allocation2 + $0x118] sm:$0xff] %vm257_vm0, %v5509_v1  ;;  %v781_v52 = vmul.f32 %v3494_v20, %v401_v41  ;;  %v782_v53 = vmul.f32 %v3494_v20, %v402_v45  ;;  %v3575_v2 = vld [vmem:[#allocation2 + $0x38] sm:$0xff]  ;;  %v351_v37 = vld [vmem:[%s3464_s30 + $0xa8] sm:$0xff] }
  0x27   : > { %294 = vst.msk [vmem:[#allocation2 + $0x120] sm:$0xff] %vm257_vm0, %v5509_v1  ;;  %295 = vst.msk [vmem:[#allocation2 + $0x128] sm:$0xff] %vm257_vm0, %v5509_v1  ;;  %v728_v61 = vadd.f32 %v632_v48, %v467_v36  ;;  %v633_v62 = vrot.slane %v568_v47, 1  ;;  %v350_v36 = vld [vmem:[%s3464_s30 + $0xa0] sm:$0xff] }
  0x28   : > { %296 = vst.msk [vmem:[#allocation2 + $0x130] sm:$0xff] %vm257_vm0, %v5509_v1  ;;  %297 = vst.msk [vmem:[#allocation2 + $0x138] sm:$0xff] %vm257_vm0, %v5509_v1  ;;  %v878_v63 = vrot.slane %v781_v52, 2  ;;  %v880_v0 = vrot.slane %v782_v53, 2 }
  0x29   : > { %298 = vst.msk [vmem:[#allocation2 + $0x140] sm:$0xff] %vm257_vm0, %v5509_v1  ;;  %299 = vst.msk [vmem:[#allocation2 + $0x148] sm:$0xff] %vm257_vm0, %v5509_v1  ;;  %v1005_v7 = vadd.f32 %v877_v49, %v728_v61  ;;  %v634_v52 = vsel %vm631_vm2, %v632_v48, %v633_v62 }
  0x2a   : > { %300 = vst.msk [vmem:[#allocation2 + $0x150] sm:$0xff] %vm257_vm0, %v5509_v1  ;;  %301 = vst.msk [vmem:[#allocation2 + $0x158] sm:$0xff] %vm257_vm0, %v5509_v1  ;;  %v879_v53 = vsel %vm876_vm1, %v877_v49, %v878_v63 }
  0x2b   : > { %302 = vst.msk [vmem:[#allocation2 + $0x160] sm:$0xff] %vm257_vm0, %v5509_v1  ;;  %303 = vst.msk [vmem:[#allocation2 + $0x168] sm:$0xff] %vm257_vm0, %v5509_v1 }
  0x2c   : > { %304 = vst.msk [vmem:[#allocation2 + $0x170] sm:$0xff] %vm257_vm0, %v5509_v1  ;;  %305 = vst.msk [vmem:[#allocation2 + $0x178] sm:$0xff] %vm257_vm0, %v5509_v1 }
  0x2d   : > { %306 = vst.msk [vmem:[#allocation2 + $0x180] sm:$0xff] %vm257_vm0, %v5509_v1  ;;  %307 = vst.msk [vmem:[#allocation2 + $0x188] sm:$0xff] %vm257_vm0, %v5509_v1 }
  0x2e   : > { %308 = vst.msk [vmem:[#allocation2 + $0x190] sm:$0xff] %vm257_vm0, %v5509_v1  ;;  %309 = vst.msk [vmem:[#allocation2 + $0x198] sm:$0xff] %vm257_vm0, %v5509_v1 }
  0x2f   : > { %310 = vst.msk [vmem:[#allocation2 + $0x1a0] sm:$0xff] %vm257_vm0, %v5509_v1  ;;  %311 = vst.msk [vmem:[#allocation2 + $0x1a8] sm:$0xff] %vm257_vm0, %v5509_v1 }
  0x30   : > { %312 = vst.msk [vmem:[#allocation2 + $0x1b0] sm:$0xff] %vm257_vm0, %v5509_v1  ;;  %313 = vst.msk [vmem:[#allocation2 + $0x1b8] sm:$0xff] %vm257_vm0, %v5509_v1 }
  0x31   : > { %314 = vst.msk [vmem:[#allocation2 + $0x1c0] sm:$0xff] %vm257_vm0, %v5509_v1  ;;  %315 = vst.msk [vmem:[#allocation2 + $0x1c8] sm:$0xff] %vm257_vm0, %v5509_v1 }
  0x32   : > { %316 = vst.msk [vmem:[#allocation2 + $0x1d0] sm:$0xff] %vm257_vm0, %v5509_v1  ;;  %317 = vst.msk [vmem:[#allocation2 + $0x1d8] sm:$0xff] %vm257_vm0, %v5509_v1 }
  0x33   : > { %318 = vst.msk [vmem:[#allocation2 + $0x1e0] sm:$0xff] %vm257_vm0, %v5509_v1  ;;  %319 = vst.msk [vmem:[#allocation2 + $0x1e8] sm:$0xff] %vm257_vm0, %v5509_v1 }
  0x34   : > { %320 = vst.msk [vmem:[#allocation2 + $0x1f0] sm:$0xff] %vm257_vm0, %v5509_v1  ;;  %321 = vst.msk [vmem:[#allocation2 + $0x1f8] sm:$0xff] %vm257_vm0, %v5509_v1 }
  0x35   : > { %322 = vst.msk [vmem:[#allocation2 + $0x200] sm:$0xff] %vm257_vm0, %v5509_v1  ;;  %323 = vst.msk [vmem:[#allocation2 + $0x208] sm:$0xff] %vm257_vm0, %v5509_v1 }
  0x36   : > { %324 = vst.msk [vmem:[#allocation2 + $0x210] sm:$0xff] %vm257_vm0, %v5509_v1  ;;  %325 = vst.msk [vmem:[#allocation2 + $0x218] sm:$0xff] %vm257_vm0, %v5509_v1 }
  0x37   : > { %326 = vst.msk [vmem:[#allocation2 + $0x220] sm:$0xff] %vm257_vm0, %v5509_v1  ;;  %327 = vst.msk [vmem:[#allocation2 + $0x228] sm:$0xff] %vm257_vm0, %v5509_v1 }
  0x38   : > { %328 = vst.msk [vmem:[#allocation2 + $0x230] sm:$0xff] %vm257_vm0, %v5509_v1  ;;  %329 = vst.msk [vmem:[#allocation2 + $0x238] sm:$0xff] %vm257_vm0, %v5509_v1 }
  0x39   : > { %364 = vst.msk [vmem:[#allocation2 + $0x28] sm:$0xff] %vm257_vm0, %v330_v8  ;;  %365 = vst.msk [vmem:[#allocation2 + $0x30] sm:$0xff] %vm257_vm0, %v331_v9  ;;  %v730_v8 = vadd.f32 %v633_v62, %v469_v46  ;;  %v881_v9 = vsel %vm876_vm1, %v878_v63, %v880_v0 }
  0x3a   : > { %366 = vst.msk [vmem:[#allocation2 + $0x48] sm:$0xff] %vm257_vm0, %v332_v10  ;;  %367 = vst.msk [vmem:[#allocation2 + $0x50] sm:$0xff] %vm257_vm0, %v333_v12 }
  0x3b   : > { %368 = vst.msk [vmem:[#allocation2 + $0x68] sm:$0xff] %vm257_vm0, %v334_v13  ;;  %369 = vst.msk [vmem:[#allocation2 + $0x70] sm:$0xff] %vm257_vm0, %v335_v14  ;;  %v1435_v14 = vmul.f32 %v3516_v32, %v3575_v2 }
  0x3c   : > { %370 = vst.msk [vmem:[#allocation2 + $0x88] sm:$0xff] %vm257_vm0, %v336_v15  ;;  %371 = vst.msk [vmem:[#allocation2 + $0x90] sm:$0xff] %vm257_vm0, %v337_v16  ;;  %v348_v16 = vld [vmem:[%s3464_s30 + $0x90] sm:$0xff] }
  0x3d   : > { %372 = vst.msk [vmem:[#allocation2 + $0xa8] sm:$0xff] %vm257_vm0, %v338_v17  ;;  %373 = vst.msk [vmem:[#allocation2 + $0xb0] sm:$0xff] %vm257_vm0, %v339_v21  ;;  %v349_v17 = vld [vmem:[%s3464_s30 + $0x98] sm:$0xff]  ;;  %v1169_v21 = vadd.f32 %v1121_v43, %v1005_v7  ;;  %v1532_v30 = vrot.slane %v1435_v14, 2  ;;  %v1124_v14 = vmul.f32 %v3534_v40, %v3502_v24 }
  0x3e   : > { %374 = vst.msk [vmem:[#allocation2 + $0xc8] sm:$0xff] %vm257_vm0, %v340_v22  ;;  %375 = vst.msk [vmem:[#allocation2 + $0xd0] sm:$0xff] %vm257_vm0, %v341_v23  ;;  %v1007_v22 = vadd.f32 %v881_v9, %v730_v8  ;;  %v3598_v23 = vld [vmem:[#allocation2 + $0x58] sm:$0xff] }
  0x3f   : > { %376 = vst.msk [vmem:[#allocation2 + $0xe8] sm:$0xff] %vm257_vm0, %v342_v25  ;;  %377 = vst.msk [vmem:[#allocation2 + $0xf0] sm:$0xff] %vm257_vm0, %v343_v26  ;;  %v2088_v31 = vmul.f32 %v3522_v35, %v3598_v23 }
  0x40   : > { %378 = vst.msk [vmem:[#allocation2 + $0x108] sm:$0xff] %vm257_vm0, %v344_v27  ;;  %379 = vst.msk [vmem:[#allocation2 + $0x110] sm:$0xff] %vm257_vm0, %v345_v29  ;;  %v3549_v50 = vld [vmem:[#allocation2 + $0x28] sm:$0xff]  ;;  %v3571_v58 = vld [vmem:[#allocation2 + $0x30] sm:$0xff] }
  0x41   : > { %v3551_v51 = vld [vmem:[#allocation2 + $0x48] sm:$0xff]  ;;  %v3557_v54 = vmul.f32 %v3510_v28, %v3549_v50  ;;  %v3561_v55 = vmul.f32 %v3516_v32, %v3549_v50  ;;  %380 = vst.msk [vmem:[#allocation2 + $0x128] sm:$0xff] %vm257_vm0, %v346_v59  ;;  %381 = vst.msk [vmem:[#allocation2 + $0x130] sm:$0xff] %vm257_vm0, %v347_v60  ;;  %v1123_v10 = vmul.f32 %v3502_v24, %v3571_v58  ;;  %v3586_v11 = vld [vmem:[#allocation2 + $0x50] sm:$0xff]  ;;  %v2185_v47 = vrot.slane %v2088_v31, 2 }
  0x42   : > { %v3565_v56 = vmul.f32 %v3520_v34, %v3551_v51  ;;  %v3569_v57 = vmul.f32 %v3522_v35, %v3551_v51  ;;  %v1222_v12 = vmul.f32 %v3510_v28, %v3571_v58  ;;  %v1434_v13 = vmul.f32 %v3516_v32, %v3571_v58  ;;  %382 = vst.msk [vmem:[#allocation2 + $0x148] sm:$0xff] %vm257_vm0, %v348_v16 }
  0x43   : > { %v1285_v3 = vrot.slane %v3557_v54, 1  ;;  %v1529_v4 = vrot.slane %v3561_v55, 2  ;;  %v1776_v15 = vmul.f32 %v3518_v33, %v3586_v11  ;;  %v1875_v25 = vmul.f32 %v3520_v34, %v3586_v11  ;;  %383 = vst.msk [vmem:[#allocation2 + $0x150] sm:$0xff] %vm257_vm0, %v349_v17  ;;  %384 = vst.msk [vmem:[#allocation2 + $0x168] sm:$0xff] %vm257_vm0, %v350_v36  ;;  %v352_v54 = vld [vmem:[%s3464_s30 + $0xb0] sm:$0xff]  ;;  %v353_v55 = vld [vmem:[%s3464_s30 + $0xb8] sm:$0xff] }
  0x44   : > { %v1938_v5 = vrot.slane %v3565_v56, 1  ;;  %v2182_v6 = vrot.slane %v3569_v57, 2  ;;  %v2087_v26 = vmul.f32 %v3522_v35, %v3586_v11  ;;  %v1286_v27 = vrot.slane %v1222_v12, 1  ;;  %385 = vst.msk [vmem:[#allocation2 + $0x170] sm:$0xff] %vm257_vm0, %v351_v37  ;;  %386 = vst.msk [vmem:[#allocation2 + $0x188] sm:$0xff] %vm257_vm0, %v352_v54 }
  0x45   : > { %v1530_v29 = vrot.slane %v1434_v13, 2  ;;  %v1381_v38 = vadd.f32 %v1285_v3, %v1169_v21  ;;  %v1171_v41 = vadd.f32 %v1123_v10, %v1007_v22  ;;  %v1939_v43 = vrot.slane %v1875_v25, 1  ;;  %387 = vst.msk [vmem:[#allocation2 + $0x190] sm:$0xff] %vm257_vm0, %v353_v55  ;;  %v354_v21 = vld [vmem:[%s3464_s30 + $0xc0] sm:$0xff]  ;;  %v355_v22 = vld [vmem:[%s3464_s30 + $0xc8] sm:$0xff] }
  0x46   : > { %v2183_v45 = vrot.slane %v2087_v26, 2  ;;  %v729_v60 = vadd.f32 %v634_v52, %v3537_v42  ;;  %v1122_v61 = vmul.f32 %v3502_v24, %v3549_v50  ;;  %v1287_v48 = vsel %vm631_vm2, %v1285_v3, %v1286_v27  ;;  %388 = vst.msk [vmem:[#allocation2 + $0x1a8] sm:$0xff] %vm257_vm0, %v354_v21  ;;  %389 = vst.msk [vmem:[#allocation2 + $0x1b0] sm:$0xff] %vm257_vm0, %v355_v22 }
  0x47   : > { %v1533_v46 = vsel %vm876_vm1, %v1530_v29, %v1532_v30  ;;  %v1657_v56 = vadd.f32 %v1529_v4, %v1381_v38  ;;  %v1383_v59 = vadd.f32 %v1286_v27, %v1171_v41  ;;  %v1531_v49 = vsel %vm876_vm1, %v1529_v4, %v1530_v29  ;;  %v3667_v29 = vld [vmem:[#allocation2 + $0x68] sm:$0xff] }
  0x48   : > { %v2186_v0 = vsel %vm876_vm1, %v2183_v45, %v2185_v47  ;;  %v1775_v62 = vmul.f32 %v3518_v33, %v3551_v51  ;;  %v1006_v7 = vadd.f32 %v879_v53, %v729_v60  ;;  %v1940_v8 = vsel %vm631_vm2, %v1938_v5, %v1939_v43 }
  0x49   : > { %v1822_v63 = vadd.f32 %v3543_v44, %v1657_v56  ;;  %v1659_v42 = vadd.f32 %v1533_v46, %v1383_v59  ;;  %v2184_v9 = vsel %vm876_vm1, %v2182_v6, %v2183_v45  ;;  %v470_v3 = vmul.f32 %v3532_v39, %v3490_v18 }
  0x4a   : > { %v3636_v4 = vmul.f32 %v3549_v50, %v3492_v19  ;;  %v3640_v44 = vmul.f32 %v3549_v50, %v3494_v20  ;;  %v1170_v13 = vadd.f32 %v1122_v61, %v1006_v7  ;;  %v3655_v17 = vmul.f32 %v3551_v51, %v3510_v28 }
  0x4b   : > { %v2034_v10 = vadd.f32 %v1938_v5, %v1822_v63  ;;  %v1824_v12 = vadd.f32 %v1776_v15, %v1659_v42  ;;  %v3659_v5 = vmul.f32 %v3551_v51, %v3516_v32  ;;  %v3661_v15 = vld [vmem:[#allocation2 + $0x60] sm:$0xff]  ;;  %v3688_v47 = vmul.f32 %v3522_v35, %v3667_v29 }
  0x4c   : > { %v5522_v39 = vrot.slane %v3636_v4, 1  ;;  %v5520_v16 = vrot.slane %v3640_v44, 2  ;;  %v1382_v27 = vadd.f32 %v1287_v48, %v1170_v13  ;;  %v1777_v30 = vmul.f32 %v3518_v33, %v3661_v15  ;;  %v3721_v13 = vld [vmem:[#allocation2 + $0x70] sm:$0xff] }
  0x4d   : > { %v2310_v25 = vadd.f32 %v2182_v6, %v2034_v10  ;;  %v2036_v26 = vadd.f32 %v1939_v43, %v1824_v12  ;;  %v5517_v36 = vrot.slane %v3655_v17, 1  ;;  %v5515_v57 = vrot.slane %v3659_v5, 2 }
  0x4e   : > { %v731_v31 = vadd.f32 %v5522_v39, %v470_v3  ;;  %v3679_v6 = vmul.f32 %v3520_v34, %v3667_v29  ;;  %v1658_v43 = vadd.f32 %v1531_v49, %v1382_v27  ;;  %v472_v52 = vmul.f32 %v3571_v58, %v3490_v18 }
  0x4f   : > { %v2407_v37 = vrot.slane %v2310_v25, 7  ;;  %v2588_v38 = vmul.f32 %v2310_v25, %v2310_v25  ;;  %2873 = vst.msk [vmem:[%s3649_s18 - $0x7] sm:$0x80] %vm2872_vm3, %v2310_v25  ;;  %v2312_v41 = vadd.f32 %v2186_v0, %v2036_v26  ;;  %v5510_v60 = vrot.slane %v3688_v47, 2 }
  0x50   : > { %v1008_v45 = vadd.f32 %v5520_v16, %v731_v31  ;;  %v5512_v46 = vrot.slane %v3679_v6, 1  ;;  %v1823_v56 = vadd.f32 %v1775_v62, %v1658_v43  ;;  %v3697_v61 = vmul.f32 %v3571_v58, %v3492_v19 }
  0x51   : > { %v2684_v53 = vrot.slane %v2588_v38, 7  ;;  %v2410_v54 = vrot.slane %v2312_v41, 7  ;;  %v2590_v55 = vmul.f32 %v2312_v41, %v2312_v41  ;;  %2876 = vst.msk [vmem:[%s3649_s18 + $0x9] sm:$0x7f] %vm2875_vm4, %v2312_v41  ;;  %v3701_v0 = vmul.f32 %v3571_v58, %v3494_v20 }
  0x52   : > { %v1172_v59 = vadd.f32 %v1124_v14, %v1008_v45  ;;  %v2035_v49 = vadd.f32 %v1940_v8, %v1823_v56  ;;  %v785_v63 = vmul.f32 %v3575_v2, %v3494_v20  ;;  %v1126_v42 = vmul.f32 %v3586_v11, %v3502_v24 }
  0x53   : > { %v2687_v48 = vrot.slane %v2590_v55, 7  ;;  %v5523_v7 = vrot.slane %v3697_v61, 1  ;;  %v5521_v3 = vrot.slane %v3701_v0, 2  ;;  %v3713_v58 = vmul.f32 %v3586_v11, %v3510_v28 }
  0x54   : > { %v1384_v62 = vadd.f32 %v5517_v36, %v1172_v59  ;;  %v2311_v10 = vadd.f32 %v2184_v9, %v2035_v49  ;;  %v885_v8 = vrot.slane %v785_v63, 2  ;;  %v3717_v2 = vmul.f32 %v3586_v11, %v3516_v32 }
  0x55   : > { %v1438_v12 = vmul.f32 %v3598_v23, %v3516_v32  ;;  %v733_v21 = vadd.f32 %v5523_v7, %v472_v52  ;;  %v5518_v22 = vrot.slane %v3713_v58, 1  ;;  %v1779_v9 = vmul.f32 %v3518_v33, %v3721_v13 }
  0x56   : > { %v1660_v14 = vadd.f32 %v5515_v57, %v1384_v62  ;;  %v2408_v25 = vrot.slane %v2311_v10, 7  ;;  %v2589_v26 = vmul.f32 %v2311_v10, %v2311_v10  ;;  %2874 = vst.msk [vmem:[%s3649_s18 + $0x1] sm:$0xff] %vm257_vm0, %v2311_v10  ;;  %v886_v27 = vsel %vm876_vm1, %v5521_v3, %v885_v8  ;;  %v3865_v3 = vld [vmem:[#allocation2 + $0x98] sm:$0xff] }
  0x57   : > { %v5516_v31 = vrot.slane %v3717_v2, 2  ;;  %v1010_v41 = vadd.f32 %v886_v27, %v733_v21  ;;  %v1537_v43 = vrot.slane %v1438_v12, 2  ;;  %v3738_v45 = vmul.f32 %v3520_v34, %v3721_v13  ;;  %5537 = vst [vmem:[#allocation10_spill] sm:$0xff] %v3865_v3 }
  0x58   : > { %v1825_v38 = vadd.f32 %v1777_v30, %v1660_v14  ;;  %v2409_v52 = vsel %vm2406_vm5, %v2407_v37, %v2408_v25  ;;  %v2411_v55 = vsel %vm2406_vm5, %v2408_v25, %v2410_v54  ;;  %v2685_v56 = vrot.slane %v2589_v26, 7  ;;  %v3765_v25 = vld [vmem:[#allocation2 + $0x78] sm:$0xff] }
  0x59   : > { %v3744_v59 = vmul.f32 %v3522_v35, %v3721_v13  ;;  %v2519_v49 = vsel %vm257_vm0, %v2409_v52, 0.0  ;;  %v2520_v63 = vsel %vm257_vm0, %v2411_v55, 0.0  ;;  %v1174_v62 = vadd.f32 %v1126_v42, %v1010_v41  ;;  %5533 = vst [vmem:[#allocation6_spill] sm:$0xff] %v3765_v25 }
  0x5a   : > { %v2037_v30 = vadd.f32 %v5512_v46, %v1825_v38  ;;  %v3750_v10 = vadd.f32 %v2520_v63, %v2519_v49  ;;  %v2686_v37 = vsel %vm2406_vm5, %v2684_v53, %v2685_v56  ;;  %v2688_v54 = vsel %vm2406_vm5, %v2685_v56, %v2687_v48 }
  0x5b   : > { %v1538_v8 = vsel %vm876_vm1, %v5516_v31, %v1537_v43  ;;  %v2796_v12 = vsel %vm257_vm0, %v2686_v37, 0.0  ;;  %v2797_v14 = vsel %vm257_vm0, %v2688_v54, 0.0  ;;  %v1386_v42 = vadd.f32 %v5518_v22, %v1174_v62  ;;  %v3802_v54 = vld [vmem:[#allocation2 + $0x80] sm:$0xff] }
  0x5c   : > { %v3761_v21 = vadd.f32 %v5510_v60, %v2037_v30  ;;  %v3767_v53 = vadd.f32 %v2797_v14, %v2796_v12  ;;  %v5513_v48 = vrot.slane %v3738_v45, 1  ;;  %v2091_v26 = vmul.f32 %v3522_v35, %v3765_v25 }
  0x5d   : > { %v5511_v27 = vrot.slane %v3744_v59, 2  ;;  %v1662_v43 = vadd.f32 %v1538_v8, %v1386_v42  ;;  %v473_v52 = vmul.f32 %v3534_v40, %v3490_v18  ;;  %v3785_v56 = vmul.f32 %v3551_v51, %v3492_v19  ;;  %v3809_v42 = vld [vmem:[#allocation2 + $0x88] sm:$0xff] }
  0x5e   : > { %5534 = vst [vmem:[#allocation7_spill] sm:$0xff] %v3767_v53  ;;  %v3776_v41 = vmul.f32 %v3761_v21, %v3761_v21  ;;  %2877 = vst.msk [vmem:[%s3649_s18 + $0x9] sm:$0x80] %vm2872_vm3, %v3761_v21  ;;  %v2190_v55 = vrot.slane %v2091_v26, 2  ;;  %v3789_v49 = vmul.f32 %v3551_v51, %v3494_v20  ;;  %v1127_v63 = vmul.f32 %v3661_v15, %v3502_v24 }
  0x5f   : > { %v1827_v62 = vadd.f32 %v1779_v9, %v1662_v43  ;;  %v3796_v37 = vmul.f32 %v3667_v29, %v3510_v28  ;;  %v3800_v40 = vmul.f32 %v3667_v29, %v3516_v32  ;;  %v5514_v12 = vrot.slane %v3785_v56, 1 }
  0x60   : > { %v2191_v8 = vsel %vm876_vm1, %v5511_v27, %v2190_v55  ;;  %v5519_v14 = vrot.slane %v3789_v49, 2  ;;  %v1780_v9 = vmul.f32 %v3518_v33, %v3802_v54  ;;  %v3819_v55 = vmul.f32 %v3520_v34, %v3809_v42 }
  0x61   : > { %v2039_v26 = vadd.f32 %v5513_v48, %v1827_v62  ;;  %v5525_v43 = vrot.slane %v3796_v37, 1  ;;  %v1539_v1 = vrot.slane %v3800_v40, 2  ;;  %v734_v30 = vadd.f32 %v5514_v12, %v473_v52 }
  0x62   : > { %v3825_v38 = vmul.f32 %v3522_v35, %v3809_v42  ;;  %v475_v60 = vmul.f32 %v3586_v11, %v3490_v18  ;;  %v572_v62 = vmul.f32 %v3586_v11, %v3492_v19  ;;  %v787_v48 = vmul.f32 %v3586_v11, %v3494_v20 }
  0x63   : > { %v3831_v27 = vadd.f32 %v2191_v8, %v2039_v26  ;;  %v788_v52 = vmul.f32 %v3598_v23, %v3494_v20  ;;  %v1011_v12 = vadd.f32 %v5519_v14, %v734_v30  ;;  %v1129_v36 = vmul.f32 %v3721_v13, %v3502_v24  ;;  %v3855_v14 = vld [vmem:[#allocation2 + $0x90] sm:$0xff] }
  0x64   : > { %v639_v31 = vrot.slane %v572_v62, 1  ;;  %v888_v11 = vrot.slane %v787_v48, 2  ;;  %v1226_v30 = vmul.f32 %v3721_v13, %v3510_v28  ;;  %v1440_v62 = vmul.f32 %v3721_v13, %v3516_v32  ;;  %5536 = vst [vmem:[#allocation9_spill] sm:$0xff] %v3855_v14 }
  0x65   : > { %v3846_v26 = vmul.f32 %v3831_v27, %v3831_v27  ;;  %2879 = vst.msk [vmem:[%s3649_s18 + $0x19] sm:$0x7f] %vm2875_vm4, %v3831_v27  ;;  %v890_v23 = vrot.slane %v788_v52, 2  ;;  %v1175_v46 = vadd.f32 %v1127_v63, %v1011_v12  ;;  %v1441_v16 = vmul.f32 %v3765_v25, %v3516_v32 }
  0x66   : > { %v736_v22 = vadd.f32 %v639_v31, %v475_v60  ;;  %v1782_v60 = vmul.f32 %v3518_v33, %v3855_v14  ;;  %v1292_v12 = vrot.slane %v1226_v30, 1  ;;  %v1540_v52 = vrot.slane %v1440_v62, 2  ;;  %v356_v30 = vld [vmem:[%s3464_s30 + $0xd0] sm:$0xff]  ;;  %v357_v62 = vld [vmem:[%s3464_s30 + $0xd8] sm:$0xff] }
  0x67   : > { %5535 = vst [vmem:[#allocation8_spill] sm:$0xff] %v3846_v26  ;;  %v891_v57 = vsel %vm876_vm1, %v888_v11, %v890_v23  ;;  %v1387_v48 = vadd.f32 %v5525_v43, %v1175_v46  ;;  %v1542_v39 = vrot.slane %v1441_v16, 2  ;;  %v1879_v23 = vmul.f32 %v3520_v34, %v3855_v14  ;;  %390 = vst.msk [vmem:[#allocation2 + $0x1c8] sm:$0xff] %vm257_vm0, %v356_v30 }
  0x68   : > { %v1013_v63 = vadd.f32 %v891_v57, %v736_v22  ;;  %v2093_v8 = vmul.f32 %v3522_v35, %v3855_v14  ;;  %v2094_v7 = vmul.f32 %v3522_v35, %v3865_v3  ;;  %v471_v57 = vmul.f32 %v3549_v50, %v3490_v18  ;;  %391 = vst.msk [vmem:[#allocation2 + $0x1d0] sm:$0xff] %vm257_vm0, %v357_v62 }
  0x69   : > { %v1663_v25 = vadd.f32 %v1539_v1, %v1387_v48  ;;  %v5538_v46 = vrot.slane %v3697_v61, 1  ;;  %v5539_v16 = vrot.slane %v3636_v4, 1  ;;  %v1543_v43 = vsel %vm876_vm1, %v1540_v52, %v1542_v39 }
  0x6a   : > { %v1177_v53 = vadd.f32 %v1129_v36, %v1013_v63  ;;  %v1945_v14 = vrot.slane %v1879_v23, 1  ;;  %v2193_v26 = vrot.slane %v2093_v8, 2  ;;  %v2195_v3 = vrot.slane %v2094_v7, 2 }
  0x6b   : > { %v637_v22 = vsel %vm631_vm2, %v5539_v16, %v5538_v46  ;;  %v1828_v36 = vadd.f32 %v1780_v9, %v1663_v25  ;;  %v5540_v61 = vrot.slane %v3701_v0, 2  ;;  %v5541_v4 = vrot.slane %v3640_v44, 2 }
  0x6c   : > { %v1389_v48 = vadd.f32 %v1292_v12, %v1177_v53  ;;  %v732_v50 = vadd.f32 %v637_v22, %v471_v57  ;;  %v2196_v46 = vsel %vm876_vm1, %v2193_v26, %v2195_v3  ;;  %v1125_v39 = vmul.f32 %v3551_v51, %v3502_v24 }
  0x6d   : > { %v884_v63 = vsel %vm876_vm1, %v5541_v4, %v5540_v61  ;;  %v5542_v7 = vrot.slane %v3713_v58, 1  ;;  %v5543_v8 = vrot.slane %v3655_v17, 1  ;;  %v5544_v25 = vrot.slane %v3717_v2, 2 }
  0x6e   : > { %v5545_v53 = vrot.slane %v3659_v5, 2  ;;  %v5546_v44 = vrot.slane %v3819_v55, 1  ;;  %v1665_v57 = vadd.f32 %v1543_v43, %v1389_v48  ;;  %v1009_v3 = vadd.f32 %v884_v63, %v732_v50 }
  0x6f   : > { %v1290_v23 = vsel %vm631_vm2, %v5543_v8, %v5542_v7  ;;  %v1778_v16 = vmul.f32 %v3518_v33, %v3667_v29  ;;  %v5547_v58 = vrot.slane %v3738_v45, 1  ;;  %v5548_v17 = vrot.slane %v3679_v6, 1 }
  0x70   : > { %v1536_v0 = vsel %vm876_vm1, %v5545_v53, %v5544_v25  ;;  %v2040_v9 = vadd.f32 %v5546_v44, %v1828_v36  ;;  %v5549_v2 = vrot.slane %v3744_v59, 2  ;;  %v5550_v5 = vrot.slane %v3688_v47, 2 }
  0x71   : > { %v1943_v22 = vsel %vm631_vm2, %v5548_v17, %v5547_v58  ;;  %v474_v43 = vmul.f32 %v3551_v51, %v3490_v18  ;;  %v5551_v62 = vrot.slane %v3785_v56, 1  ;;  %v5552_v48 = vrot.slane %v3825_v38, 2  ;;  %v3982_v58 = vld [vmem:[#allocation2 + $0xa0] sm:$0xff] }
  0x72   : > { %v2189_v30 = vsel %vm876_vm1, %v5550_v5, %v5549_v2  ;;  %v1830_v6 = vadd.f32 %v1782_v60, %v1665_v57  ;;  %v1173_v50 = vadd.f32 %v1125_v39, %v1009_v3  ;;  %v5553_v61 = vrot.slane %v3789_v49, 2 }
  0x73   : > { %v640_v36 = vsel %vm631_vm2, %v5551_v62, %v639_v31  ;;  %v3926_v45 = vadd.f32 %v5552_v48, %v2040_v9  ;;  %v1128_v4 = vmul.f32 %v3667_v29, %v3502_v24  ;;  %v5554_v51 = vrot.slane %v3796_v37, 1 }
  0x74   : > { %v889_v59 = vsel %vm876_vm1, %v5553_v61, %v888_v11  ;;  %v735_v47 = vadd.f32 %v640_v36, %v474_v43  ;;  %v1541_v31 = vsel %vm876_vm1, %v1539_v1, %v1540_v52  ;;  %v2042_v49 = vadd.f32 %v1945_v14, %v1830_v6  ;;  %v3986_v43 = vld [vmem:[#allocation2 + $0xa8] sm:$0xff] }
  0x75   : > { %v1293_v56 = vsel %vm631_vm2, %v5554_v51, %v1292_v12  ;;  %v2417_v63 = vrot.slane %v3926_v45, 7  ;;  %v3942_v60 = vmul.f32 %v3926_v45, %v3926_v45  ;;  %2880 = vst.msk [vmem:[%s3649_s18 + $0x19] sm:$0x80] %vm2872_vm3, %v3926_v45  ;;  %v1385_v11 = vadd.f32 %v1290_v23, %v1173_v50 }
  0x76   : > { %v1012_v39 = vadd.f32 %v889_v59, %v735_v47  ;;  %v1781_v37 = vmul.f32 %v3518_v33, %v3809_v42  ;;  %v5555_v40 = vmov %v5546_v44  ;;  %v5556_v12 = vmov %v5552_v48 }
  0x77   : > { %v1946_v1 = vsel %vm631_vm2, %v5555_v40, %v1945_v14  ;;  %v2194_v52 = vsel %vm876_vm1, %v5556_v12, %v2193_v26  ;;  %v2694_v7 = vrot.slane %v3942_v60, 7  ;;  %v3956_v8 = vadd.f32 %v2196_v46, %v2042_v49 }
  0x78   : > { %v1661_v25 = vadd.f32 %v1536_v0, %v1385_v11  ;;  %v476_v23 = vmul.f32 %v3661_v15, %v3490_v18  ;;  %v1176_v53 = vadd.f32 %v1128_v4, %v1012_v39  ;;  %v573_v44 = vmul.f32 %v3667_v29, %v3492_v19 }
  0x79   : > { %v789_v55 = vmul.f32 %v3667_v29, %v3494_v20  ;;  %v1130_v38 = vmul.f32 %v3802_v54, %v3502_v24  ;;  %v2420_v14 = vrot.slane %v3956_v8, 7  ;;  %v3969_v26 = vmul.f32 %v3956_v8, %v3956_v8  ;;  %2882 = vst.msk [vmem:[%s3649_s18 + $0x29] sm:$0x7f] %vm2875_vm4, %v3956_v8 }
  0x7a   : > { %v1826_v15 = vadd.f32 %v1778_v16, %v1661_v25  ;;  %v3976_v46 = vmul.f32 %v3809_v42, %v3510_v28  ;;  %v1388_v0 = vadd.f32 %v1293_v56, %v1176_v53  ;;  %v641_v9 = vrot.slane %v573_v44, 1 }
  0x7b   : > { %v892_v57 = vrot.slane %v789_v55, 2  ;;  %v3980_v3 = vmul.f32 %v3809_v42, %v3516_v32  ;;  %v2697_v17 = vrot.slane %v3969_v26, 7  ;;  %v1783_v16 = vmul.f32 %v3518_v33, %v3982_v58 }
  0x7c   : > { %v2038_v2 = vadd.f32 %v1943_v22, %v1826_v15  ;;  %v1294_v5 = vrot.slane %v3976_v46, 1  ;;  %v1664_v62 = vadd.f32 %v1541_v31, %v1388_v0  ;;  %v737_v36 = vadd.f32 %v641_v9, %v476_v23  ;;  %v5560_v0 = vld [vmem:[#allocation8_spill] sm:$0xff] }
  0x7d   : > { %v1544_v48 = vrot.slane %v3980_v3, 2  ;;  %v3993_v6 = vmul.f32 %v3520_v34, %v3986_v43  ;;  %v3997_v22 = vmul.f32 %v3522_v35, %v3986_v43  ;;  %v477_v61 = vmul.f32 %v3667_v29, %v3490_v18 }
  0x7e   : > { %v2314_v50 = vadd.f32 %v2189_v30, %v2038_v2  ;;  %v4003_v59 = vmul.f32 %v3721_v13, %v3492_v19  ;;  %v1829_v47 = vadd.f32 %v1781_v37, %v1664_v62  ;;  %v1014_v4 = vadd.f32 %v892_v57, %v737_v36 }
  0x7f   : > { %v1947_v51 = vrot.slane %v3993_v6, 1  ;;  %v4008_v56 = vmul.f32 %v3721_v13, %v3494_v20  ;;  %v2197_v49 = vrot.slane %v3997_v22, 2  ;;  %v1131_v37 = vmul.f32 %v3809_v42, %v3502_v24 }
  0x80   : > { %v2413_v30 = vrot.slane %v2314_v50, 7  ;;  %v2592_v31 = vmul.f32 %v2314_v50, %v2314_v50  ;;  %2878 = vst.msk [vmem:[%s3649_s18 + $0x11] sm:$0xff] %vm257_vm0, %v2314_v50  ;;  %v642_v29 = vrot.slane %v4003_v59, 1  ;;  %v2041_v11 = vadd.f32 %v1946_v1, %v1829_v47 }
  0x81   : > { %v1178_v39 = vadd.f32 %v1130_v38, %v1014_v4  ;;  %v893_v40 = vrot.slane %v4008_v56, 2  ;;  %v5557_v12 = vrot.slane %v3761_v21, 7  ;;  %v5558_v25 = vrot.slane %v3831_v27, 7 }
  0x82   : > { %v2690_v53 = vrot.slane %v2592_v31, 7  ;;  %v643_v1 = vsel %vm631_vm2, %v641_v9, %v642_v29  ;;  %v2317_v38 = vadd.f32 %v2194_v52, %v2041_v11  ;;  %v5559_v27 = vrot.slane %v3776_v41, 7 }
  0x83   : > { %v2414_v8 = vsel %vm2406_vm5, %v5557_v12, %v2413_v30  ;;  %v2416_v23 = vsel %vm2406_vm5, %v2413_v30, %v5558_v25  ;;  %v1390_v21 = vadd.f32 %v1294_v5, %v1178_v39  ;;  %v5561_v2 = vrot.slane %v5560_v0, 7  ;;  %v5562_v30 = vld [vmem:[#allocation7_spill] sm:$0xff] }
  0x84   : > { %v2522_v44 = vsel %vm257_vm0, %v2414_v8, 0.0  ;;  %v2524_v55 = vsel %vm257_vm0, %v2416_v23, 0.0  ;;  %v2691_v15 = vsel %vm2406_vm5, %v5559_v27, %v2690_v53  ;;  %v738_v36 = vadd.f32 %v643_v1, %v477_v61  ;;  %2881 = vst.msk [vmem:[%s3649_s18 + $0x21] sm:$0xff] %vm257_vm0, %v2317_v38 }
  0x85   : > { %v2523_v26 = vadd.f32 %v2522_v44, %v3750_v10  ;;  %v2693_v62 = vsel %vm2406_vm5, %v2690_v53, %v5561_v2  ;;  %v2799_v9 = vsel %vm257_vm0, %v2691_v15, 0.0  ;;  %v2418_v47 = vrot.slane %v2317_v38, 7 }
  0x86   : > { %v2801_v50 = vsel %vm257_vm0, %v2693_v62, 0.0  ;;  %v2595_v52 = vmul.f32 %v2317_v38, %v2317_v38  ;;  %v2800_v10 = vadd.f32 %v2799_v9, %v5562_v30  ;;  %v1666_v41 = vadd.f32 %v1544_v48, %v1390_v21  ;;  %v5563_v38 = vld [vmem:[#allocation9_spill] sm:$0xff]  ;;  %v5564_v9 = vld [vmem:[#allocation6_spill] sm:$0xff] }
  0x87   : > { %v2525_v4 = vadd.f32 %v2524_v55, %v2523_v26  ;;  %v894_v31 = vsel %vm876_vm1, %v892_v57, %v893_v40  ;;  %v2419_v61 = vsel %vm2406_vm5, %v2417_v63, %v2418_v47  ;;  %v2421_v11 = vsel %vm2406_vm5, %v2418_v47, %v2420_v14 }
  0x88   : > { %v2695_v39 = vrot.slane %v2595_v52, 7  ;;  %v1015_v12 = vadd.f32 %v894_v31, %v738_v36  ;;  %v2802_v8 = vadd.f32 %v2801_v50, %v2800_v10  ;;  %v2526_v25 = vsel %vm257_vm0, %v2419_v61, 0.0 }
  0x89   : > { %v2528_v23 = vsel %vm257_vm0, %v2421_v11, 0.0  ;;  %v1831_v53 = vadd.f32 %v1783_v16, %v1666_v41  ;;  %v2527_v1 = vadd.f32 %v2526_v25, %v2525_v4  ;;  %v1228_v21 = vmul.f32 %v5563_v38, %v3510_v28 }
  0x8a   : > { %v2696_v44 = vsel %vm2406_vm5, %v2694_v7, %v2695_v39  ;;  %v2698_v57 = vsel %vm2406_vm5, %v2695_v39, %v2697_v17  ;;  %v1179_v45 = vadd.f32 %v1131_v37, %v1015_v12  ;;  %v1443_v60 = vmul.f32 %v5563_v38, %v3516_v32  ;;  %v4067_v7 = vld [vmem:[#allocation2 + $0xb0] sm:$0xff] }
  0x8b   : > { %v2803_v63 = vsel %vm257_vm0, %v2696_v44, 0.0  ;;  %v2805_v14 = vsel %vm257_vm0, %v2698_v57, 0.0  ;;  %v2043_v55 = vadd.f32 %v1947_v51, %v1831_v53  ;;  %v4063_v16 = vadd.f32 %v2528_v23, %v2527_v1 }
  0x8c   : > { %v2804_v26 = vadd.f32 %v2803_v63, %v2802_v8  ;;  %v1784_v17 = vmul.f32 %v3518_v33, %v3986_v43  ;;  %v1295_v27 = vrot.slane %v1228_v21, 1  ;;  %v4077_v15 = vmul.f32 %v3520_v34, %v4067_v7 }
  0x8d   : > { %v4073_v37 = vadd.f32 %v2197_v49, %v2043_v55  ;;  %v2096_v0 = vmul.f32 %v3522_v35, %v4067_v7  ;;  %v1545_v62 = vrot.slane %v1443_v60, 2  ;;  %v478_v36 = vmul.f32 %v3721_v13, %v3490_v18 }
  0x8e   : > { %v4081_v2 = vadd.f32 %v2805_v14, %v2804_v26  ;;  %v791_v50 = vmul.f32 %v5564_v9, %v3494_v20  ;;  %v1296_v4 = vsel %vm631_vm2, %v1294_v5, %v1295_v27  ;;  %v1948_v30 = vrot.slane %v4077_v15, 1  ;;  %v4139_v14 = vld [vmem:[#allocation2 + $0xc0] sm:$0xff] }
  0x8f   : > { %v2422_v47 = vrot.slane %v4073_v37, 7  ;;  %v4090_v52 = vmul.f32 %v4073_v37, %v4073_v37  ;;  %2883 = vst.msk [vmem:[%s3649_s18 + $0x29] sm:$0x80] %vm2872_vm3, %v4073_v37  ;;  %v1391_v10 = vadd.f32 %v1296_v4, %v1179_v45  ;;  %v1546_v13 = vsel %vm876_vm1, %v1544_v48, %v1545_v62  ;;  %v5565_v48 = vld [vmem:[#allocation10_spill] sm:$0xff] }
  0x90   : > { %v2198_v41 = vrot.slane %v2096_v0, 2  ;;  %v739_v31 = vadd.f32 %v642_v29, %v478_v36  ;;  %v1949_v46 = vsel %vm631_vm2, %v1947_v51, %v1948_v30  ;;  %v895_v5 = vrot.slane %v791_v50, 2  ;;  %v4117_v29 = vld [vmem:[#allocation2 + $0xb8] sm:$0xff]  ;;  %v358_v37 = vld [vmem:[%s3464_s30 + $0xe0] sm:$0xff]  ;;  %v359_v0 = vld [vmem:[%s3464_s30 + $0xe8] sm:$0xff] }
  0x91   : > { %v2699_v61 = vrot.slane %v4090_v52, 7  ;;  %v1132_v11 = vmul.f32 %v5563_v38, %v3502_v24  ;;  %v1667_v39 = vadd.f32 %v1546_v13, %v1391_v10  ;;  %v1444_v59 = vmul.f32 %v5565_v48, %v3516_v32  ;;  %392 = vst.msk [vmem:[#allocation2 + $0x1e8] sm:$0xff] %vm257_vm0, %v358_v37  ;;  %393 = vst.msk [vmem:[#allocation2 + $0x1f0] sm:$0xff] %vm257_vm0, %v359_v0 }
  0x92   : > { %v2199_v3 = vsel %vm876_vm1, %v2197_v49, %v2198_v41  ;;  %v1785_v12 = vmul.f32 %v3518_v33, %v4067_v7  ;;  %v896_v6 = vsel %vm876_vm1, %v893_v40, %v895_v5  ;;  %v2097_v51 = vmul.f32 %v3522_v35, %v4117_v29 }
  0x93   : > { %v479_v22 = vmul.f32 %v3802_v54, %v3490_v18  ;;  %v575_v49 = vmul.f32 %v3809_v42, %v3492_v19  ;;  %v1832_v8 = vadd.f32 %v1784_v17, %v1667_v39  ;;  %v1016_v25 = vadd.f32 %v896_v6, %v739_v31  ;;  %v4147_v17 = vld [vmem:[#allocation2 + $0xc8] sm:$0xff] }
  0x94   : > { %v1547_v23 = vrot.slane %v1444_v59, 2  ;;  %v792_v53 = vmul.f32 %v3809_v42, %v3494_v20  ;;  %v2200_v56 = vrot.slane %v2097_v51, 2  ;;  %v1133_v40 = vmul.f32 %v3982_v58, %v3502_v24 }
  0x95   : > { %v644_v1 = vrot.slane %v575_v49, 1  ;;  %v4136_v44 = vmul.f32 %v3986_v43, %v3510_v28  ;;  %v2044_v54 = vadd.f32 %v1949_v46, %v1832_v8  ;;  %v1180_v57 = vadd.f32 %v1132_v11, %v1016_v25 }
  0x96   : > { %v1548_v45 = vsel %vm876_vm1, %v1545_v62, %v1547_v23  ;;  %v897_v63 = vrot.slane %v792_v53, 2  ;;  %v2201_v55 = vsel %vm876_vm1, %v2198_v41, %v2200_v56  ;;  %v4145_v60 = vmul.f32 %v3986_v43, %v3516_v32 }
  0x97   : > { %v740_v21 = vadd.f32 %v644_v1, %v479_v22  ;;  %v1297_v26 = vrot.slane %v4136_v44, 1  ;;  %v2320_v36 = vadd.f32 %v2199_v3, %v2044_v54  ;;  %v1392_v9 = vadd.f32 %v1295_v27, %v1180_v57 }
  0x98   : > { %v1786_v62 = vmul.f32 %v3518_v33, %v4139_v14  ;;  %v1882_v50 = vmul.f32 %v3520_v34, %v4147_v17  ;;  %v1549_v4 = vrot.slane %v4145_v60, 2  ;;  %v4160_v10 = vmul.f32 %v3522_v35, %v4147_v17 }
  0x99   : > { %v1017_v52 = vadd.f32 %v897_v63, %v740_v21  ;;  %v480_v27 = vmul.f32 %v3809_v42, %v3490_v18  ;;  %v2423_v13 = vrot.slane %v2320_v36, 7  ;;  %v2598_v41 = vmul.f32 %v2320_v36, %v2320_v36  ;;  %2884 = vst.msk [vmem:[%s3649_s18 + $0x31] sm:$0xff] %vm257_vm0, %v2320_v36 }
  0x9a   : > { %v1668_v31 = vadd.f32 %v1548_v45, %v1392_v9  ;;  %v1950_v46 = vrot.slane %v1882_v50, 1  ;;  %v2202_v11 = vrot.slane %v4160_v10, 2  ;;  %v576_v39 = vmul.f32 %v5563_v38, %v3492_v19 }
  0x9b   : > { %v1181_v5 = vadd.f32 %v1133_v40, %v1017_v52  ;;  %v4171_v3 = vmul.f32 %v5563_v38, %v3494_v20  ;;  %v2424_v59 = vsel %vm2406_vm5, %v2422_v47, %v2423_v13  ;;  %v2700_v6 = vrot.slane %v2598_v41, 7 }
  0x9c   : > { %v1833_v42 = vadd.f32 %v1785_v12, %v1668_v31  ;;  %v1134_v51 = vmul.f32 %v3986_v43, %v3502_v24  ;;  %v2530_v22 = vsel %vm257_vm0, %v2424_v59, 0.0  ;;  %v645_v8 = vrot.slane %v576_v39, 1 }
  0x9d   : > { %v1393_v49 = vadd.f32 %v1297_v26, %v1181_v5  ;;  %v898_v25 = vrot.slane %v4171_v3, 2  ;;  %v2531_v23 = vadd.f32 %v2530_v22, %v4063_v16  ;;  %v2701_v53 = vsel %vm2406_vm5, %v2699_v61, %v2700_v6 }
  0x9e   : > { %v2045_v56 = vadd.f32 %v1948_v30, %v1833_v42  ;;  %v4184_v47 = vmul.f32 %v4067_v7, %v3510_v28  ;;  %v2807_v12 = vsel %vm257_vm0, %v2701_v53, 0.0  ;;  %v646_v44 = vsel %vm631_vm2, %v644_v1, %v645_v8  ;;  %v4193_v30 = vld [vmem:[#allocation2 + $0xd0] sm:$0xff] }
  0x9f   : > { %v1669_v40 = vadd.f32 %v1549_v4, %v1393_v49  ;;  %v899_v54 = vsel %vm876_vm1, %v897_v63, %v898_v25  ;;  %v2808_v16 = vadd.f32 %v2807_v12, %v4081_v2  ;;  %v741_v57 = vadd.f32 %v646_v44, %v480_v27 }
  0xa0   : > { %v2321_v61 = vadd.f32 %v2201_v55, %v2045_v56  ;;  %v1298_v15 = vrot.slane %v4184_v47, 1  ;;  %v1446_v21 = vmul.f32 %v4067_v7, %v3516_v32  ;;  %v1787_v60 = vmul.f32 %v3518_v33, %v4147_v17 }
  0xa1   : > { %v1834_v45 = vadd.f32 %v1786_v62, %v1669_v40  ;;  %v4201_v1 = vmul.f32 %v3520_v34, %v4193_v30  ;;  %v1018_v2 = vadd.f32 %v899_v54, %v741_v57  ;;  %v2099_v62 = vmul.f32 %v3522_v35, %v4193_v30  ;;  %v4232_v40 = vld [vmem:[#allocation2 + $0xd8] sm:$0xff] }
  0xa2   : > { %v2425_v63 = vrot.slane %v2321_v61, 7  ;;  %v2599_v37 = vmul.f32 %v2321_v61, %v2321_v61  ;;  %2885 = vst.msk [vmem:[%s3649_s18 + $0x39] sm:$0x7f] %vm2875_vm4, %v2321_v61  ;;  %v1299_v55 = vsel %vm631_vm2, %v1297_v26, %v1298_v15  ;;  %v1550_v36 = vrot.slane %v1446_v21, 2 }
  0xa3   : > { %v2046_v0 = vadd.f32 %v1950_v46, %v1834_v45  ;;  %v1951_v9 = vrot.slane %v4201_v1, 1  ;;  %v1182_v10 = vadd.f32 %v1134_v51, %v1018_v2  ;;  %v481_v27 = vmul.f32 %v5563_v38, %v3490_v18 }
  0xa4   : > { %v2426_v50 = vsel %vm2406_vm5, %v2423_v13, %v2425_v63  ;;  %v2702_v52 = vrot.slane %v2599_v37, 7  ;;  %v1551_v26 = vsel %vm876_vm1, %v1549_v4, %v1550_v36  ;;  %v2203_v22 = vrot.slane %v2099_v62, 2 }
  0xa5   : > { %v2532_v41 = vsel %vm257_vm0, %v2426_v50, 0.0  ;;  %v2322_v31 = vadd.f32 %v2202_v11, %v2046_v0  ;;  %v1952_v5 = vsel %vm631_vm2, %v1950_v46, %v1951_v9  ;;  %v1394_v42 = vadd.f32 %v1299_v55, %v1182_v10  ;;  %v4262_v10 = vld [vmem:[#allocation2 + $0xe8] sm:$0xff] }
  0xa6   : > { %v2533_v39 = vadd.f32 %v2532_v41, %v2531_v23  ;;  %v2703_v59 = vsel %vm2406_vm5, %v2700_v6, %v2702_v52  ;;  %v742_v38 = vadd.f32 %v645_v8, %v481_v27  ;;  %v2204_v4 = vsel %vm876_vm1, %v2202_v11, %v2203_v22 }
  0xa7   : > { %v2809_v13 = vsel %vm257_vm0, %v2703_v59, 0.0  ;;  %v2427_v51 = vrot.slane %v2322_v31, 7  ;;  %v2600_v49 = vmul.f32 %v2322_v31, %v2322_v31  ;;  %2886 = vst.msk [vmem:[%s3649_s18 + $0x39] sm:$0x80] %vm2872_vm3, %v2322_v31  ;;  %v1670_v56 = vadd.f32 %v1551_v26, %v1394_v42 }
  0xa8   : > { %v4223_v53 = vadd.f32 %v2809_v13, %v2808_v16  ;;  %v794_v46 = vmul.f32 %v5565_v48, %v3494_v20  ;;  %v1135_v6 = vmul.f32 %v4067_v7, %v3502_v24  ;;  %v1447_v12 = vmul.f32 %v4117_v29, %v3516_v32 }
  0xa9   : > { %v2704_v23 = vrot.slane %v2600_v49, 7  ;;  %v1788_v8 = vmul.f32 %v3518_v33, %v4193_v30  ;;  %v1835_v44 = vadd.f32 %v1787_v60, %v1670_v56  ;;  %v2100_v11 = vmul.f32 %v3522_v35, %v4232_v40 }
  0xaa   : > { %v900_v54 = vrot.slane %v794_v46, 2  ;;  %v482_v48 = vmul.f32 %v3982_v58, %v3490_v18  ;;  %v1552_v16 = vrot.slane %v1447_v12, 2  ;;  %v577_v61 = vmul.f32 %v3986_v43, %v3492_v19 }
  0xab   : > { %v795_v57 = vmul.f32 %v3986_v43, %v3494_v20  ;;  %v1136_v45 = vmul.f32 %v4139_v14, %v3502_v24  ;;  %v2047_v21 = vadd.f32 %v1952_v5, %v1835_v44  ;;  %v2205_v63 = vrot.slane %v2100_v11, 2 }
  0xac   : > { %v901_v60 = vsel %vm876_vm1, %v898_v25, %v900_v54  ;;  %v4251_v37 = vmul.f32 %v4147_v17, %v3510_v28  ;;  %v1553_v2 = vsel %vm876_vm1, %v1550_v36, %v1552_v16  ;;  %v647_v55 = vrot.slane %v577_v61, 1  ;;  %v4260_v25 = vld [vmem:[#allocation2 + $0xe0] sm:$0xff]  ;;  %v361_v16 = vld [vmem:[%s3464_s30 + $0xf8] sm:$0xff] }
  0xad   : > { %v1019_v58 = vadd.f32 %v901_v60, %v742_v38  ;;  %v902_v0 = vrot.slane %v795_v57, 2  ;;  %v4254_v62 = vadd.f32 %v2204_v4, %v2047_v21  ;;  %v2206_v50 = vsel %vm876_vm1, %v2203_v22, %v2205_v63  ;;  %395 = vst.msk [vmem:[#allocation2 + $0x210] sm:$0xff] %vm257_vm0, %v361_v16 }
  0xae   : > { %v1300_v52 = vrot.slane %v4251_v37, 1  ;;  %v1448_v3 = vmul.f32 %v4147_v17, %v3516_v32  ;;  %v743_v41 = vadd.f32 %v647_v55, %v482_v48  ;;  %v1789_v36 = vmul.f32 %v3518_v33, %v4260_v25 }
  0xaf   : > { %v1183_v27 = vadd.f32 %v1135_v6, %v1019_v58  ;;  %v1884_v31 = vmul.f32 %v3520_v34, %v4262_v10  ;;  %v2428_v26 = vrot.slane %v4254_v62, 7  ;;  %v4271_v5 = vmul.f32 %v4254_v62, %v4254_v62  ;;  %2887 = vst.msk [vmem:[%s3649_s18 + $0x41] sm:$0xff] %vm257_vm0, %v4254_v62  ;;  %v4308_v62 = vld [vmem:[#allocation2 + $0xf0] sm:$0xff] }
  0xb0   : > { %v1554_v59 = vrot.slane %v1448_v3, 2  ;;  %v2101_v42 = vmul.f32 %v3522_v35, %v4262_v10  ;;  %v1020_v13 = vadd.f32 %v902_v0, %v743_v41  ;;  %v483_v38 = vmul.f32 %v3986_v43, %v3490_v18 }
  0xb1   : > { %v1395_v22 = vadd.f32 %v1298_v15, %v1183_v27  ;;  %v1953_v49 = vrot.slane %v1884_v31, 1  ;;  %v2429_v56 = vsel %vm2406_vm5, %v2427_v51, %v2428_v26  ;;  %v2705_v4 = vrot.slane %v4271_v5, 7  ;;  %v360_v51 = vld [vmem:[%s3464_s30 + $0xf0] sm:$0xff]  ;;  %s2944_s30 = scalar_lea.hbm %s5507_s2, %s3091_s26 }
  0xb2   : > { %v2207_v46 = vrot.slane %v2101_v42, 2  ;;  %v578_v6 = vmul.f32 %v4067_v7, %v3492_v19  ;;  %v2534_v12 = vsel %vm257_vm0, %v2429_v56, 0.0  ;;  %v1184_v47 = vadd.f32 %v1136_v45, %v1020_v13  ;;  %394 = vst.msk [vmem:[#allocation2 + $0x208] sm:$0xff] %vm257_vm0, %v360_v51 }
  0xb3   : > { %v1671_v44 = vadd.f32 %v1553_v2, %v1395_v22  ;;  %v796_v15 = vmul.f32 %v4067_v7, %v3494_v20  ;;  %v2535_v54 = vadd.f32 %v2534_v12, %v2533_v39  ;;  %v2706_v11 = vsel %vm2406_vm5, %v2704_v23, %v2705_v4 }
  0xb4   : > { %v648_v48 = vrot.slane %v578_v6, 1  ;;  %v1137_v43 = vmul.f32 %v4147_v17, %v3502_v24  ;;  %v2811_v61 = vsel %vm257_vm0, %v2706_v11, 0.0  ;;  %v1396_v21 = vadd.f32 %v1300_v52, %v1184_v47 }
  0xb5   : > { %v1836_v57 = vadd.f32 %v1788_v8, %v1671_v44  ;;  %v903_v60 = vrot.slane %v796_v15, 2  ;;  %v2812_v45 = vadd.f32 %v2811_v61, %v4223_v53  ;;  %v4301_v23 = vmul.f32 %v4193_v30, %v3510_v28 }
  0xb6   : > { %v649_v39 = vsel %vm631_vm2, %v647_v55, %v648_v48  ;;  %v1449_v63 = vmul.f32 %v4193_v30, %v3516_v32  ;;  %v1672_v37 = vadd.f32 %v1554_v59, %v1396_v21  ;;  %v1790_v3 = vmul.f32 %v3518_v33, %v4262_v10 }
  0xb7   : > { %v2048_v8 = vadd.f32 %v1951_v9, %v1836_v57  ;;  %v744_v58 = vadd.f32 %v649_v39, %v483_v38  ;;  %v904_v2 = vsel %vm876_vm1, %v902_v0, %v903_v60  ;;  %v1301_v53 = vrot.slane %v4301_v23, 1 }
  0xb8   : > { %v1555_v55 = vrot.slane %v1449_v63, 2  ;;  %v4315_v27 = vmul.f32 %v3520_v34, %v4308_v62  ;;  %v1837_v1 = vadd.f32 %v1789_v36, %v1672_v37  ;;  %v2102_v31 = vmul.f32 %v3522_v35, %v4308_v62  ;;  %v4343_v63 = vld [vmem:[#allocation2 + $0xf8] sm:$0xff] }
  0xb9   : > { %v2324_v41 = vadd.f32 %v2206_v50, %v2048_v8  ;;  %v1021_v9 = vadd.f32 %v904_v2, %v744_v58  ;;  %v1302_v0 = vsel %vm631_vm2, %v1300_v52, %v1301_v53  ;;  %v484_v22 = vmul.f32 %v4067_v7, %v3490_v18 }
  0xba   : > { %v1556_v5 = vsel %vm876_vm1, %v1554_v59, %v1555_v55  ;;  %v1954_v42 = vrot.slane %v4315_v27, 1  ;;  %v2049_v56 = vadd.f32 %v1953_v49, %v1837_v1  ;;  %v2208_v6 = vrot.slane %v2102_v31, 2 }
  0xbb   : > { %v2430_v13 = vrot.slane %v2324_v41, 7  ;;  %v2602_v38 = vmul.f32 %v2324_v41, %v2324_v41  ;;  %2888 = vst.msk [vmem:[%s3649_s18 + $0x49] sm:$0x7f] %vm2875_vm4, %v2324_v41  ;;  %v1185_v50 = vadd.f32 %v1137_v43, %v1021_v9  ;;  %v745_v52 = vadd.f32 %v648_v48, %v484_v22 }
  0xbc   : > { %v1955_v36 = vsel %vm631_vm2, %v1953_v49, %v1954_v42  ;;  %v797_v59 = vmul.f32 %v4117_v29, %v3494_v20  ;;  %v2325_v7 = vadd.f32 %v2207_v46, %v2049_v56  ;;  %v2209_v11 = vsel %vm876_vm1, %v2207_v46, %v2208_v6 }
  0xbd   : > { %v2431_v12 = vsel %vm2406_vm5, %v2428_v26, %v2430_v13  ;;  %v2707_v44 = vrot.slane %v2602_v38, 7  ;;  %v1397_v47 = vadd.f32 %v1302_v0, %v1185_v50  ;;  %v1138_v51 = vmul.f32 %v4193_v30, %v3502_v24  ;;  %v4364_v13 = vld [vmem:[#allocation2 + $0x100] sm:$0xff] }
  0xbe   : > { %v2536_v15 = vsel %vm257_vm0, %v2431_v12, 0.0  ;;  %v905_v43 = vrot.slane %v797_v59, 2  ;;  %v2432_v48 = vrot.slane %v2325_v7, 7  ;;  %v2603_v61 = vmul.f32 %v2325_v7, %v2325_v7  ;;  %2889 = vst.msk [vmem:[%s3649_s18 + $0x49] sm:$0x80] %vm2872_vm3, %v2325_v7 }
  0xbf   : > { %v2537_v49 = vadd.f32 %v2536_v15, %v2535_v54  ;;  %v2708_v16 = vsel %vm2406_vm5, %v2705_v4, %v2707_v44  ;;  %v1673_v26 = vadd.f32 %v1556_v5, %v1397_v47  ;;  %v1450_v21 = vmul.f32 %v4232_v40, %v3516_v32 }
  0xc0   : > { %v2813_v29 = vsel %vm257_vm0, %v2708_v16, 0.0  ;;  %v906_v57 = vsel %vm876_vm1, %v903_v60, %v905_v43  ;;  %v2709_v39 = vrot.slane %v2603_v61, 7  ;;  %v1791_v4 = vmul.f32 %v3518_v33, %v4308_v62 }
  0xc1   : > { %v2814_v46 = vadd.f32 %v2813_v29, %v2812_v45  ;;  %v1022_v23 = vadd.f32 %v906_v57, %v745_v52  ;;  %v1838_v54 = vadd.f32 %v1790_v3, %v1673_v26  ;;  %v1557_v8 = vrot.slane %v1450_v21, 2 }
  0xc2   : > { %v2103_v37 = vmul.f32 %v3522_v35, %v4343_v63  ;;  %v485_v58 = vmul.f32 %v4139_v14, %v3490_v18  ;;  %v579_v2 = vmul.f32 %v4147_v17, %v3492_v19  ;;  %v798_v45 = vmul.f32 %v4147_v17, %v3494_v20 }
  0xc3   : > { %v1186_v60 = vadd.f32 %v1138_v51, %v1022_v23  ;;  %v1139_v41 = vmul.f32 %v4260_v25, %v3502_v24  ;;  %v2050_v1 = vadd.f32 %v1955_v36, %v1838_v54  ;;  %v1558_v3 = vsel %vm876_vm1, %v1555_v55, %v1557_v8  ;;  %v4367_v36 = vld [vmem:[#allocation2 + $0x108] sm:$0xff] }
  0xc4   : > { %v2210_v9 = vrot.slane %v2103_v37, 2  ;;  %v1233_v31 = vmul.f32 %v4262_v10, %v3510_v28  ;;  %v650_v14 = vrot.slane %v579_v2, 1  ;;  %v907_v5 = vrot.slane %v798_v45, 2 }
  0xc5   : > { %v1398_v0 = vadd.f32 %v1301_v53, %v1186_v60  ;;  %v4362_v22 = vmul.f32 %v4262_v10, %v3516_v32  ;;  %v2326_v38 = vadd.f32 %v2209_v11, %v2050_v1  ;;  %v1792_v55 = vmul.f32 %v3518_v33, %v4364_v13 }
  0xc6   : > { %v2211_v56 = vsel %vm876_vm1, %v2208_v6, %v2210_v9  ;;  %v1303_v50 = vrot.slane %v1233_v31, 1  ;;  %v746_v53 = vadd.f32 %v650_v14, %v485_v58  ;;  %v1886_v12 = vmul.f32 %v3520_v34, %v4367_v36  ;;  %v4408_v9 = vld [vmem:[#allocation2 + $0x110] sm:$0xff] }
  0xc7   : > { %v1674_v52 = vadd.f32 %v1558_v3, %v1398_v0  ;;  %v1559_v59 = vrot.slane %v4362_v22, 2  ;;  %v2433_v44 = vrot.slane %v2326_v38, 7  ;;  %v2604_v7 = vmul.f32 %v2326_v38, %v2326_v38  ;;  %2890 = vst.msk [vmem:[%s3649_s18 + $0x51] sm:$0xff] %vm257_vm0, %v2326_v38 }
  0xc8   : > { %v4378_v6 = vmul.f32 %v3522_v35, %v4367_v36  ;;  %v486_v47 = vmul.f32 %v4147_v17, %v3490_v18  ;;  %v1023_v11 = vadd.f32 %v907_v5, %v746_v53  ;;  %v1956_v43 = vrot.slane %v1886_v12, 1 }
  0xc9   : > { %v1839_v15 = vadd.f32 %v1791_v4, %v1674_v52  ;;  %v580_v51 = vmul.f32 %v4193_v30, %v3492_v19  ;;  %v2434_v16 = vsel %vm2406_vm5, %v2432_v48, %v2433_v44  ;;  %v2710_v61 = vrot.slane %v2604_v7, 7 }
  0xca   : > { %v2212_v29 = vrot.slane %v4378_v6, 2  ;;  %v4388_v26 = vmul.f32 %v4193_v30, %v3494_v20  ;;  %v2538_v57 = vsel %vm257_vm0, %v2434_v16, 0.0  ;;  %v1187_v21 = vadd.f32 %v1139_v41, %v1023_v11 }
  0xcb   : > { %v2051_v17 = vadd.f32 %v1954_v42, %v1839_v15  ;;  %v651_v23 = vrot.slane %v580_v51, 1  ;;  %v2539_v4 = vadd.f32 %v2538_v57, %v2537_v49  ;;  %v2711_v54 = vsel %vm2406_vm5, %v2709_v39, %v2710_v61 }
  0xcc   : > { %v908_v48 = vrot.slane %v4388_v26, 2  ;;  %v1140_v8 = vmul.f32 %v4262_v10, %v3502_v24  ;;  %v2815_v37 = vsel %vm257_vm0, %v2711_v54, 0.0  ;;  %v1399_v60 = vadd.f32 %v1303_v50, %v1187_v21 }
  0xcd   : > { %v2327_v58 = vadd.f32 %v2211_v56, %v2051_v17  ;;  %v652_v2 = vsel %vm631_vm2, %v650_v14, %v651_v23  ;;  %v2816_v45 = vadd.f32 %v2815_v37, %v2814_v46  ;;  %v4402_v49 = vmul.f32 %v4308_v62, %v3510_v28 }
  0xce   : > { %v747_v27 = vadd.f32 %v652_v2, %v486_v47  ;;  %v909_v42 = vsel %vm876_vm1, %v907_v5, %v908_v48  ;;  %v1675_v1 = vadd.f32 %v1559_v59, %v1399_v60  ;;  %v1452_v3 = vmul.f32 %v4308_v62, %v3516_v32  ;;  %v4444_v2 = vld [vmem:[#allocation2 + $0x118] sm:$0xff] }
  0xcf   : > { %v2435_v39 = vrot.slane %v2327_v58, 7  ;;  %v2605_v41 = vmul.f32 %v2327_v58, %v2327_v58  ;;  %2891 = vst.msk [vmem:[%s3649_s18 + $0x59] sm:$0x7f] %vm2875_vm4, %v2327_v58  ;;  %v1304_v46 = vrot.slane %v4402_v49, 1  ;;  %v1793_v0 = vmul.f32 %v3518_v33, %v4367_v36 }
  0xd0   : > { %v1024_v31 = vadd.f32 %v909_v42, %v747_v27  ;;  %v4415_v14 = vmul.f32 %v3520_v34, %v4408_v9  ;;  %v1840_v38 = vadd.f32 %v1792_v55, %v1675_v1  ;;  %v1560_v56 = vrot.slane %v1452_v3, 2 }
  0xd1   : > { %v2436_v5 = vsel %vm2406_vm5, %v2433_v44, %v2435_v39  ;;  %v2712_v22 = vrot.slane %v2605_v41, 7  ;;  %v1305_v12 = vsel %vm631_vm2, %v1303_v50, %v1304_v46  ;;  %v2105_v50 = vmul.f32 %v3522_v35, %v4408_v9 }
  0xd2   : > { %v2540_v52 = vsel %vm257_vm0, %v2436_v5, 0.0  ;;  %v1188_v53 = vadd.f32 %v1140_v8, %v1024_v31  ;;  %v1957_v7 = vrot.slane %v4415_v14, 1  ;;  %v2052_v15 = vadd.f32 %v1956_v43, %v1840_v38  ;;  %v4466_v38 = vld [vmem:[#allocation2 + $0x120] sm:$0xff] }
  0xd3   : > { %v4421_v6 = vadd.f32 %v2540_v52, %v2539_v4  ;;  %v2713_v47 = vsel %vm2406_vm5, %v2710_v61, %v2712_v22  ;;  %v1561_v11 = vsel %vm876_vm1, %v1559_v59, %v1560_v56  ;;  %v487_v61 = vmul.f32 %v4193_v30, %v3490_v18 }
  0xd4   : > { %v2817_v44 = vsel %vm257_vm0, %v2713_v47, 0.0  ;;  %v1400_v51 = vadd.f32 %v1305_v12, %v1188_v53  ;;  %v1958_v55 = vsel %vm631_vm2, %v1956_v43, %v1957_v7  ;;  %v2328_v26 = vadd.f32 %v2212_v29, %v2052_v15 }
  0xd5   : > { %v4431_v16 = vadd.f32 %v2817_v44, %v2816_v45  ;;  %v800_v57 = vmul.f32 %v4232_v40, %v3494_v20  ;;  %v2213_v17 = vrot.slane %v2105_v50, 2  ;;  %v1141_v21 = vmul.f32 %v4308_v62, %v3502_v24 }
  0xd6   : > { %v1676_v59 = vadd.f32 %v1561_v11, %v1400_v51  ;;  %v1453_v43 = vmul.f32 %v4343_v63, %v3516_v32  ;;  %v2437_v4 = vrot.slane %v2328_v26, 7  ;;  %v2606_v54 = vmul.f32 %v2328_v26, %v2328_v26  ;;  %2892 = vst.msk [vmem:[%s3649_s18 + $0x59] sm:$0x80] %vm2872_vm3, %v2328_v26  ;;  %v4477_v51 = vld [vmem:[#allocation2 + $0x128] sm:$0xff] }
  0xd7   : > { %v748_v8 = vadd.f32 %v651_v23, %v487_v61  ;;  %v910_v37 = vrot.slane %v800_v57, 2  ;;  %v2214_v30 = vsel %vm876_vm1, %v2212_v29, %v2213_v17  ;;  %v1794_v40 = vmul.f32 %v3518_v33, %v4408_v9 }
  0xd8   : > { %v1841_v58 = vadd.f32 %v1793_v0, %v1676_v59  ;;  %v1562_v60 = vrot.slane %v1453_v43, 2  ;;  %v2714_v45 = vrot.slane %v2606_v54, 7  ;;  %v2106_v42 = vmul.f32 %v3522_v35, %v4444_v2 }
  0xd9   : > { %v911_v27 = vsel %vm876_vm1, %v908_v48, %v910_v37  ;;  %v488_v49 = vmul.f32 %v4260_v25, %v3490_v18  ;;  %v581_v29 = vmul.f32 %v4262_v10, %v3492_v19  ;;  %v801_v3 = vmul.f32 %v4262_v10, %v3494_v20 }
  0xda   : > { %v2053_v23 = vadd.f32 %v1958_v55, %v1841_v58  ;;  %v1025_v39 = vadd.f32 %v911_v27, %v748_v8  ;;  %v1563_v41 = vsel %vm876_vm1, %v1560_v56, %v1562_v60  ;;  %v2215_v1 = vrot.slane %v2106_v42, 2 }
  0xdb   : > { %v1142_v48 = vmul.f32 %v4364_v13, %v3502_v24  ;;  %v1235_v31 = vmul.f32 %v4367_v36, %v3510_v28  ;;  %v653_v5 = vrot.slane %v581_v29, 1  ;;  %v1454_v22 = vmul.f32 %v4367_v36, %v3516_v32 }
  0xdc   : > { %v4462_v0 = vadd.f32 %v2214_v30, %v2053_v23  ;;  %v1189_v25 = vadd.f32 %v1141_v21, %v1025_v39  ;;  %v2216_v56 = vsel %vm876_vm1, %v2213_v17, %v2215_v1  ;;  %v912_v52 = vrot.slane %v801_v3, 2 }
  0xdd   : > { %v1306_v53 = vrot.slane %v1235_v31, 1  ;;  %v1795_v12 = vmul.f32 %v3518_v33, %v4466_v38  ;;  %v749_v44 = vadd.f32 %v653_v5, %v488_v49  ;;  %v1564_v55 = vrot.slane %v1454_v22, 2 }
  0xde   : > { %v2438_v47 = vrot.slane %v4462_v0, 7  ;;  %v2607_v15 = vmul.f32 %v4462_v0, %v4462_v0  ;;  %2893 = vst.msk [vmem:[%s3649_s18 + $0x61] sm:$0xff] %vm257_vm0, %v4462_v0  ;;  %v1401_v11 = vadd.f32 %v1304_v46, %v1189_v25  ;;  %v1888_v50 = vmul.f32 %v3520_v34, %v4477_v51 }
  0xdf   : > { %v2107_v26 = vmul.f32 %v3522_v35, %v4477_v51  ;;  %v489_v61 = vmul.f32 %v4262_v10, %v3490_v18  ;;  %v1026_v21 = vadd.f32 %v912_v52, %v749_v44  ;;  %v582_v8 = vmul.f32 %v4308_v62, %v3492_v19 }
  0xe0   : > { %v2439_v57 = vsel %vm2406_vm5, %v2437_v4, %v2438_v47  ;;  %v2715_v59 = vrot.slane %v2607_v15, 7  ;;  %v1677_v17 = vadd.f32 %v1563_v41, %v1401_v11  ;;  %v1959_v43 = vrot.slane %v1888_v50, 1 }
  0xe1   : > { %v2542_v46 = vsel %vm257_vm0, %v2439_v57, 0.0  ;;  %v2217_v54 = vrot.slane %v2107_v26, 2  ;;  %v1190_v60 = vadd.f32 %v1142_v48, %v1026_v21  ;;  %v654_v27 = vrot.slane %v582_v8, 1 }
  0xe2   : > { %v2543_v37 = vadd.f32 %v2542_v46, %v4421_v6  ;;  %v2716_v58 = vsel %vm2406_vm5, %v2714_v45, %v2715_v59  ;;  %v1842_v30 = vadd.f32 %v1794_v40, %v1677_v17  ;;  %v802_v4 = vmul.f32 %v4308_v62, %v3494_v20 }
  0xe3   : > { %v2819_v10 = vsel %vm257_vm0, %v2716_v58, 0.0  ;;  %v1143_v42 = vmul.f32 %v4367_v36, %v3502_v24  ;;  %v1402_v39 = vadd.f32 %v1306_v53, %v1190_v60  ;;  %v4501_v6 = vmul.f32 %v4408_v9, %v3510_v28 }
  0xe4   : > { %v2820_v49 = vadd.f32 %v2819_v10, %v4431_v16  ;;  %v2054_v23 = vadd.f32 %v1957_v7, %v1842_v30  ;;  %v655_v40 = vsel %vm631_vm2, %v653_v5, %v654_v27  ;;  %v913_v45 = vrot.slane %v802_v4, 2  ;;  %v4509_v7 = vld [vmem:[#allocation2 + $0x130] sm:$0xff] }
  0xe5   : > { %v1455_v41 = vmul.f32 %v4408_v9, %v3516_v32  ;;  %v1796_v29 = vmul.f32 %v3518_v33, %v4477_v51  ;;  %v1678_v16 = vadd.f32 %v1564_v55, %v1402_v39  ;;  %v750_v3 = vadd.f32 %v655_v40, %v489_v61 }
  0xe6   : > { %v2330_v1 = vadd.f32 %v2216_v56, %v2054_v23  ;;  %v1307_v14 = vrot.slane %v4501_v6, 1  ;;  %v914_v48 = vsel %vm876_vm1, %v912_v52, %v913_v45  ;;  %v4514_v0 = vmul.f32 %v3520_v34, %v4509_v7 }
  0xe7   : > { %v1565_v31 = vrot.slane %v1455_v41, 2  ;;  %v2108_v25 = vmul.f32 %v3522_v35, %v4509_v7  ;;  %v1843_v56 = vadd.f32 %v1795_v12, %v1678_v16  ;;  %v1027_v15 = vadd.f32 %v914_v48, %v750_v3 }
  0xe8   : > { %v2440_v5 = vrot.slane %v2330_v1, 7  ;;  %v2608_v22 = vmul.f32 %v2330_v1, %v2330_v1  ;;  %2894 = vst.msk [vmem:[%s3649_s18 + $0x69] sm:$0x7f] %vm2875_vm4, %v2330_v1  ;;  %v1308_v11 = vsel %vm631_vm2, %v1306_v53, %v1307_v14  ;;  %v1960_v44 = vrot.slane %v4514_v0, 1  ;;  %v4609_v0 = vld [vmem:[#allocation2 + $0x150] sm:$0xff] }
  0xe9   : > { %v1566_v52 = vsel %vm876_vm1, %v1564_v55, %v1565_v31  ;;  %v2218_v50 = vrot.slane %v2108_v25, 2  ;;  %v2055_v57 = vadd.f32 %v1959_v43, %v1843_v56  ;;  %v1191_v17 = vadd.f32 %v1143_v42, %v1027_v15 }
  0xea   : > { %v2441_v26 = vsel %vm2406_vm5, %v2438_v47, %v2440_v5  ;;  %v2717_v61 = vrot.slane %v2608_v22, 7  ;;  %v1961_v12 = vsel %vm631_vm2, %v1959_v43, %v1960_v44  ;;  %v490_v53 = vmul.f32 %v4308_v62, %v3490_v18 }
  0xeb   : > { %v2544_v21 = vsel %vm257_vm0, %v2441_v26, 0.0  ;;  %v2219_v46 = vsel %vm876_vm1, %v2217_v54, %v2218_v50  ;;  %v2331_v58 = vadd.f32 %v2217_v54, %v2055_v57  ;;  %v1403_v47 = vadd.f32 %v1308_v11, %v1191_v17  ;;  %v4566_v57 = vld [vmem:[#allocation2 + $0x140] sm:$0xff]  ;;  %v4568_v17 = vld [vmem:[#allocation2 + $0x148] sm:$0xff] }
  0xec   : > { %v2545_v55 = vadd.f32 %v2544_v21, %v2543_v37  ;;  %v2718_v8 = vsel %vm2406_vm5, %v2715_v59, %v2717_v61  ;;  %v751_v60 = vadd.f32 %v654_v27, %v490_v53  ;;  %v803_v10 = vmul.f32 %v4343_v63, %v3494_v20  ;;  %v4541_v37 = vld [vmem:[#allocation2 + $0x138] sm:$0xff] }
  0xed   : > { %v2821_v30 = vsel %vm257_vm0, %v2718_v8, 0.0  ;;  %v1144_v4 = vmul.f32 %v4408_v9, %v3502_v24  ;;  %v2442_v42 = vrot.slane %v2331_v58, 7  ;;  %v2609_v23 = vmul.f32 %v2331_v58, %v2331_v58  ;;  %2895 = vst.msk [vmem:[%s3649_s18 + $0x69] sm:$0x80] %vm2872_vm3, %v2331_v58 }
  0xee   : > { %v2822_v43 = vadd.f32 %v2821_v30, %v2820_v49  ;;  %v1679_v62 = vadd.f32 %v1566_v52, %v1403_v47  ;;  %v915_v59 = vrot.slane %v803_v10, 2  ;;  %v1456_v54 = vmul.f32 %v4444_v2, %v3516_v32 }
  0xef   : > { %v1797_v27 = vmul.f32 %v3518_v33, %v4509_v7  ;;  %v2109_v63 = vmul.f32 %v3522_v35, %v4541_v37  ;;  %v2719_v39 = vrot.slane %v2609_v23, 7  ;;  %v491_v49 = vmul.f32 %v4364_v13, %v3490_v18 }
  0xf0   : > { %v1844_v40 = vadd.f32 %v1796_v29, %v1679_v62  ;;  %v583_v41 = vmul.f32 %v4367_v36, %v3492_v19  ;;  %v916_v1 = vsel %vm876_vm1, %v913_v45, %v915_v59  ;;  %v1567_v16 = vrot.slane %v1456_v54, 2 }
  0xf1   : > { %v2220_v3 = vrot.slane %v2109_v63, 2  ;;  %v804_v48 = vmul.f32 %v4367_v36, %v3494_v20  ;;  %v1028_v5 = vadd.f32 %v916_v1, %v751_v60  ;;  %v1145_v56 = vmul.f32 %v4466_v38, %v3502_v24 }
  0xf2   : > { %v2056_v25 = vadd.f32 %v1961_v12, %v1844_v40  ;;  %v656_v22 = vrot.slane %v583_v41, 1  ;;  %v1568_v29 = vsel %vm876_vm1, %v1565_v31, %v1567_v16  ;;  %v1237_v45 = vmul.f32 %v4477_v51, %v3510_v28 }
  0xf3   : > { %v2221_v13 = vsel %vm876_vm1, %v2218_v50, %v2220_v3  ;;  %v917_v15 = vrot.slane %v804_v48, 2  ;;  %v1192_v52 = vadd.f32 %v1144_v4, %v1028_v5  ;;  %v1457_v61 = vmul.f32 %v4477_v51, %v3516_v32 }
  0xf4   : > { %v4562_v11 = vadd.f32 %v2219_v46, %v2056_v25  ;;  %v752_v26 = vadd.f32 %v656_v22, %v491_v49  ;;  %v1309_v21 = vrot.slane %v1237_v45, 1  ;;  %v1798_v31 = vmul.f32 %v3518_v33, %v4566_v57 }
  0xf5   : > { %v1890_v50 = vmul.f32 %v3520_v34, %v4568_v17  ;;  %v2110_v12 = vmul.f32 %v3522_v35, %v4568_v17  ;;  %v1404_v8 = vadd.f32 %v1307_v14, %v1192_v52  ;;  %v1569_v47 = vrot.slane %v1457_v61, 2 }
  0xf6   : > { %v2443_v46 = vrot.slane %v4562_v11, 7  ;;  %v2610_v53 = vmul.f32 %v4562_v11, %v4562_v11  ;;  %2896 = vst.msk [vmem:[%s3649_s18 + $0x71] sm:$0xff] %vm257_vm0, %v4562_v11  ;;  %v1029_v58 = vadd.f32 %v917_v15, %v752_v26  ;;  %v492_v10 = vmul.f32 %v4367_v36, %v3490_v18 }
  0xf7   : > { %v1962_v30 = vrot.slane %v1890_v50, 1  ;;  %v2222_v60 = vrot.slane %v2110_v12, 2  ;;  %v1680_v62 = vadd.f32 %v1568_v29, %v1404_v8  ;;  %v584_v63 = vmul.f32 %v4408_v9, %v3492_v19 }
  0xf8   : > { %v2444_v4 = vsel %vm2406_vm5, %v2442_v42, %v2443_v46  ;;  %v2720_v23 = vrot.slane %v2610_v53, 7  ;;  %v1193_v59 = vadd.f32 %v1145_v56, %v1029_v58  ;;  %v805_v6 = vmul.f32 %v4408_v9, %v3494_v20 }
  0xf9   : > { %v2546_v54 = vsel %vm257_vm0, %v2444_v4, 0.0  ;;  %v1146_v14 = vmul.f32 %v4477_v51, %v3502_v24  ;;  %v1845_v36 = vadd.f32 %v1797_v27, %v1680_v62  ;;  %v657_v1 = vrot.slane %v584_v63, 1 }
  0xfa   : > { %v2547_v40 = vadd.f32 %v2546_v54, %v2545_v55  ;;  %v2721_v49 = vsel %vm2406_vm5, %v2719_v39, %v2720_v23  ;;  %v1405_v41 = vadd.f32 %v1309_v21, %v1193_v59  ;;  %v918_v16 = vrot.slane %v805_v6, 2 }
  0xfb   : > { %v2823_v42 = vsel %vm257_vm0, %v2721_v49, 0.0  ;;  %v4598_v3 = vmul.f32 %v4509_v7, %v3510_v28  ;;  %v2057_v25 = vadd.f32 %v1960_v44, %v1845_v36  ;;  %v1458_v55 = vmul.f32 %v4509_v7, %v3516_v32 }
  0xfc   : > { %v2824_v48 = vadd.f32 %v2823_v42, %v2822_v43  ;;  %v1681_v5 = vadd.f32 %v1569_v47, %v1405_v41  ;;  %v658_v27 = vsel %vm631_vm2, %v656_v22, %v657_v1  ;;  %v919_v39 = vsel %vm876_vm1, %v917_v15, %v918_v16  ;;  %v4655_v41 = vld [vmem:[#allocation2 + $0x158] sm:$0xff] }
  0xfd   : > { %v1310_v56 = vrot.slane %v4598_v3, 1  ;;  %v1799_v29 = vmul.f32 %v3518_v33, %v4568_v17  ;;  %v2333_v45 = vadd.f32 %v2221_v13, %v2057_v25  ;;  %v753_v43 = vadd.f32 %v658_v27, %v492_v10 }
  0xfe   : > { %v1846_v11 = vadd.f32 %v1798_v31, %v1681_v5  ;;  %v1570_v52 = vrot.slane %v1458_v55, 2  ;;  %v4616_v22 = vmul.f32 %v3520_v34, %v4609_v0  ;;  %v2111_v15 = vmul.f32 %v3522_v35, %v4609_v0 }
  0xff   : > { %v1311_v44 = vsel %vm631_vm2, %v1309_v21, %v1310_v56  ;;  %v493_v26 = vmul.f32 %v4408_v9, %v3490_v18  ;;  %v2445_v13 = vrot.slane %v2333_v45, 7  ;;  %v2611_v61 = vmul.f32 %v2333_v45, %v2333_v45  ;;  %2897 = vst.msk [vmem:[%s3649_s18 + $0x79] sm:$0x7f] %vm2875_vm4, %v2333_v45 }
 0x100   : > { %v2058_v31 = vadd.f32 %v1962_v30, %v1846_v11  ;;  %v1030_v50 = vadd.f32 %v919_v39, %v753_v43  ;;  %v1571_v12 = vsel %vm876_vm1, %v1569_v47, %v1570_v52  ;;  %v1963_v21 = vrot.slane %v4616_v22, 1 }
 0x101   : > { %v2223_v53 = vrot.slane %v2111_v15, 2  ;;  %v754_v8 = vadd.f32 %v657_v1, %v493_v26  ;;  %v2446_v58 = vsel %vm2406_vm5, %v2443_v46, %v2445_v13  ;;  %v2722_v10 = vrot.slane %v2611_v61, 7 }
 0x102   : > { %v4627_v4 = vadd.f32 %v2222_v60, %v2058_v31  ;;  %v1194_v62 = vadd.f32 %v1146_v14, %v1030_v50  ;;  %v2548_v9 = vsel %vm257_vm0, %v2446_v58, 0.0  ;;  %v1964_v59 = vsel %vm631_vm2, %v1962_v30, %v1963_v21 }
 0x103   : > { %v2224_v54 = vsel %vm876_vm1, %v2222_v60, %v2223_v53  ;;  %v806_v47 = vmul.f32 %v4444_v2, %v3494_v20  ;;  %v4636_v63 = vadd.f32 %v2548_v9, %v2547_v40  ;;  %v2723_v6 = vsel %vm2406_vm5, %v2720_v23, %v2722_v10 }
 0x104   : > { %v2447_v46 = vrot.slane %v4627_v4, 7  ;;  %v4642_v14 = vmul.f32 %v4627_v4, %v4627_v4  ;;  %2898 = vst.msk [vmem:[%s3649_s18 + $0x79] sm:$0x80] %vm2872_vm3, %v4627_v4  ;;  %v2825_v30 = vsel %vm257_vm0, %v2723_v6, 0.0  ;;  %v1406_v49 = vadd.f32 %v1311_v44, %v1194_v62 }
 0x105   : > { %v920_v60 = vrot.slane %v806_v47, 2  ;;  %v1147_v2 = vmul.f32 %v4509_v7, %v3502_v24  ;;  %v4650_v40 = vadd.f32 %v2825_v30, %v2824_v48  ;;  %v1459_v36 = vmul.f32 %v4541_v37, %v3516_v32 }
 0x106   : > { %v2724_v23 = vrot.slane %v4642_v14, 7  ;;  %v1800_v42 = vmul.f32 %v3518_v33, %v4609_v0  ;;  %v1682_v1 = vadd.f32 %v1571_v12, %v1406_v49  ;;  %v2112_v5 = vmul.f32 %v3522_v35, %v4655_v41 }
 0x107   : > { %v921_v25 = vsel %vm876_vm1, %v918_v16, %v920_v60  ;;  %v494_v48 = vmul.f32 %v4466_v38, %v3490_v18  ;;  %v1572_v27 = vrot.slane %v1459_v36, 2  ;;  %v585_v39 = vmul.f32 %v4477_v51, %v3492_v19 }
 0x108   : > { %v1031_v55 = vadd.f32 %v921_v25, %v754_v8  ;;  %v807_v45 = vmul.f32 %v4477_v51, %v3494_v20  ;;  %v1847_v11 = vadd.f32 %v1799_v29, %v1682_v1  ;;  %v2225_v43 = vrot.slane %v2112_v5, 2  ;;  %v4676_v29 = vld [vmem:[#allocation2 + $0x160] sm:$0xff]  ;;  %v4678_v8 = vld [vmem:[#allocation2 + $0x168] sm:$0xff] }
 0x109   : > { %v1148_v44 = vmul.f32 %v4566_v57, %v3502_v24  ;;  %v1239_v16 = vmul.f32 %v4568_v17, %v3510_v28  ;;  %v1573_v26 = vsel %vm876_vm1, %v1570_v52, %v1572_v27  ;;  %v659_v38 = vrot.slane %v585_v39, 1 }
 0x10a   : > { %v1195_v15 = vadd.f32 %v1147_v2, %v1031_v55  ;;  %v922_v13 = vrot.slane %v807_v45, 2  ;;  %v2059_v61 = vadd.f32 %v1964_v59, %v1847_v11  ;;  %v2226_v31 = vsel %vm876_vm1, %v2223_v53, %v2225_v43 }
 0x10b   : > { %v1312_v50 = vrot.slane %v1239_v16, 1  ;;  %v1460_v12 = vmul.f32 %v4568_v17, %v3516_v32  ;;  %v755_v10 = vadd.f32 %v659_v38, %v494_v48  ;;  %v1801_v52 = vmul.f32 %v3518_v33, %v4676_v29 }
 0x10c   : > { %v1407_v58 = vadd.f32 %v1310_v56, %v1195_v15  ;;  %v4686_v4 = vmul.f32 %v3520_v34, %v4678_v8  ;;  %v2335_v53 = vadd.f32 %v2224_v54, %v2059_v61  ;;  %v4690_v9 = vmul.f32 %v3522_v35, %v4678_v8 }
 0x10d   : > { %v1574_v62 = vrot.slane %v1460_v12, 2  ;;  %v495_v59 = vmul.f32 %v4477_v51, %v3490_v18  ;;  %v1032_v3 = vadd.f32 %v922_v13, %v755_v10  ;;  %v586_v6 = vmul.f32 %v4509_v7, %v3492_v19  ;;  %v4733_v12 = vld [vmem:[#allocation2 + $0x170] sm:$0xff] }
 0x10e   : > { %v1683_v47 = vadd.f32 %v1573_v26, %v1407_v58  ;;  %v1965_v56 = vrot.slane %v4686_v4, 1  ;;  %v2448_v14 = vrot.slane %v2335_v53, 7  ;;  %v2613_v30 = vmul.f32 %v2335_v53, %v2335_v53  ;;  %2899 = vst.msk [vmem:[%s3649_s18 + $0x81] sm:$0xff] %vm257_vm0, %v2335_v53 }
 0x10f   : > { %v2227_v54 = vrot.slane %v4690_v9, 2  ;;  %v4702_v49 = vmul.f32 %v4509_v7, %v3494_v20  ;;  %v1196_v2 = vadd.f32 %v1148_v44, %v1032_v3  ;;  %v660_v51 = vrot.slane %v586_v6, 1 }
 0x110   : > { %v1848_v60 = vadd.f32 %v1800_v42, %v1683_v47  ;;  %v1149_v36 = vmul.f32 %v4568_v17, %v3502_v24  ;;  %v2449_v1 = vsel %vm2406_vm5, %v2447_v46, %v2448_v14  ;;  %v2725_v25 = vrot.slane %v2613_v30, 7 }
 0x111   : > { %v923_v5 = vrot.slane %v4702_v49, 2  ;;  %v4710_v48 = vmul.f32 %v4609_v0, %v3510_v28  ;;  %v2550_v55 = vsel %vm257_vm0, %v2449_v1, 0.0  ;;  %v1408_v42 = vadd.f32 %v1312_v50, %v1196_v2 }
 0x112   : > { %v2060_v27 = vadd.f32 %v1963_v21, %v1848_v60  ;;  %v661_v39 = vsel %vm631_vm2, %v659_v38, %v660_v51  ;;  %v2551_v45 = vadd.f32 %v2550_v55, %v4636_v63  ;;  %v2726_v46 = vsel %vm2406_vm5, %v2724_v23, %v2725_v25 }
 0x113   : > { %v756_v11 = vadd.f32 %v661_v39, %v495_v59  ;;  %v924_v43 = vsel %vm876_vm1, %v922_v13, %v923_v5  ;;  %v2827_v44 = vsel %vm257_vm0, %v2726_v46, 0.0  ;;  %v1684_v15 = vadd.f32 %v1574_v62, %v1408_v42 }
 0x114   : > { %v2336_v16 = vadd.f32 %v2226_v31, %v2060_v27  ;;  %v1313_v22 = vrot.slane %v4710_v48, 1  ;;  %v2828_v21 = vadd.f32 %v2827_v44, %v4650_v40  ;;  %v1461_v38 = vmul.f32 %v4609_v0, %v3516_v32 }
 0x115   : > { %v1033_v26 = vadd.f32 %v924_v43, %v756_v11  ;;  %v1802_v63 = vmul.f32 %v3518_v33, %v4678_v8  ;;  %v1849_v13 = vadd.f32 %v1801_v52, %v1684_v15  ;;  %v4737_v10 = vmul.f32 %v3520_v34, %v4733_v12  ;;  %v4761_v43 = vld [vmem:[#allocation2 + $0x178] sm:$0xff] }
 0x116   : > { %v2450_v23 = vrot.slane %v2336_v16, 7  ;;  %v2614_v61 = vmul.f32 %v2336_v16, %v2336_v16  ;;  %2900 = vst.msk [vmem:[%s3649_s18 + $0x89] sm:$0x7f] %vm2875_vm4, %v2336_v16  ;;  %v1314_v31 = vsel %vm631_vm2, %v1312_v50, %v1313_v22  ;;  %v1575_v40 = vrot.slane %v1461_v38, 2 }
 0x117   : > { %v1197_v58 = vadd.f32 %v1149_v36, %v1033_v26  ;;  %v2114_v4 = vmul.f32 %v3522_v35, %v4733_v12  ;;  %v2061_v59 = vadd.f32 %v1965_v56, %v1849_v13  ;;  %v496_v52 = vmul.f32 %v4509_v7, %v3490_v18 }
 0x118   : > { %v2451_v53 = vsel %vm2406_vm5, %v2448_v14, %v2450_v23  ;;  %v2727_v9 = vrot.slane %v2614_v61, 7  ;;  %v1576_v3 = vsel %vm876_vm1, %v1574_v62, %v1575_v40  ;;  %v1966_v6 = vrot.slane %v4737_v10, 1 }
 0x119   : > { %v2552_v50 = vsel %vm257_vm0, %v2451_v53, 0.0  ;;  %v1409_v47 = vadd.f32 %v1314_v31, %v1197_v58  ;;  %v2337_v2 = vadd.f32 %v2227_v54, %v2061_v59  ;;  %v2228_v36 = vrot.slane %v2114_v4, 2 }
 0x11a   : > { %v2553_v30 = vadd.f32 %v2552_v50, %v2551_v45  ;;  %v2728_v60 = vsel %vm2406_vm5, %v2725_v25, %v2727_v9  ;;  %v1967_v7 = vsel %vm631_vm2, %v1965_v56, %v1966_v6  ;;  %v757_v55 = vadd.f32 %v660_v51, %v496_v52  ;;  %v4796_v50 = vld [vmem:[#allocation2 + $0x188] sm:$0xff] }
 0x11b   : > { %v2829_v14 = vsel %vm257_vm0, %v2728_v60, 0.0  ;;  %v1685_v1 = vadd.f32 %v1576_v3, %v1409_v47  ;;  %v2452_v42 = vrot.slane %v2337_v2, 7  ;;  %v2615_v39 = vmul.f32 %v2337_v2, %v2337_v2  ;;  %2901 = vst.msk [vmem:[%s3649_s18 + $0x89] sm:$0x80] %vm2872_vm3, %v2337_v2 }
 0x11c   : > { %v2830_v27 = vadd.f32 %v2829_v14, %v2828_v21  ;;  %v2229_v62 = vsel %vm876_vm1, %v2227_v54, %v2228_v36  ;;  %v809_v25 = vmul.f32 %v4541_v37, %v3494_v20  ;;  %v1150_v46 = vmul.f32 %v4609_v0, %v3502_v24 }
 0x11d   : > { %v1850_v45 = vadd.f32 %v1802_v63, %v1685_v1  ;;  %v1462_v11 = vmul.f32 %v4655_v41, %v3516_v32  ;;  %v2729_v56 = vrot.slane %v2615_v39, 7  ;;  %v1803_v51 = vmul.f32 %v3518_v33, %v4733_v12 }
 0x11e   : > { %v2115_v44 = vmul.f32 %v3522_v35, %v4761_v43  ;;  %v497_v54 = vmul.f32 %v4566_v57, %v3490_v18  ;;  %v925_v37 = vrot.slane %v809_v25, 2  ;;  %v587_v21 = vmul.f32 %v4568_v17, %v3492_v19 }
 0x11f   : > { %v2062_v16 = vadd.f32 %v1967_v7, %v1850_v45  ;;  %v1577_v15 = vrot.slane %v1462_v11, 2  ;;  %v810_v38 = vmul.f32 %v4568_v17, %v3494_v20  ;;  %v1151_v63 = vmul.f32 %v4676_v29, %v3502_v24 }
 0x120   : > { %v2230_v26 = vrot.slane %v2115_v44, 2  ;;  %v1241_v23 = vmul.f32 %v4678_v8, %v3510_v28  ;;  %v926_v57 = vsel %vm876_vm1, %v923_v5, %v925_v37  ;;  %v662_v31 = vrot.slane %v587_v21, 1 }
 0x121   : > { %v4777_v61 = vadd.f32 %v2229_v62, %v2062_v16  ;;  %v1578_v13 = vsel %vm876_vm1, %v1575_v40, %v1577_v15  ;;  %v1034_v58 = vadd.f32 %v926_v57, %v757_v55  ;;  %v927_v53 = vrot.slane %v810_v38, 2  ;;  %v4794_v40 = vld [vmem:[#allocation2 + $0x180] sm:$0xff]  ;;  %v4829_v38 = vld [vmem:[#allocation2 + $0x190] sm:$0xff] }
 0x122   : > { %v2231_v4 = vsel %vm876_vm1, %v2228_v36, %v2230_v26  ;;  %v1315_v9 = vrot.slane %v1241_v23, 1  ;;  %v758_v49 = vadd.f32 %v662_v31, %v497_v54  ;;  %v1463_v5 = vmul.f32 %v4678_v8, %v3516_v32 }
 0x123   : > { %v2453_v59 = vrot.slane %v4777_v61, 7  ;;  %v4787_v52 = vmul.f32 %v4777_v61, %v4777_v61  ;;  %2902 = vst.msk [vmem:[%s3649_s18 + $0x91] sm:$0xff] %vm257_vm0, %v4777_v61  ;;  %v1198_v47 = vadd.f32 %v1150_v46, %v1034_v58  ;;  %v1804_v3 = vmul.f32 %v3518_v33, %v4794_v40 }
 0x124   : > { %v1894_v60 = vmul.f32 %v3520_v34, %v4796_v50  ;;  %v2116_v2 = vmul.f32 %v3522_v35, %v4796_v50  ;;  %v1035_v1 = vadd.f32 %v927_v53, %v758_v49  ;;  %v1579_v7 = vrot.slane %v1463_v5, 2 }
 0x125   : > { %v2454_v36 = vsel %vm2406_vm5, %v2452_v42, %v2453_v59  ;;  %v2730_v14 = vrot.slane %v4787_v52, 7  ;;  %v1410_v39 = vadd.f32 %v1313_v22, %v1198_v47  ;;  %v498_v42 = vmul.f32 %v4568_v17, %v3490_v18 }
 0x126   : > { %v2554_v55 = vsel %vm257_vm0, %v2454_v36, 0.0  ;;  %v1968_v62 = vrot.slane %v1894_v60, 1  ;;  %v2232_v45 = vrot.slane %v2116_v2, 2  ;;  %v1199_v11 = vadd.f32 %v1151_v63, %v1035_v1 }
 0x127   : > { %v2555_v25 = vadd.f32 %v2554_v55, %v2553_v30  ;;  %v2731_v46 = vsel %vm2406_vm5, %v2729_v56, %v2730_v14  ;;  %v1686_v54 = vadd.f32 %v1578_v13, %v1410_v39  ;;  %v588_v16 = vmul.f32 %v4609_v0, %v3492_v19 }
 0x128   : > { %v2831_v44 = vsel %vm257_vm0, %v2731_v46, 0.0  ;;  %v811_v48 = vmul.f32 %v4609_v0, %v3494_v20  ;;  %v1411_v37 = vadd.f32 %v1315_v9, %v1199_v11  ;;  %v1152_v30 = vmul.f32 %v4678_v8, %v3502_v24 }
 0x129   : > { %v2832_v22 = vadd.f32 %v2831_v44, %v2830_v27  ;;  %v4825_v56 = vmul.f32 %v4733_v12, %v3510_v28  ;;  %v1851_v15 = vadd.f32 %v1803_v51, %v1686_v54  ;;  %v663_v17 = vrot.slane %v588_v16, 1 }
 0x12a   : > { %v928_v21 = vrot.slane %v811_v48, 2  ;;  %v1464_v26 = vmul.f32 %v4733_v12, %v3516_v32  ;;  %v1687_v63 = vadd.f32 %v1579_v7, %v1411_v37  ;;  %v1805_v27 = vmul.f32 %v3518_v33, %v4796_v50 }
 0x12b   : > { %v1316_v23 = vrot.slane %v4825_v56, 1  ;;  %v4836_v57 = vmul.f32 %v3520_v34, %v4829_v38  ;;  %v2063_v51 = vadd.f32 %v1966_v6, %v1851_v15  ;;  %v664_v13 = vsel %vm631_vm2, %v662_v31, %v663_v17 }
 0x12c   : > { %v929_v58 = vsel %vm876_vm1, %v927_v53, %v928_v21  ;;  %v1580_v49 = vrot.slane %v1464_v26, 2  ;;  %v1852_v5 = vadd.f32 %v1804_v3, %v1687_v63  ;;  %v759_v47 = vadd.f32 %v664_v13, %v498_v42 }
 0x12d   : > { %v1317_v60 = vsel %vm631_vm2, %v1315_v9, %v1316_v23  ;;  %v1969_v2 = vrot.slane %v4836_v57, 1  ;;  %v2339_v36 = vadd.f32 %v2231_v4, %v2063_v51  ;;  %v2117_v55 = vmul.f32 %v3522_v35, %v4829_v38  ;;  %v4878_v51 = vld [vmem:[#allocation2 + $0x198] sm:$0xff] }
 0x12e   : > { %v1581_v1 = vsel %vm876_vm1, %v1579_v7, %v1580_v49  ;;  %v499_v10 = vmul.f32 %v4609_v0, %v3490_v18  ;;  %v2064_v6 = vadd.f32 %v1968_v62, %v1852_v5  ;;  %v1036_v31 = vadd.f32 %v929_v58, %v759_v47 }
 0x12f   : > { %v1970_v53 = vsel %vm631_vm2, %v1968_v62, %v1969_v2  ;;  %v812_v9 = vmul.f32 %v4655_v41, %v3494_v20  ;;  %v2455_v3 = vrot.slane %v2339_v36, 7  ;;  %v2617_v4 = vmul.f32 %v2339_v36, %v2339_v36  ;;  %2903 = vst.msk [vmem:[%s3649_s18 + $0x99] sm:$0x7f] %vm2875_vm4, %v2339_v36 }
 0x130   : > { %v2233_v7 = vrot.slane %v2117_v55, 2  ;;  %v760_v39 = vadd.f32 %v663_v17, %v499_v10  ;;  %v4856_v46 = vadd.f32 %v2232_v45, %v2064_v6  ;;  %v1200_v11 = vadd.f32 %v1152_v30, %v1036_v31 }
 0x131   : > { %v930_v0 = vrot.slane %v812_v9, 2  ;;  %v1153_v42 = vmul.f32 %v4733_v12, %v3502_v24  ;;  %v2456_v62 = vsel %vm2406_vm5, %v2453_v59, %v2455_v3  ;;  %v2732_v44 = vrot.slane %v2617_v4, 7 }
 0x132   : > { %v2234_v41 = vsel %vm876_vm1, %v2232_v45, %v2233_v7  ;;  %v1465_v54 = vmul.f32 %v4761_v43, %v3516_v32  ;;  %v2556_v16 = vsel %vm257_vm0, %v2456_v62, 0.0  ;;  %v2457_v48 = vrot.slane %v4856_v46, 7  ;;  %2904 = vst.msk [vmem:[%s3649_s18 + $0x99] sm:$0x80] %vm2872_vm3, %v4856_v46 }
 0x133   : > { %v2618_v37 = vmul.f32 %v4856_v46, %v4856_v46  ;;  %v1412_v30 = vadd.f32 %v1317_v60, %v1200_v11  ;;  %v2557_v61 = vadd.f32 %v2556_v16, %v2555_v25  ;;  %v2733_v59 = vsel %vm2406_vm5, %v2730_v14, %v2732_v44 }
 0x134   : > { %v931_v45 = vsel %vm876_vm1, %v928_v21, %v930_v0  ;;  %v1582_v56 = vrot.slane %v1465_v54, 2  ;;  %v2833_v15 = vsel %vm257_vm0, %v2733_v59, 0.0  ;;  %v1806_v25 = vmul.f32 %v3518_v33, %v4829_v38 }
 0x135   : > { %v2734_v17 = vrot.slane %v2618_v37, 7  ;;  %v1688_v26 = vadd.f32 %v1581_v1, %v1412_v30  ;;  %v1037_v63 = vadd.f32 %v931_v45, %v760_v39  ;;  %v2834_v13 = vadd.f32 %v2833_v15, %v2832_v22 }
 0x136   : > { %v1583_v58 = vsel %vm876_vm1, %v1580_v49, %v1582_v56  ;;  %v2118_v52 = vmul.f32 %v3522_v35, %v4878_v51  ;;  %v500_v21 = vmul.f32 %v4676_v29, %v3490_v18  ;;  %v589_v47 = vmul.f32 %v4678_v8, %v3492_v19  ;;  %v4899_v29 = vld [vmem:[#allocation2 + $0x1a0] sm:$0xff] }
 0x137   : > { %v1853_v14 = vadd.f32 %v1805_v27, %v1688_v26  ;;  %v1201_v5 = vadd.f32 %v1153_v42, %v1037_v63  ;;  %v813_v22 = vmul.f32 %v4678_v8, %v3494_v20  ;;  %v1154_v49 = vmul.f32 %v4794_v40, %v3502_v24 }
 0x138   : > { %v2235_v60 = vrot.slane %v2118_v52, 2  ;;  %v1243_v36 = vmul.f32 %v4796_v50, %v3510_v28  ;;  %v665_v27 = vrot.slane %v589_v47, 1  ;;  %v4897_v10 = vmul.f32 %v4796_v50, %v3516_v32 }
 0x139   : > { %v2065_v1 = vadd.f32 %v1970_v53, %v1853_v14  ;;  %v1413_v55 = vadd.f32 %v1316_v23, %v1201_v5  ;;  %v932_v31 = vrot.slane %v813_v22, 2  ;;  %v1807_v3 = vmul.f32 %v3518_v33, %v4899_v29  ;;  %v4905_v53 = vld [vmem:[#allocation2 + $0x1a8] sm:$0xff] }
 0x13a   : > { %v2236_v6 = vsel %vm876_vm1, %v2233_v7, %v2235_v60  ;;  %v1318_v9 = vrot.slane %v1243_v36, 1  ;;  %v761_v46 = vadd.f32 %v665_v27, %v500_v21  ;;  %v1584_v23 = vrot.slane %v4897_v10, 2 }
 0x13b   : > { %v2341_v4 = vadd.f32 %v2234_v41, %v2065_v1  ;;  %v1689_v39 = vadd.f32 %v1583_v58, %v1413_v55  ;;  %v1896_v11 = vmul.f32 %v3520_v34, %v4905_v53  ;;  %v4911_v0 = vmul.f32 %v3522_v35, %v4905_v53  ;;  %v4944_v55 = vld [vmem:[#allocation2 + $0x1b0] sm:$0xff] }
 0x13c   : > { %v501_v7 = vmul.f32 %v4678_v8, %v3490_v18  ;;  %v590_v42 = vmul.f32 %v4733_v12, %v3492_v19  ;;  %v1038_v54 = vadd.f32 %v932_v31, %v761_v46  ;;  %v4922_v59 = vmul.f32 %v4733_v12, %v3494_v20 }
 0x13d   : > { %v2458_v62 = vrot.slane %v2341_v4, 7  ;;  %v2619_v44 = vmul.f32 %v2341_v4, %v2341_v4  ;;  %2905 = vst.msk [vmem:[%s3649_s18 + $0xa1] sm:$0xff] %vm257_vm0, %v2341_v4  ;;  %v1854_v41 = vadd.f32 %v1806_v25, %v1689_v39  ;;  %v1971_v16 = vrot.slane %v1896_v11, 1 }
 0x13e   : > { %v2237_v37 = vrot.slane %v4911_v0, 2  ;;  %v666_v30 = vrot.slane %v590_v42, 1  ;;  %v1202_v15 = vadd.f32 %v1154_v49, %v1038_v54  ;;  %v933_v58 = vrot.slane %v4922_v59, 2 }
 0x13f   : > { %v2459_v45 = vsel %vm2406_vm5, %v2457_v48, %v2458_v62  ;;  %v2735_v8 = vrot.slane %v2619_v44, 7  ;;  %v2066_v56 = vadd.f32 %v1969_v2, %v1854_v41  ;;  %v1155_v25 = vmul.f32 %v4796_v50, %v3502_v24 }
 0x140   : > { %v2558_v26 = vsel %vm257_vm0, %v2459_v45, 0.0  ;;  %v667_v63 = vsel %vm631_vm2, %v665_v27, %v666_v30  ;;  %v1414_v48 = vadd.f32 %v1318_v9, %v1202_v15  ;;  %v934_v2 = vsel %vm876_vm1, %v932_v31, %v933_v58 }
 0x141   : > { %v2559_v52 = vadd.f32 %v2558_v26, %v2557_v61  ;;  %v2736_v14 = vsel %vm2406_vm5, %v2734_v17, %v2735_v8  ;;  %v2342_v5 = vadd.f32 %v2236_v6, %v2066_v56  ;;  %v762_v57 = vadd.f32 %v667_v63, %v501_v7 }
 0x142   : > { %v2835_v21 = vsel %vm257_vm0, %v2736_v14, 0.0  ;;  %v4937_v47 = vmul.f32 %v4829_v38, %v3510_v28  ;;  %v1690_v36 = vadd.f32 %v1584_v23, %v1414_v48  ;;  %v1467_v1 = vmul.f32 %v4829_v38, %v3516_v32 }
 0x143   : > { %v2836_v60 = vadd.f32 %v2835_v21, %v2834_v13  ;;  %v2460_v22 = vrot.slane %v2342_v5, 7  ;;  %v2620_v49 = vmul.f32 %v2342_v5, %v2342_v5  ;;  %2906 = vst.msk [vmem:[%s3649_s18 + $0xa9] sm:$0x7f] %vm2875_vm4, %v2342_v5  ;;  %v1039_v61 = vadd.f32 %v934_v2, %v762_v57 }
 0x144   : > { %v1319_v17 = vrot.slane %v4937_v47, 1  ;;  %v1808_v27 = vmul.f32 %v3518_v33, %v4905_v53  ;;  %v1855_v13 = vadd.f32 %v1807_v3, %v1690_v36  ;;  %v4951_v31 = vmul.f32 %v3520_v34, %v4944_v55 }
 0x145   : > { %v2461_v10 = vsel %vm2406_vm5, %v2458_v62, %v2460_v22  ;;  %v2737_v6 = vrot.slane %v2620_v49, 7  ;;  %v1203_v39 = vadd.f32 %v1155_v25, %v1039_v61  ;;  %v1585_v11 = vrot.slane %v1467_v1, 2 }
 0x146   : > { %v2560_v4 = vsel %vm257_vm0, %v2461_v10, 0.0  ;;  %v1320_v46 = vsel %vm631_vm2, %v1318_v9, %v1319_v17  ;;  %v2067_v42 = vadd.f32 %v1971_v16, %v1855_v13  ;;  %v1972_v3 = vrot.slane %v4951_v31, 1 }
 0x147   : > { %v4957_v0 = vadd.f32 %v2560_v4, %v2559_v52  ;;  %v2738_v7 = vsel %vm2406_vm5, %v2735_v8, %v2737_v6  ;;  %v1415_v44 = vadd.f32 %v1320_v46, %v1203_v39  ;;  %v1586_v41 = vsel %vm876_vm1, %v1584_v23, %v1585_v11  ;;  %v5004_v46 = vld [vmem:[#allocation2 + $0x1c0] sm:$0xff] }
 0x148   : > { %v2837_v62 = vsel %vm257_vm0, %v2738_v7, 0.0  ;;  %v2120_v54 = vmul.f32 %v3522_v35, %v4944_v55  ;;  %v2343_v9 = vadd.f32 %v2237_v37, %v2067_v42  ;;  %v502_v45 = vmul.f32 %v4733_v12, %v3490_v18 }
 0x149   : > { %v4965_v59 = vadd.f32 %v2837_v62, %v2836_v60  ;;  %v1691_v56 = vadd.f32 %v1586_v41, %v1415_v44  ;;  %v1973_v8 = vsel %vm631_vm2, %v1971_v16, %v1972_v3  ;;  %v815_v26 = vmul.f32 %v4761_v43, %v3494_v20  ;;  %v4981_v16 = vld [vmem:[#allocation2 + $0x1b8] sm:$0xff]  ;;  %v5014_v62 = vld [vmem:[#allocation2 + $0x1c8] sm:$0xff] }
 0x14a   : > { %v2238_v15 = vrot.slane %v2120_v54, 2  ;;  %v2621_v63 = vmul.f32 %v2343_v9, %v2343_v9  ;;  %2907 = vst.msk [vmem:[%s3649_s18 + $0xa9] sm:$0x80] %vm2872_vm3, %v2343_v9  ;;  %v763_v23 = vadd.f32 %v666_v30, %v502_v45  ;;  %v1156_v25 = vmul.f32 %v4829_v38, %v3502_v24 }
 0x14b   : > { %v1468_v52 = vmul.f32 %v4878_v51, %v3516_v32  ;;  %v2462_v12 = vrot.slane %v2343_v9, 7  ;;  %v1856_v14 = vadd.f32 %v1808_v27, %v1691_v56  ;;  %v935_v48 = vrot.slane %v815_v26, 2 }
 0x14c   : > { %v2239_v5 = vsel %vm876_vm1, %v2237_v37, %v2238_v15  ;;  %v1809_v43 = vmul.f32 %v3518_v33, %v4944_v55  ;;  %v2121_v30 = vmul.f32 %v3522_v35, %v4981_v16  ;;  %v503_v57 = vmul.f32 %v4794_v40, %v3490_v18 }
 0x14d   : > { %v1587_v21 = vrot.slane %v1468_v52, 2  ;;  %v2068_v2 = vadd.f32 %v1973_v8, %v1856_v14  ;;  %v936_v60 = vsel %vm876_vm1, %v933_v58, %v935_v48  ;;  %v591_v22 = vmul.f32 %v4796_v50, %v3492_v19 }
 0x14e   : > { %v816_v37 = vmul.f32 %v4796_v50, %v3494_v20  ;;  %v2739_v49 = vrot.slane %v2621_v63, 7  ;;  %v1040_v36 = vadd.f32 %v936_v60, %v763_v23  ;;  %v2240_v1 = vrot.slane %v2121_v30, 2 }
 0x14f   : > { %v1588_v61 = vsel %vm876_vm1, %v1585_v11, %v1587_v21  ;;  %v4995_v27 = vadd.f32 %v2239_v5, %v2068_v2  ;;  %v668_v10 = vrot.slane %v591_v22, 1  ;;  %v1245_v40 = vmul.f32 %v4905_v53, %v3510_v28 }
 0x150   : > { %v937_v6 = vrot.slane %v816_v37, 2  ;;  %v1204_v58 = vadd.f32 %v1156_v25, %v1040_v36  ;;  %v2241_v13 = vsel %vm876_vm1, %v2238_v15, %v2240_v1  ;;  %v1157_v4 = vmul.f32 %v4899_v29, %v3502_v24 }
 0x151   : > { %v1469_v39 = vmul.f32 %v4905_v53, %v3516_v32  ;;  %v2463_v11 = vrot.slane %v4995_v27, 7  ;;  %v5009_v7 = vmul.f32 %v4995_v27, %v4995_v27  ;;  %2908 = vst.msk [vmem:[%s3649_s18 + $0xb1] sm:$0xff] %vm257_vm0, %v4995_v27  ;;  %v764_v42 = vadd.f32 %v668_v10, %v503_v57 }
 0x152   : > { %v1810_v44 = vmul.f32 %v3518_v33, %v5004_v46  ;;  %v1416_v41 = vadd.f32 %v1319_v17, %v1204_v58  ;;  %v1321_v54 = vrot.slane %v1245_v40, 1  ;;  %v1898_v9 = vmul.f32 %v3520_v34, %v5014_v62 }
 0x153   : > { %v5024_v45 = vmul.f32 %v3522_v35, %v5014_v62  ;;  %v2464_v56 = vsel %vm2406_vm5, %v2462_v12, %v2463_v11  ;;  %v2740_v8 = vrot.slane %v5009_v7, 7  ;;  %v1041_v15 = vadd.f32 %v937_v6, %v764_v42 }
 0x154   : > { %v1589_v26 = vrot.slane %v1469_v39, 2  ;;  %v2562_v63 = vsel %vm257_vm0, %v2464_v56, 0.0  ;;  %v1692_v23 = vadd.f32 %v1588_v61, %v1416_v41  ;;  %v1974_v25 = vrot.slane %v1898_v9, 1 }
 0x155   : > { %v504_v47 = vmul.f32 %v4796_v50, %v3490_v18  ;;  %v2563_v17 = vadd.f32 %v2562_v63, %v4957_v0  ;;  %v2741_v52 = vsel %vm2406_vm5, %v2739_v49, %v2740_v8  ;;  %v1205_v14 = vadd.f32 %v1157_v4, %v1041_v15  ;;  %v5050_v49 = vld [vmem:[#allocation2 + $0x1d0] sm:$0xff] }
 0x156   : > { %v592_v5 = vmul.f32 %v4829_v38, %v3492_v19  ;;  %v2839_v12 = vsel %vm257_vm0, %v2741_v52, 0.0  ;;  %v1857_v48 = vadd.f32 %v1809_v43, %v1692_v23  ;;  %v2242_v21 = vrot.slane %v5024_v45, 2 }
 0x157   : > { %v817_v30 = vmul.f32 %v4829_v38, %v3494_v20  ;;  %v2840_v57 = vadd.f32 %v2839_v12, %v4965_v59  ;;  %v1417_v2 = vadd.f32 %v1321_v54, %v1205_v14  ;;  %v5042_v0 = vmul.f32 %v4944_v55, %v3510_v28 }
 0x158   : > { %v669_v50 = vrot.slane %v592_v5, 1  ;;  %v2069_v60 = vadd.f32 %v1972_v3, %v1857_v48  ;;  %v1158_v43 = vmul.f32 %v4905_v53, %v3502_v24  ;;  %v1470_v37 = vmul.f32 %v4944_v55, %v3516_v32 }
 0x159   : > { %v938_v22 = vrot.slane %v817_v30, 2  ;;  %v1693_v59 = vadd.f32 %v1589_v26, %v1417_v2  ;;  %v1322_v61 = vrot.slane %v5042_v0, 1  ;;  %v5056_v1 = vmul.f32 %v3520_v34, %v5050_v49 }
 0x15a   : > { %v670_v36 = vsel %vm631_vm2, %v668_v10, %v669_v50  ;;  %v2345_v31 = vadd.f32 %v2241_v13, %v2069_v60  ;;  %v1590_v40 = vrot.slane %v1470_v37, 2  ;;  %v1811_v4 = vmul.f32 %v3518_v33, %v5014_v62 }
 0x15b   : > { %v765_v3 = vadd.f32 %v670_v36, %v504_v47  ;;  %v939_v27 = vsel %vm876_vm1, %v937_v6, %v938_v22  ;;  %v1858_v58 = vadd.f32 %v1810_v44, %v1693_v59  ;;  %v1975_v39 = vrot.slane %v5056_v1, 1  ;;  %v5143_v1 = vld [vmem:[#allocation2 + $0x1f0] sm:$0xff] }
 0x15c   : > { %v2123_v10 = vmul.f32 %v3522_v35, %v5050_v49  ;;  %v2465_v7 = vrot.slane %v2345_v31, 7  ;;  %v2623_v42 = vmul.f32 %v2345_v31, %v2345_v31  ;;  %2909 = vst.msk [vmem:[%s3649_s18 + $0xb9] sm:$0x7f] %vm2875_vm4, %v2345_v31  ;;  %v1323_v13 = vsel %vm631_vm2, %v1321_v54, %v1322_v61 }
 0x15d   : > { %v1042_v41 = vadd.f32 %v939_v27, %v765_v3  ;;  %v2070_v9 = vadd.f32 %v1974_v25, %v1858_v58  ;;  %v1591_v6 = vsel %vm876_vm1, %v1589_v26, %v1590_v40  ;;  %v505_v44 = vmul.f32 %v4829_v38, %v3490_v18 }
 0x15e   : > { %v2243_v45 = vrot.slane %v2123_v10, 2  ;;  %v2466_v56 = vsel %vm2406_vm5, %v2463_v11, %v2465_v7  ;;  %v2742_v15 = vrot.slane %v2623_v42, 7  ;;  %v818_v23 = vmul.f32 %v4878_v51, %v3494_v20  ;;  %v5102_v42 = vld [vmem:[#allocation2 + $0x1e0] sm:$0xff] }
 0x15f   : > { %v1206_v63 = vadd.f32 %v1158_v43, %v1042_v41  ;;  %v2564_v47 = vsel %vm257_vm0, %v2466_v56, 0.0  ;;  %v2346_v52 = vadd.f32 %v2242_v21, %v2070_v9  ;;  %v1976_v54 = vsel %vm631_vm2, %v1974_v25, %v1975_v39 }
 0x160   : > { %v766_v26 = vadd.f32 %v669_v50, %v505_v44  ;;  %v2565_v14 = vadd.f32 %v2564_v47, %v2563_v17  ;;  %v2743_v5 = vsel %vm2406_vm5, %v2740_v8, %v2742_v15  ;;  %v940_v38 = vrot.slane %v818_v23, 2  ;;  %v5087_v8 = vld [vmem:[#allocation2 + $0x1d8] sm:$0xff] }
 0x161   : > { %v1418_v12 = vadd.f32 %v1323_v13, %v1206_v63  ;;  %v2841_v11 = vsel %vm257_vm0, %v2743_v5, 0.0  ;;  %v2624_v48 = vmul.f32 %v2346_v52, %v2346_v52  ;;  %2910 = vst.msk [vmem:[%s3649_s18 + $0xb9] sm:$0x80] %vm2872_vm3, %v2346_v52  ;;  %v2244_v51 = vsel %vm876_vm1, %v2242_v21, %v2243_v45 }
 0x162   : > { %v1159_v30 = vmul.f32 %v4944_v55, %v3502_v24  ;;  %v2842_v2 = vadd.f32 %v2841_v11, %v2840_v57  ;;  %v941_v25 = vsel %vm876_vm1, %v938_v22, %v940_v38  ;;  %v1471_v17 = vmul.f32 %v4981_v16, %v3516_v32 }
 0x163   : > { %v1694_v0 = vadd.f32 %v1591_v6, %v1418_v12  ;;  %v2467_v50 = vrot.slane %v2346_v52, 7  ;;  %v2744_v60 = vrot.slane %v2624_v48, 7  ;;  %v1043_v43 = vadd.f32 %v941_v25, %v766_v26 }
 0x164   : > { %v2124_v37 = vmul.f32 %v3522_v35, %v5087_v8  ;;  %v1592_v21 = vrot.slane %v1471_v17, 2  ;;  %v506_v36 = vmul.f32 %v4899_v29, %v3490_v18  ;;  %v593_v57 = vmul.f32 %v4905_v53, %v3492_v19  ;;  %v5104_v29 = vld [vmem:[#allocation2 + $0x1e8] sm:$0xff] }
 0x165   : > { %v1859_v59 = vadd.f32 %v1811_v4, %v1694_v0  ;;  %v1207_v22 = vadd.f32 %v1159_v30, %v1043_v43  ;;  %v1812_v31 = vmul.f32 %v3518_v33, %v5050_v49  ;;  %v819_v27 = vmul.f32 %v4905_v53, %v3494_v20 }
 0x166   : > { %v2245_v3 = vrot.slane %v2124_v37, 2  ;;  %v1593_v10 = vsel %vm876_vm1, %v1590_v40, %v1592_v21  ;;  %v671_v7 = vrot.slane %v593_v57, 1  ;;  %v1247_v4 = vmul.f32 %v5014_v62, %v3510_v28 }
 0x167   : > { %v2071_v58 = vadd.f32 %v1976_v54, %v1859_v59  ;;  %v1419_v41 = vadd.f32 %v1322_v61, %v1207_v22  ;;  %v942_v13 = vrot.slane %v819_v27, 2  ;;  %v1160_v9 = vmul.f32 %v5004_v46, %v3502_v24 }
 0x168   : > { %v1472_v6 = vmul.f32 %v5014_v62, %v3516_v32  ;;  %v2246_v40 = vsel %vm876_vm1, %v2243_v45, %v2245_v3  ;;  %v767_v56 = vadd.f32 %v671_v7, %v506_v36  ;;  %v1324_v15 = vrot.slane %v1247_v4, 1 }
 0x169   : > { %v2347_v44 = vadd.f32 %v2244_v51, %v2071_v58  ;;  %v1695_v63 = vadd.f32 %v1593_v10, %v1419_v41  ;;  %v1813_v47 = vmul.f32 %v3518_v33, %v5102_v42  ;;  %v5115_v61 = vmul.f32 %v3520_v34, %v5104_v29 }
 0x16a   : > { %v1594_v23 = vrot.slane %v1472_v6, 2  ;;  %v1044_v26 = vadd.f32 %v942_v13, %v767_v56  ;;  %v5121_v5 = vmul.f32 %v3522_v35, %v5104_v29  ;;  %v507_v38 = vmul.f32 %v4905_v53, %v3490_v18 }
 0x16b   : > { %v2468_v52 = vrot.slane %v2347_v44, 7  ;;  %v2625_v54 = vmul.f32 %v2347_v44, %v2347_v44  ;;  %2911 = vst.msk [vmem:[%s3649_s18 + $0xc1] sm:$0xff] %vm257_vm0, %v2347_v44  ;;  %v1860_v45 = vadd.f32 %v1812_v31, %v1695_v63  ;;  %v1977_v12 = vrot.slane %v5115_v61, 1 }
 0x16c   : > { %v594_v11 = vmul.f32 %v4944_v55, %v3492_v19  ;;  %v1208_v30 = vadd.f32 %v1160_v9, %v1044_v26  ;;  %v820_v0 = vmul.f32 %v4944_v55, %v3494_v20  ;;  %v1161_v37 = vmul.f32 %v5014_v62, %v3502_v24 }
 0x16d   : > { %v2469_v48 = vsel %vm2406_vm5, %v2467_v50, %v2468_v52  ;;  %v2745_v51 = vrot.slane %v2625_v54, 7  ;;  %v2072_v17 = vadd.f32 %v1975_v39, %v1860_v45  ;;  %v5141_v31 = vmul.f32 %v5050_v49, %v3510_v28 }
 0x16e   : > { %v2566_v25 = vsel %vm257_vm0, %v2469_v48, 0.0  ;;  %v672_v43 = vrot.slane %v594_v11, 1  ;;  %v1420_v21 = vadd.f32 %v1324_v15, %v1208_v30  ;;  %v943_v50 = vrot.slane %v820_v0, 2 }
 0x16f   : > { %v2567_v53 = vadd.f32 %v2566_v25, %v2565_v14  ;;  %v2746_v59 = vsel %vm2406_vm5, %v2744_v60, %v2745_v51  ;;  %v2348_v57 = vadd.f32 %v2246_v40, %v2072_v17  ;;  %v1325_v10 = vrot.slane %v5141_v31, 1 }
 0x170   : > { %v2843_v36 = vsel %vm257_vm0, %v2746_v59, 0.0  ;;  %v673_v22 = vsel %vm631_vm2, %v671_v7, %v672_v43  ;;  %v1696_v3 = vadd.f32 %v1594_v23, %v1420_v21  ;;  %v944_v14 = vsel %vm876_vm1, %v942_v13, %v943_v50  ;;  %v5183_v59 = vld [vmem:[#allocation2 + $0x1f8] sm:$0xff] }
 0x171   : > { %v2844_v39 = vadd.f32 %v2843_v36, %v2842_v2  ;;  %v768_v27 = vadd.f32 %v673_v22, %v507_v38  ;;  %v2470_v58 = vrot.slane %v2348_v57, 7  ;;  %v2626_v60 = vmul.f32 %v2348_v57, %v2348_v57  ;;  %2912 = vst.msk [vmem:[%s3649_s18 + $0xc9] sm:$0x7f] %vm2875_vm4, %v2348_v57 }
 0x172   : > { %v1473_v7 = vmul.f32 %v5050_v49, %v3516_v32  ;;  %v1861_v4 = vadd.f32 %v1813_v47, %v1696_v3  ;;  %v2247_v41 = vrot.slane %v5121_v5, 2  ;;  %v5154_v2 = vmul.f32 %v3520_v34, %v5143_v1 }
 0x173   : > { %v1045_v9 = vadd.f32 %v944_v14, %v768_v27  ;;  %v2471_v6 = vsel %vm2406_vm5, %v2468_v52, %v2470_v58  ;;  %v2747_v13 = vrot.slane %v2626_v60, 7  ;;  %v1326_v44 = vsel %vm631_vm2, %v1324_v15, %v1325_v10 }
 0x174   : > { %v1595_v40 = vrot.slane %v1473_v7, 2  ;;  %v2568_v56 = vsel %vm257_vm0, %v2471_v6, 0.0  ;;  %v2073_v63 = vadd.f32 %v1977_v12, %v1861_v4  ;;  %v1978_v47 = vrot.slane %v5154_v2, 1 }
 0x175   : > { %v1209_v61 = vadd.f32 %v1161_v37, %v1045_v9  ;;  %v5160_v54 = vadd.f32 %v2568_v56, %v2567_v53  ;;  %v2748_v26 = vsel %vm2406_vm5, %v2745_v51, %v2747_v13  ;;  %v2126_v52 = vmul.f32 %v3522_v35, %v5143_v1  ;;  %v5206_v9 = vld [vmem:[#allocation2 + $0x208] sm:$0xff] }
 0x176   : > { %v1596_v5 = vsel %vm876_vm1, %v1594_v23, %v1595_v40  ;;  %v2845_v45 = vsel %vm257_vm0, %v2748_v26, 0.0  ;;  %v5167_v15 = vadd.f32 %v2247_v41, %v2073_v63  ;;  %v1814_v11 = vmul.f32 %v3518_v33, %v5104_v29  ;;  %v5213_v63 = vld [vmem:[#allocation2 + $0x200] sm:$0xff] }
 0x177   : > { %v1421_v38 = vadd.f32 %v1326_v44, %v1209_v61  ;;  %v5171_v48 = vadd.f32 %v2845_v45, %v2844_v39  ;;  %v2248_v30 = vrot.slane %v2126_v52, 2  ;;  %v508_v0 = vmul.f32 %v4944_v55, %v3490_v18 }
 0x178   : > { %v821_v23 = vmul.f32 %v4981_v16, %v3494_v20  ;;  %2913 = vst.msk [vmem:[%s3649_s18 + $0xc9] sm:$0x80] %vm2872_vm3, %v5167_v15  ;;  %v1979_v25 = vsel %vm631_vm2, %v1977_v12, %v1978_v47  ;;  %v1474_v53 = vmul.f32 %v5087_v8, %v3516_v32  ;;  %v1162_v55 = vmul.f32 %v5050_v49, %v3502_v24 }
 0x179   : > { %v1697_v51 = vadd.f32 %v1596_v5, %v1421_v38  ;;  %v769_v17 = vadd.f32 %v672_v43, %v508_v0  ;;  %v2249_v36 = vsel %vm876_vm1, %v2247_v41, %v2248_v30  ;;  %v509_v22 = vmul.f32 %v5004_v46, %v3490_v18 }
 0x17a   : > { %v945_v37 = vrot.slane %v821_v23, 2  ;;  %v1597_v57 = vrot.slane %v1474_v53, 2  ;;  %v595_v12 = vmul.f32 %v5014_v62, %v3492_v19  ;;  %v2127_v39 = vmul.f32 %v3522_v35, %v5183_v59 }
 0x17b   : > { %v1862_v21 = vadd.f32 %v1814_v11, %v1697_v51  ;;  %v822_v3 = vmul.f32 %v5014_v62, %v3494_v20  ;;  %v1163_v4 = vmul.f32 %v5102_v42, %v3502_v24  ;;  %v1475_v41 = vmul.f32 %v5104_v29, %v3516_v32 }
 0x17c   : > { %v946_v16 = vsel %vm876_vm1, %v943_v50, %v945_v37  ;;  %v674_v27 = vrot.slane %v595_v12, 1  ;;  %v1249_v50 = vmul.f32 %v5104_v29, %v3510_v28  ;;  %v1598_v60 = vsel %vm876_vm1, %v1595_v40, %v1597_v57 }
 0x17d   : > { %v2074_v43 = vadd.f32 %v1979_v25, %v1862_v21  ;;  %v1046_v31 = vadd.f32 %v946_v16, %v769_v17  ;;  %v947_v46 = vrot.slane %v822_v3, 2  ;;  %v1815_v6 = vmul.f32 %v3518_v33, %v5143_v1 }
 0x17e   : > { %v770_v7 = vadd.f32 %v674_v27, %v509_v22  ;;  %v2250_v13 = vrot.slane %v2127_v39, 2  ;;  %v1327_v56 = vrot.slane %v1249_v50, 1  ;;  %v1902_v61 = vmul.f32 %v3520_v34, %v5206_v9 }
 0x17f   : > { %v5199_v14 = vadd.f32 %v2249_v36, %v2074_v43  ;;  %v1210_v58 = vadd.f32 %v1162_v55, %v1046_v31  ;;  %v1599_v5 = vrot.slane %v1475_v41, 2  ;;  %v596_v52 = vmul.f32 %v5050_v49, %v3492_v19 }
 0x180   : > { %v1047_v44 = vadd.f32 %v947_v46, %v770_v7  ;;  %v510_v38 = vmul.f32 %v5014_v62, %v3490_v18  ;;  %v823_v11 = vmul.f32 %v5050_v49, %v3494_v20  ;;  %v1816_v23 = vmul.f32 %v3518_v33, %v5213_v63  ;;  %v5232_v62 = vld [vmem:[#allocation2 + $0x210] sm:$0xff] }
 0x181   : > { %2914 = vst.msk [vmem:[%s3649_s18 + $0xd1] sm:$0xff] %vm257_vm0, %v5199_v14  ;;  %v1422_v2 = vadd.f32 %v1325_v10, %v1210_v58  ;;  %v2251_v10 = vsel %vm876_vm1, %v2248_v30, %v2250_v13  ;;  %v2128_v51 = vmul.f32 %v3522_v35, %v5206_v9  ;;  %v675_v25 = vrot.slane %v596_v52, 1 }
 0x182   : > { %v1211_v26 = vadd.f32 %v1163_v4, %v1047_v44  ;;  %v1980_v37 = vrot.slane %v1902_v61, 1  ;;  %v948_v53 = vrot.slane %v823_v11, 2  ;;  %v5230_v30 = vmul.f32 %v5143_v1, %v3510_v28 }
 0x183   : > { %v1698_v40 = vadd.f32 %v1598_v60, %v1422_v2  ;;  %v676_v36 = vsel %vm631_vm2, %v674_v27, %v675_v25  ;;  %v1164_v55 = vmul.f32 %v5104_v29, %v3502_v24  ;;  %v1476_v16 = vmul.f32 %v5143_v1, %v3516_v32 }
 0x184   : > { %v1423_v0 = vadd.f32 %v1327_v56, %v1211_v26  ;;  %v949_v22 = vsel %vm876_vm1, %v947_v46, %v948_v53  ;;  %v1328_v12 = vrot.slane %v5230_v30, 1  ;;  %v2252_v31 = vrot.slane %v2128_v51, 2 }
 0x185   : > { %v1863_v45 = vadd.f32 %v1815_v6, %v1698_v40  ;;  %v1600_v39 = vrot.slane %v1476_v16, 2  ;;  %v5245_v3 = vmul.f32 %v3520_v34, %v5232_v62  ;;  %v5253_v46 = vmul.f32 %v3522_v35, %v5232_v62 }
 0x186   : > { %v1699_v21 = vadd.f32 %v1599_v5, %v1423_v0  ;;  %v1329_v58 = vsel %vm631_vm2, %v1327_v56, %v1328_v12  ;;  %v2472_v60 = vrot.slane %v5167_v15, 7  ;;  %v2627_v7 = vmul.f32 %v5167_v15, %v5167_v15 }
 0x187   : > { %v2075_v17 = vadd.f32 %v1978_v47, %v1863_v45  ;;  %v771_v47 = vadd.f32 %v676_v36, %v510_v38  ;;  %v511_v41 = vmul.f32 %v5050_v49, %v3490_v18  ;;  %v2473_v2 = vrot.slane %v5199_v14, 7 }
 0x188   : > { %v1864_v43 = vadd.f32 %v1816_v23, %v1699_v21  ;;  %v1601_v13 = vsel %vm876_vm1, %v1599_v5, %v1600_v39  ;;  %v1981_v44 = vrot.slane %v5245_v3, 1  ;;  %v1817_v40 = vmul.f32 %v3518_v33, %v5206_v9 }
 0x189   : > { %v5239_v57 = vadd.f32 %v2251_v10, %v2075_v17  ;;  %v1048_v27 = vadd.f32 %v949_v22, %v771_v47  ;;  %v2253_v15 = vrot.slane %v5253_v46, 2  ;;  %v824_v49 = vmul.f32 %v5087_v8, %v3494_v20  ;;  %v5285_v8 = vld [vmem:[#allocation2 + $0x218] sm:$0xff]  ;;  %v5308_v46 = vld [vmem:[#allocation2 + $0x228] sm:$0xff] }
 0x18a   : > { %v2076_v50 = vadd.f32 %v1980_v37, %v1864_v43  ;;  %v2749_v61 = vrot.slane %v2627_v7, 7  ;;  %v772_v52 = vadd.f32 %v675_v25, %v511_v41  ;;  %v1477_v5 = vmul.f32 %v5183_v59, %v3516_v32 }
 0x18b   : > { %2915 = vst.msk [vmem:[%s3649_s18 + $0xd9] sm:$0x7f] %vm2875_vm4, %v5239_v57  ;;  %v1212_v4 = vadd.f32 %v1164_v55, %v1048_v27  ;;  %v2474_v45 = vsel %vm2406_vm5, %v2472_v60, %v2473_v2  ;;  %v5280_v10 = vmul.f32 %v5199_v14, %v5199_v14  ;;  %v1982_v38 = vsel %vm631_vm2, %v1980_v37, %v1981_v44 }
 0x18c   : > { %v5261_v6 = vadd.f32 %v2252_v31, %v2076_v50  ;;  %v950_v11 = vrot.slane %v824_v49, 2  ;;  %v1165_v23 = vmul.f32 %v5143_v1, %v3502_v24  ;;  %v512_v51 = vmul.f32 %v5102_v42, %v3490_v18 }
 0x18d   : > { %v1424_v56 = vadd.f32 %v1329_v58, %v1212_v4  ;;  %v597_v25 = vmul.f32 %v5104_v29, %v3492_v19  ;;  %v2254_v17 = vsel %vm876_vm1, %v2252_v31, %v2253_v15  ;;  %v1602_v21 = vrot.slane %v1477_v5, 2 }
 0x18e   : > { %2916 = vst.msk [vmem:[%s3649_s18 + $0xd9] sm:$0x80] %vm2872_vm3, %v5261_v6  ;;  %v951_v30 = vsel %vm876_vm1, %v948_v53, %v950_v11  ;;  %v825_v37 = vmul.f32 %v5104_v29, %v3494_v20  ;;  %v2130_v16 = vmul.f32 %v3522_v35, %v5285_v8  ;;  %v2750_v42 = vrot.slane %v5280_v10, 7 }
 0x18f   : > { %v1700_v26 = vadd.f32 %v1601_v13, %v1424_v56  ;;  %v1049_v55 = vadd.f32 %v951_v30, %v772_v52  ;;  %v677_v47 = vrot.slane %v597_v25, 1  ;;  %v1166_v43 = vmul.f32 %v5213_v63, %v3502_v24 }
 0x190   : > { %v952_v22 = vrot.slane %v825_v37, 2  ;;  %v1251_v53 = vmul.f32 %v5206_v9, %v3510_v28  ;;  %v1478_v58 = vmul.f32 %v5206_v9, %v3516_v32  ;;  %v2570_v60 = vsel %vm257_vm0, %v2474_v45, 0.0  ;;  %v5348_v37 = vld [vmem:[#allocation2 + $0x230] sm:$0xff] }
 0x191   : > { %v1865_v0 = vadd.f32 %v1817_v40, %v1700_v26  ;;  %v1213_v27 = vadd.f32 %v1165_v23, %v1049_v55  ;;  %v773_v50 = vadd.f32 %v677_v47, %v512_v51  ;;  %v1603_v7 = vsel %vm876_vm1, %v1600_v39, %v1602_v21  ;;  %v1766_v26 = vld [vmem:[#allocation2 + $0x220] sm:$0xff] }
 0x192   : > { %v1818_v4 = vmul.f32 %v3518_v33, %v5232_v62  ;;  %v2255_v41 = vrot.slane %v2130_v16, 2  ;;  %v1330_v56 = vrot.slane %v1251_v53, 1  ;;  %v2751_v40 = vsel %vm2406_vm5, %v2749_v61, %v2750_v42 }
 0x193   : > { %v2077_v36 = vadd.f32 %v1982_v38, %v1865_v0  ;;  %v1425_v63 = vadd.f32 %v1328_v12, %v1213_v27  ;;  %v1050_v13 = vadd.f32 %v952_v22, %v773_v50  ;;  %v2475_v49 = vrot.slane %v5239_v57, 7 }
 0x194   : > { %v5323_v39 = vmul.f32 %v3520_v34, %v5308_v46  ;;  %v598_v52 = vmul.f32 %v5143_v1, %v3492_v19  ;;  %v1604_v12 = vrot.slane %v1478_v58, 2  ;;  %v513_v38 = vmul.f32 %v5104_v29, %v3490_v18 }
 0x195   : > { %v5304_v31 = vadd.f32 %v2254_v17, %v2077_v36  ;;  %v1701_v5 = vadd.f32 %v1603_v7, %v1425_v63  ;;  %v1214_v45 = vadd.f32 %v1166_v43, %v1050_v13  ;;  %v2629_v11 = vmul.f32 %v5239_v57, %v5239_v57 }
 0x196   : > { %v5333_v61 = vmul.f32 %v3522_v35, %v5308_v46  ;;  %v678_v0 = vrot.slane %v598_v52, 1  ;;  %v5337_v23 = vmul.f32 %v5143_v1, %v3494_v20  ;;  %v2256_v19 = vsel %vm876_vm1, %v2253_v15, %v2255_v41 }
 0x197   : > { %2917 = vst.msk [vmem:[%s3649_s18 + $0xe1] sm:$0xff] %vm257_vm0, %v5304_v31  ;;  %v1866_v51 = vadd.f32 %v1818_v4, %v1701_v5  ;;  %v1426_v25 = vadd.f32 %v1330_v56, %v1214_v45  ;;  %v1819_v17 = vmul.f32 %v3518_v33, %v1766_v26  ;;  %v1983_v29 = vrot.slane %v5323_v39, 1 }
 0x198   : > { %v679_v30 = vsel %vm631_vm2, %v677_v47, %v678_v0  ;;  %v953_v57 = vrot.slane %v5337_v23, 2  ;;  %v5346_v21 = vmul.f32 %v5232_v62, %v3510_v28  ;;  %v1167_v16 = vmul.f32 %v5206_v9, %v3502_v24 }
 0x199   : > { %v2078_v36 = vadd.f32 %v1981_v44, %v1866_v51  ;;  %v1702_v15 = vadd.f32 %v1604_v12, %v1426_v25  ;;  %v774_v55 = vadd.f32 %v679_v30, %v513_v38  ;;  %v2257_v47 = vrot.slane %v5333_v61, 2  ;;  %v1769_v61 = vld [vmem:[#allocation2 + $0x238] sm:$0xff] }
 0x19a   : > { %v954_v43 = vsel %vm876_vm1, %v952_v22, %v953_v57  ;;  %v1331_v53 = vrot.slane %v5346_v21, 1  ;;  %v5359_v28 = vmul.f32 %v5232_v62, %v3516_v32  ;;  %v5365_v50 = vmul.f32 %v3520_v34, %v5348_v37 }
 0x19b   : > { %v5361_v27 = vadd.f32 %v2256_v19, %v2078_v36  ;;  %v1867_v3 = vadd.f32 %v1819_v17, %v1702_v15  ;;  %v1051_v44 = vadd.f32 %v954_v43, %v774_v55  ;;  %v2571_v9 = vadd.f32 %v2570_v60, %v5160_v54 }
 0x19c   : > { %v2847_v58 = vsel %vm257_vm0, %v2751_v40, 0.0  ;;  %v1332_v22 = vsel %vm631_vm2, %v1330_v56, %v1331_v53  ;;  %v1605_v7 = vrot.slane %v5359_v28, 2  ;;  %v5379_v34 = vmul.f32 %v3522_v35, %v5348_v37 }
 0x19d   : > { %2918 = vst.msk [vmem:[%s3649_s18 + $0xe9] sm:$0x7f] %vm2875_vm4, %v5361_v27  ;;  %v2079_v4 = vadd.f32 %v1983_v29, %v1867_v3  ;;  %v1215_v63 = vadd.f32 %v1167_v16, %v1051_v44  ;;  %v514_v54 = vmul.f32 %v5143_v1, %v3490_v18  ;;  %v2476_v60 = vsel %vm2406_vm5, %v2473_v2, %v2475_v49 }
 0x19e   : > { %v2752_v41 = vrot.slane %v2629_v11, 7  ;;  %v2630_v13 = vmul.f32 %v5261_v6, %v5261_v6  ;;  %v2631_v56 = vmul.f32 %v5304_v31, %v5304_v31  ;;  %v1606_v39 = vsel %vm876_vm1, %v1604_v12, %v1605_v7 }
 0x19f   : > { %v5390_v40 = vadd.f32 %v2257_v47, %v2079_v4  ;;  %v1427_v26 = vadd.f32 %v1332_v22, %v1215_v63  ;;  %v1984_v52 = vrot.slane %v5365_v50, 1  ;;  %v2477_v18 = vrot.slane %v5261_v6, 7 }
 0x1a0   : > { %v2478_v1 = vrot.slane %v5304_v31, 7  ;;  %v1820_v14 = vmul.f32 %v3518_v33, %v5308_v46  ;;  %v827_v2 = vmul.f32 %v5183_v59, %v3494_v20  ;;  %v2848_v49 = vadd.f32 %v2847_v58, %v5171_v48 }
 0x1a1   : > { %v2572_v5 = vsel %vm257_vm0, %v2476_v60, 0.0  ;;  %2919 = vst.msk [vmem:[%s3649_s18 + $0xe9] sm:$0x80] %vm2872_vm3, %v5390_v40  ;;  %v2258_v45 = vrot.slane %v5379_v34, 2  ;;  %v775_v12 = vadd.f32 %v678_v0, %v514_v54  ;;  %v2753_v6 = vsel %vm2406_vm5, %v2750_v42, %v2752_v41 }
 0x1a2   : > { %v2754_v31 = vrot.slane %v2630_v13, 7  ;;  %v1703_v38 = vadd.f32 %v1606_v39, %v1427_v26  ;;  %v955_v46 = vrot.slane %v827_v2, 2  ;;  %v2755_v11 = vrot.slane %v2631_v56, 7 }
 0x1a3   : > { %v1985_v20 = vsel %vm631_vm2, %v1983_v29, %v1984_v52  ;;  %v1168_v48 = vmul.f32 %v5232_v62, %v3502_v24  ;;  %v1480_v59 = vmul.f32 %v5285_v8, %v3516_v32  ;;  %v2479_v0 = vsel %vm2406_vm5, %v2477_v18, %v2478_v1 }
 0x1a4   : > { %v1868_v10 = vadd.f32 %v1820_v14, %v1703_v38  ;;  %v956_v42 = vsel %vm876_vm1, %v953_v57, %v955_v46  ;;  %v2632_v23 = vmul.f32 %v5361_v27, %v5361_v27  ;;  %v2259_v51 = vsel %vm876_vm1, %v2257_v47, %v2258_v45 }
 0x1a5   : > { %v1052_v19 = vadd.f32 %v956_v42, %v775_v12  ;;  %v1607_v25 = vrot.slane %v1480_v59, 2  ;;  %v5566_v24 = vmov 0.0   ;;  %v2573_v32 = vadd.f32 %v2572_v5, %v2571_v9 }
 0x1a6   : > { %256 = vst.msk [vmem:[%s5423_s23] sm:$0x3] %vm255_vm6, %v5566_v24  ;;  %v2080_v62 = vadd.f32 %v1985_v20, %v1868_v10  ;;  %v2133_v8 = vmul.f32 %v3522_v35, %v1769_v61  ;;  %v2849_v17 = vsel %vm257_vm0, %v2753_v6, 0.0  ;;  %v2756_v29 = vsel %vm2406_vm5, %v2754_v31, %v2755_v11 }
 0x1a7   : > { %v2480_v30 = vrot.slane %v5361_v27, 7  ;;  %v1216_v57 = vadd.f32 %v1168_v48, %v1052_v19  ;;  %v2850_v36 = vadd.f32 %v2849_v17, %v2848_v49  ;;  %v2574_v15 = vsel %vm257_vm0, %v2479_v0, 0.0 }
 0x1a8   : > { %v2356_v55 = vadd.f32 %v2259_v51, %v2080_v62  ;;  %v1608_v16 = vsel %vm876_vm1, %v1605_v7, %v1607_v25  ;;  %v2757_v47 = vrot.slane %v2632_v23, 7  ;;  %v2633_v43 = vmul.f32 %v5390_v40, %v5390_v40 }
 0x1a9   : > { %v1428_v35 = vadd.f32 %v1331_v53, %v1216_v57  ;;  %v1821_v28 = vmul.f32 %v3518_v33, %v5348_v37  ;;  %v2575_v3 = vadd.f32 %v2574_v15, %v2573_v32  ;;  %v2851_v27 = vsel %vm257_vm0, %v2756_v29, 0.0 }
 0x1aa   : > { %v2634_v44 = vmul.f32 %v2356_v55, %v2356_v55  ;;  %2920 = vst.msk [vmem:[%s3649_s18 + $0xf1] sm:$0xff] %vm257_vm0, %v2356_v55  ;;  %v2260_v9 = vrot.slane %v2133_v8, 2  ;;  %v2481_v58 = vsel %vm2406_vm5, %v2478_v1, %v2480_v30  ;;  %v2482_v22 = vrot.slane %v5390_v40, 7 }
 0x1ab   : > { %v2483_v7 = vrot.slane %v2356_v55, 7  ;;  %v1704_v4 = vadd.f32 %v1608_v16, %v1428_v35  ;;  %v2852_v63 = vadd.f32 %v2851_v27, %v2850_v36  ;;  %v2758_v21 = vsel %vm2406_vm5, %v2755_v11, %v2757_v47 }
 0x1ac   : > { %v2759_v53 = vrot.slane %v2633_v43, 7  ;;  %v2760_v34 = vrot.slane %v2634_v44, 7  ;;  %v2576_v37 = vsel %vm257_vm0, %v2481_v58, 0.0  ;;  %v2261_v54 = vsel %vm876_vm1, %v2258_v45, %v2260_v9 }
 0x1ad   : > { %v1869_v33 = vadd.f32 %v1821_v28, %v1704_v4  ;;  %v2577_v60 = vadd.f32 %v2576_v37, %v2575_v3  ;;  %v2484_v41 = vsel %vm2406_vm5, %v2482_v22, %v2483_v7  ;;  %v2853_v56 = vsel %vm257_vm0, %v2758_v21, 0.0  ;;  %v2865_v23 = vld [vmem:[%s5423_s23] sm:$0x1]  ;;  %v2869_v25 = vld [vmem:[%s5423_s23 + $0x1] sm:$0x1] }
 0x1ae   : > { %v2854_v40 = vadd.f32 %v2853_v56, %v2852_v63  ;;  %v2761_v26 = vsel %vm2406_vm5, %v2759_v53, %v2760_v34  ;;  %v2578_v18 = vsel %vm257_vm0, %v2484_v41, 0.0 }
 0x1af   : > { %v2081_v13 = vadd.f32 %v1984_v52, %v1869_v33  ;;  %v2579_v1 = vadd.f32 %v2578_v18, %v2577_v60  ;;  %v2855_v49 = vsel %vm257_vm0, %v2761_v26, 0.0 }
 0x1b0   : > { %v2856_v5 = vadd.f32 %v2855_v49, %v2854_v40 }
 0x1b1   : > { %v2357_v39 = vadd.f32 %v2261_v54, %v2081_v13 }
 0x1b3   : > { %v2485_v14 = vrot.slane %v2357_v39, 7  ;;  %v2635_v2 = vmul.f32 %v2357_v39, %v2357_v39  ;;  %2921 = vst.msk [vmem:[%s3649_s18 + $0xf9] sm:$0x7f] %vm2875_vm4, %v2357_v39 }
 0x1b5   : > { %v2486_v45 = vsel %vm2406_vm5, %v2483_v7, %v2485_v14  ;;  %v2762_v50 = vrot.slane %v2635_v2, 7 }
 0x1b6   : > { %v2580_v52 = vsel %vm257_vm0, %v2486_v45, 0.0 }
 0x1b7   : > { %v2763_v12 = vsel %vm2406_vm5, %v2760_v34, %v2762_v50  ;;  %v2581_v6 = vadd.f32 %v2580_v52, %v2579_v1 }
 0x1b8   : > { %v2857_v31 = vsel %vm257_vm0, %v2763_v12, 0.0 }
 0x1b9   : > { %v2582_v38 = vrot.slane %v2581_v6, 4  ;;  %v2858_v46 = vadd.f32 %v2857_v31, %v2856_v5 }
 0x1bb   : > { %v2583_v11 = vadd.f32 %v2582_v38, %v2581_v6  ;;  %v2859_v20 = vrot.slane %v2858_v46, 4 }
 0x1bd   : > { %v2584_v48 = vrot.slane %v2583_v11, 2  ;;  %v2860_v59 = vadd.f32 %v2859_v20, %v2858_v46 }
 0x1bf   : > { %v2585_v61 = vadd.f32 %v2584_v48, %v2583_v11  ;;  %v2861_v0 = vrot.slane %v2860_v59, 2 }
 0x1c1   : > { %v2586_v10 = vrot.slane %v2585_v61, 1  ;;  %v2862_v42 = vadd.f32 %v2861_v0, %v2860_v59 }
 0x1c3   : > { %v2587_v51 = vadd.f32 %v2586_v10, %v2585_v61  ;;  %v2863_v19 = vrot.slane %v2862_v42, 1 }
 0x1c5   : > { %v2866_v24 = vadd.f32 %v2865_v23, %v2587_v51  ;;  %v2864_v32 = vadd.f32 %v2863_v19, %v2862_v42 }
 0x1c7   : > { %2868 = vst.msk [vmem:[%s5423_s23] sm:$0x1] %vm2867_vm7, %v2866_v24  ;;  %v2870_v62 = vadd.f32 %v2869_v25, %v2864_v32 }
 0x1c9   : > { %2871 = vst.msk [vmem:[%s5423_s23 + $0x1] sm:$0x1] %vm2867_vm7, %v2870_v62 }
 0x1ca   : > { %3165 = shalt.err (!%p3162_p5)
}
 0x1cb   : > { %s3166_s8 = scalar_lea.hbm %s2944_s30, 32  ;;  %s3170_s11 = scalar_lea.hbm %s5507_s2, 64 }
 0x1cc   : > { %p3167_p6 = scmp.ne.s32.totalorder %s2944_s30, %s3166_s8  ;;  %p3171_p10 = scmp.lt.s32.totalorder %s2944_s30, %s5507_s2 }
 0x1cd   : > { %p3172_p11 = scmp.lt.s32.totalorder %s3170_s11, %s3166_s8 }
 0x1ce   : > { %p3168_p7 = pnand %p3167_p6, %p3292_p4 }
 0x1cf   : > { %p3173_p12 = por %p3172_p11, %p3171_p10 }
 0x1d0   : > { %p3169_p9 = pneg %p3168_p7 }
 0x1d2   : > { %p3174_p13 = pnand %p3173_p12, %p3169_p9 }
 0x1d4   : > { %3177 = shalt.err (!%p3174_p13)
}
 0x1d5   : > { %3096 = dma.vmem_to_hbm [thread:$0]  (%p3292_p4), %s2947_s27, 32, %s2944_s30, %s2923_s4  }
 0x1d6 PF: > { %p3102_p0 = scmp.ge.s32.totalorder %s3228_s17, 2  ;;  %s2962_s21 = sand.u32 1, %s3208_s12  }
 0x1d7   : > { %s2963_s23 = scalar_lea.sflag [#allocation4], %s2962_s21 }
 0x1d8   : > { %p3099_p1 = pnand %p3102_p0, %p3299_p8 }
 0x1da   : > { %p3100_p2 = pneg %p3099_p1 }
 0x1dc   : > { %3203 = dma.done.wait (%p3100_p2), %s2963_s23, 32  }
 0x1dd   : > { %3205 = vsyncadd (%p3100_p2), %s2963_s23, 4294967264  ;;  %s17_s17 = sadd.s32 1, %s3228_s17   ;;  %s5567_s12 = smov %s3212_s13 }
 0x1de   : > { %p14_p3 = scmp.ge.s32.totalorder %s17_s17, 4   ;;  %s5568_s13 = smov %s3216_s14 }
 0x1df   : > { %s5569_s14 = smov %s3305_s25  ;;  %s5570_s15 = smov %s3224_s16 }
 0x1e0   : > { %s5571_s16 = smov %s5573_s20  ;;  %16 = sbr.rel (!%p14_p3) target bundleno = 4 (0x4), region = 84 }
 0x1e5   :  { %2980 = vsyncpa [#allocation4], 1 }
 0x1e6   :  { %2982 = vsyncpa [#allocation4 + $0x1], 1 }

</bundles_post_ra>
